<compile_context>
chip_gen: v7x
topology: tpu7x:2x2x1
jax: 0.10.0
libtpu: 0.0.40
codegen_flags: <defaults>
</compile_context>

<pallas_src>
import functools

import jax
import jax.numpy as jnp
from jax.experimental import pallas as pl
from jax.experimental.pallas import tpu as pltpu

# Model dimensions from the PyTorch module.
IN_F, H1, H2, OUT_F = 9605, 4800, 2400, 3

TILE = 512  # N / K tile size for the streamed matmuls.


def _round_up(x, m):
    return (x + m - 1) // m * m


# Padded (tile-aligned) dimensions.  Zero padding keeps the math exact:
# padded input columns are 0, padded weight rows/cols are 0, padded biases 0,
# so padded hidden activations are relu(0) = 0 and contribute nothing.
K1P = _round_up(IN_F, TILE)  # 9728
N1P = _round_up(H1, TILE)    # 5120
N2P = _round_up(H2, TILE)    # 2560


def _pad2(a, rows, cols):
    return jnp.pad(a, ((0, rows - a.shape[0]), (0, cols - a.shape[1])))


# ---------------------------------------------------------------------------
# Kernel 1: tiled  out = relu?(x @ W + b)  with f32 accumulator over K.
# ---------------------------------------------------------------------------
def _linear_kernel(x_ref, w_ref, b_ref, o_ref, acc_ref, *, apply_relu):
    k = pl.program_id(2)

    @pl.when(k == 0)
    def _init():
        acc_ref[...] = jnp.zeros_like(acc_ref)

    acc_ref[...] += jnp.dot(x_ref[...], w_ref[...],
                            preferred_element_type=jnp.float32)

    @pl.when(k == pl.num_programs(2) - 1)
    def _finish():
        out = acc_ref[...] + b_ref[...]
        if apply_relu:
            out = jnp.maximum(out, 0.0)
        o_ref[...] = out.astype(o_ref.dtype)


def _linear(x, w, b, *, apply_relu, tm, tn=TILE, tk=TILE):
    M, K = x.shape
    _, N = w.shape
    grid = (M // tm, N // tn, K // tk)
    kernel = functools.partial(_linear_kernel, apply_relu=apply_relu)
    return pl.pallas_call(
        kernel,
        out_shape=jax.ShapeDtypeStruct((M, N), jnp.float32),
        grid_spec=pltpu.PrefetchScalarGridSpec(
            num_scalar_prefetch=0,
            grid=grid,
            in_specs=[
                pl.BlockSpec((tm, tk), lambda i, j, k: (i, k)),   # x tile
                pl.BlockSpec((tk, tn), lambda i, j, k: (k, j)),   # W tile
                pl.BlockSpec((1, tn), lambda i, j, k: (0, j)),    # bias tile
            ],
            out_specs=pl.BlockSpec((tm, tn), lambda i, j, k: (i, j)),
            scratch_shapes=[pltpu.VMEM((tm, tn), jnp.float32)],
        ),
        compiler_params=pltpu.CompilerParams(
            dimension_semantics=("parallel", "parallel", "arbitrary")),
        cost_estimate=pl.CostEstimate(
            flops=2 * M * N * K,
            transcendentals=0,
            bytes_accessed=4 * (M * K + K * N + M * N + N)),
    )(x, w, b)


# ---------------------------------------------------------------------------
# Kernel 2: fc4 (2400p -> 3) fused with log_softmax(dim=1).
# ---------------------------------------------------------------------------
def _final_kernel(x_ref, w_ref, b_ref, o_ref):
    logits = jnp.dot(x_ref[...], w_ref[...],
                     preferred_element_type=jnp.float32) + b_ref[...]
    # Numerically stable log_softmax over the 3 classes (dim=1).
    m = jnp.max(logits, axis=1, keepdims=True)
    shifted = logits - m
    lse = jnp.log(jnp.sum(jnp.exp(shifted), axis=1, keepdims=True))
    o_ref[...] = shifted - lse


def _final(x, w, b, *, tm):
    M, K = x.shape
    _, N = w.shape  # N == 3
    grid = (M // tm,)
    return pl.pallas_call(
        _final_kernel,
        out_shape=jax.ShapeDtypeStruct((M, N), jnp.float32),
        grid_spec=pltpu.PrefetchScalarGridSpec(
            num_scalar_prefetch=0,
            grid=grid,
            in_specs=[
                pl.BlockSpec((tm, K), lambda i: (i, 0)),   # full-K batch tile
                pl.BlockSpec((K, N), lambda i: (0, 0)),    # whole W3 (small)
                pl.BlockSpec((1, N), lambda i: (0, 0)),    # bias
            ],
            out_specs=pl.BlockSpec((tm, N), lambda i: (i, 0)),
        ),
        compiler_params=pltpu.CompilerParams(
            dimension_semantics=("parallel",)),
        cost_estimate=pl.CostEstimate(
            flops=2 * M * N * K + 6 * M * N,
            transcendentals=2 * M * N,
            bytes_accessed=4 * (M * K + K * N + M * N + N)),
    )(x, w, b)


# ---------------------------------------------------------------------------
# Parameter prep (done once, outside the forward call).
# ---------------------------------------------------------------------------
def prepare_params(params):
    """Transpose PyTorch (out,in) weights to (in,out), zero-pad to tile
    multiples, and reshape biases to (1, out)."""
    w1, b1, w2, b2, w3, b3 = params
    w1p = _pad2(w1.T.astype(jnp.float32), K1P, N1P)
    b1p = _pad2(b1.reshape(1, -1).astype(jnp.float32), 1, N1P)
    w2p = _pad2(w2.T.astype(jnp.float32), N1P, N2P)
    b2p = _pad2(b2.reshape(1, -1).astype(jnp.float32), 1, N2P)
    w3p = _pad2(w3.T.astype(jnp.float32), N2P, OUT_F)
    b3p = b3.reshape(1, -1).astype(jnp.float32)
    return (w1p, b1p, w2p, b2p, w3p, b3p)


@jax.jit
def nural_netwoek_1hl2gt_forward(x, prepared):
    """Forward: Linear(9605,4800)->ReLU->Linear(4800,2400)->ReLU->Linear(2400,3)->log_softmax."""
    w1p, b1p, w2p, b2p, w3p, b3p = prepared
    B = x.shape[0]

    if B >= 128:
        tm = 128
        Bp = _round_up(B, tm)
    else:
        tm = max(_round_up(B, 8), 8)
        Bp = tm

    # Zero-pad batch (to the batch tile) and the input-feature axis (to K1P).
    xp = jnp.pad(x.astype(jnp.float32), ((0, Bp - B), (0, K1P - IN_F)))

    h1 = _linear(xp, w1p, b1p, apply_relu=True, tm=tm)   # (Bp, N1P)
    h2 = _linear(h1, w2p, b2p, apply_relu=True, tm=tm)   # (Bp, N2P)
    out = _final(h2, w3p, b3p, tm=tm)                    # (Bp, 3)
    return out[:B]


# ---------------------------------------------------------------------------
# Demo / self-test
# ---------------------------------------------------------------------------
def init_params(key):
    """PyTorch nn.Linear default init: U(-1/sqrt(fan_in), 1/sqrt(fan_in))."""
    def linear_init(k, out_f, in_f):
        kw, kb = jax.random.split(k)
        bound = 1.0 / jnp.sqrt(jnp.float32(in_f))
        w = jax.random.uniform(kw, (out_f, in_f), jnp.float32, -bound, bound)
        b = jax.random.uniform(kb, (out_f,), jnp.float32, -bound, bound)
        return w, b

    k1, k2, k3 = jax.random.split(key, 3)
    w1, b1 = linear_init(k1, H1, IN_F)     # fc1: Linear(9605, 4800)
    w2, b2 = linear_init(k2, H2, H1)       # fc2: Linear(4800, 2400)
    w3, b3 = linear_init(k3, OUT_F, H2)    # fc4: Linear(2400, 3)
    return (w1, b1, w2, b2, w3, b3)


def reference_forward(x, params):
    w1, b1, w2, b2, w3, b3 = params
    with jax.default_matmul_precision("highest"):
        h1 = jnp.maximum(x @ w1.T + b1, 0.0)
        h2 = jnp.maximum(h1 @ w2.T + b2, 0.0)
        logits = h2 @ w3.T + b3
    return jax.nn.log_softmax(logits, axis=1)


if __name__ == "__main__":
    key = jax.random.PRNGKey(0)
    k_params, k_x = jax.random.split(key)

    params = init_params(k_params)
    prepared = prepare_params(params)

    B = 4
    x = jax.random.normal(k_x, (B, IN_F), jnp.float32)

    out = nural_netwoek_1hl2gt_forward(x, prepared)
    out = jax.block_until_ready(out)

    assert out.shape == (B, OUT_F)

    # log_softmax rows must sum to 1 in probability space.
    row_sums = jnp.sum(jnp.exp(out), axis=1)
    assert bool(jnp.allclose(row_sums, 1.0, atol=1e-5))

    # Compare against a pure-JAX reference.
    ref = jax.block_until_ready(reference_forward(x, params))
    assert bool(jnp.allclose(out, ref, atol=5e-3, rtol=5e-3))

    print("KERNEL_OK")
</pallas_src>

<mosaic_0001>
module attributes {stable_mosaic.version = 11 : i64} {
  func.func @_linear_kernel(%arg0: i32, %arg1: i32, %arg2: i32, %arg3: memref<8x512xf32, #tpu.memory_space<vmem>>, %arg4: memref<512x512xf32, #tpu.memory_space<vmem>>, %arg5: memref<1x512xf32, #tpu.memory_space<vmem>>, %arg6: memref<8x512xf32, #tpu.memory_space<vmem>>, %arg7: memref<8x512xf32, #tpu.memory_space<vmem>>) attributes {dimension_semantics = [#tpu.dimension_semantics<parallel>, #tpu.dimension_semantics<parallel>, #tpu.dimension_semantics<arbitrary>], iteration_bounds = array<i64: 1, 10, 19>, scalar_prefetch = 0 : i64, scratch_operands = 1 : i64, tpu.core_type = #tpu.core_type<tc>, window_params = [{transform_indices = @transform_0, window_bounds = array<i64: 8, 512>}, {transform_indices = @transform_1, window_bounds = array<i64: 512, 512>}, {transform_indices = @transform_2, window_bounds = array<i64: 1, 512>}, {transform_indices = @transform_3, window_bounds = array<i64: 8, 512>}]} {
    %c0_i32 = arith.constant 0 : i32
    %0 = arith.cmpi eq, %arg2, %c0_i32 : i32
    %1 = arith.extui %0 : i1 to i32
    %c0_i32_0 = arith.constant 0 : i32
    %2 = arith.cmpi ne, %1, %c0_i32_0 : i32
    scf.if %2 {
      %cst_9 = arith.constant 0.000000e+00 : f32
      %12 = vector.broadcast %cst_9 : f32 to vector<8x512xf32>
      %c0_10 = arith.constant 0 : index
      %c0_11 = arith.constant 0 : index
      %13 = vector.load %arg7[%c0_10, %c0_11] : memref<8x512xf32, #tpu.memory_space<vmem>>, vector<8x512xf32>
      tpu.vector_store %arg7[%c0_10, %c0_11], %12 {strides = array<i32>} : memref<8x512xf32, #tpu.memory_space<vmem>>, vector<8x512xf32>,
    } else {
    }
    %c0 = arith.constant 0 : index
    %c0_1 = arith.constant 0 : index
    %3 = vector.load %arg7[%c0, %c0_1] : memref<8x512xf32, #tpu.memory_space<vmem>>, vector<8x512xf32>
    %c0_2 = arith.constant 0 : index
    %c0_3 = arith.constant 0 : index
    %4 = vector.load %arg3[%c0_2, %c0_3] : memref<8x512xf32, #tpu.memory_space<vmem>>, vector<8x512xf32>
    %c0_4 = arith.constant 0 : index
    %c0_5 = arith.constant 0 : index
    %5 = vector.load %arg4[%c0_4, %c0_5] : memref<512x512xf32, #tpu.memory_space<vmem>>, vector<512x512xf32>
    %cst = arith.constant dense<0.000000e+00> : vector<8x512xf32>
    %6 = tpu.matmul %4, %5, %cst {dimension_numbers = #tpu.dot_dimension_numbers<[1], [0], [0], [1], [0, 0, 1, 1], [], []>} : vector<8x512xf32>, vector<512x512xf32>, vector<8x512xf32> -> vector<8x512xf32>
    %7 = arith.addf %3, %6 : vector<8x512xf32>
    %c0_6 = arith.constant 0 : index
    %c0_7 = arith.constant 0 : index
    %8 = vector.load %arg7[%c0_6, %c0_7] : memref<8x512xf32, #tpu.memory_space<vmem>>, vector<8x512xf32>
    tpu.vector_store %arg7[%c0_6, %c0_7], %7 {strides = array<i32>} : memref<8x512xf32, #tpu.memory_space<vmem>>, vector<8x512xf32>,
    %c18_i32 = arith.constant 18 : i32
    %9 = arith.cmpi eq, %arg2, %c18_i32 : i32
    %10 = arith.extui %9 : i1 to i32
    %c0_i32_8 = arith.constant 0 : i32
    %11 = arith.cmpi ne, %10, %c0_i32_8 : i32
    scf.if %11 {
      %c0_9 = arith.constant 0 : index
      %c0_10 = arith.constant 0 : index
      %12 = vector.load %arg7[%c0_9, %c0_10] : memref<8x512xf32, #tpu.memory_space<vmem>>, vector<8x512xf32>
      %c0_11 = arith.constant 0 : index
      %c0_12 = arith.constant 0 : index
      %13 = vector.load %arg5[%c0_11, %c0_12] : memref<1x512xf32, #tpu.memory_space<vmem>>, vector<1x512xf32>
      %14 = vector.broadcast %13 : vector<1x512xf32> to vector<8x512xf32>
      %15 = arith.addf %12, %14 : vector<8x512xf32>
      %cst_13 = arith.constant 0.000000e+00 : f32
      %16 = vector.broadcast %cst_13 : f32 to vector<8x512xf32>
      %17 = arith.maximumf %15, %16 : vector<8x512xf32>
      %c0_14 = arith.constant 0 : index
      %c0_15 = arith.constant 0 : index
      %18 = vector.load %arg6[%c0_14, %c0_15] : memref<8x512xf32, #tpu.memory_space<vmem>>, vector<8x512xf32>
      tpu.vector_store %arg6[%c0_14, %c0_15], %17 {strides = array<i32>} : memref<8x512xf32, #tpu.memory_space<vmem>>, vector<8x512xf32>,
    } else {
    }
    return
  }
  func.func @transform_0(%arg0: i32, %arg1: i32, %arg2: i32) -> (i32, i32) {
    %c0_i32 = arith.constant 0 : i32
    return %arg0, %arg2 : i32, i32
  }
  func.func @transform_1(%arg0: i32, %arg1: i32, %arg2: i32) -> (i32, i32) {
    %c0_i32 = arith.constant 0 : i32
    return %arg2, %arg1 : i32, i32
  }
  func.func @transform_2(%arg0: i32, %arg1: i32, %arg2: i32) -> (i32, i32) {
    %c0_i32 = arith.constant 0 : i32
    %c0_i32_0 = arith.constant 0 : i32
    return %c0_i32, %arg1 : i32, i32
  }
  func.func @transform_3(%arg0: i32, %arg1: i32, %arg2: i32) -> (i32, i32) {
    %c0_i32 = arith.constant 0 : i32
    return %arg0, %arg1 : i32, i32
  }
}

module attributes {stable_mosaic.version = 11 : i64} {
  func.func @_linear_kernel(%arg0: i32, %arg1: i32, %arg2: i32, %arg3: memref<8x512xf32, #tpu.memory_space<vmem>>, %arg4: memref<512x512xf32, #tpu.memory_space<vmem>>, %arg5: memref<1x512xf32, #tpu.memory_space<vmem>>, %arg6: memref<8x512xf32, #tpu.memory_space<vmem>>, %arg7: memref<8x512xf32, #tpu.memory_space<vmem>>) attributes {dimension_semantics = [#tpu.dimension_semantics<parallel>, #tpu.dimension_semantics<parallel>, #tpu.dimension_semantics<arbitrary>], iteration_bounds = array<i64: 1, 5, 10>, scalar_prefetch = 0 : i64, scratch_operands = 1 : i64, tpu.core_type = #tpu.core_type<tc>, window_params = [{transform_indices = @transform_0, window_bounds = array<i64: 8, 512>}, {transform_indices = @transform_1, window_bounds = array<i64: 512, 512>}, {transform_indices = @transform_2, window_bounds = array<i64: 1, 512>}, {transform_indices = @transform_3, window_bounds = array<i64: 8, 512>}]} {
    %c0_i32 = arith.constant 0 : i32
    %0 = arith.cmpi eq, %arg2, %c0_i32 : i32
    %1 = arith.extui %0 : i1 to i32
    %c0_i32_0 = arith.constant 0 : i32
    %2 = arith.cmpi ne, %1, %c0_i32_0 : i32
    scf.if %2 {
      %cst_9 = arith.constant 0.000000e+00 : f32
      %12 = vector.broadcast %cst_9 : f32 to vector<8x512xf32>
      %c0_10 = arith.constant 0 : index
      %c0_11 = arith.constant 0 : index
      %13 = vector.load %arg7[%c0_10, %c0_11] : memref<8x512xf32, #tpu.memory_space<vmem>>, vector<8x512xf32>
      tpu.vector_store %arg7[%c0_10, %c0_11], %12 {strides = array<i32>} : memref<8x512xf32, #tpu.memory_space<vmem>>, vector<8x512xf32>,
    } else {
    }
    %c0 = arith.constant 0 : index
    %c0_1 = arith.constant 0 : index
    %3 = vector.load %arg7[%c0, %c0_1] : memref<8x512xf32, #tpu.memory_space<vmem>>, vector<8x512xf32>
    %c0_2 = arith.constant 0 : index
    %c0_3 = arith.constant 0 : index
    %4 = vector.load %arg3[%c0_2, %c0_3] : memref<8x512xf32, #tpu.memory_space<vmem>>, vector<8x512xf32>
    %c0_4 = arith.constant 0 : index
    %c0_5 = arith.constant 0 : index
    %5 = vector.load %arg4[%c0_4, %c0_5] : memref<512x512xf32, #tpu.memory_space<vmem>>, vector<512x512xf32>
    %cst = arith.constant dense<0.000000e+00> : vector<8x512xf32>
    %6 = tpu.matmul %4, %5, %cst {dimension_numbers = #tpu.dot_dimension_numbers<[1], [0], [0], [1], [0, 0, 1, 1], [], []>} : vector<8x512xf32>, vector<512x512xf32>, vector<8x512xf32> -> vector<8x512xf32>
    %7 = arith.addf %3, %6 : vector<8x512xf32>
    %c0_6 = arith.constant 0 : index
    %c0_7 = arith.constant 0 : index
    %8 = vector.load %arg7[%c0_6, %c0_7] : memref<8x512xf32, #tpu.memory_space<vmem>>, vector<8x512xf32>
    tpu.vector_store %arg7[%c0_6, %c0_7], %7 {strides = array<i32>} : memref<8x512xf32, #tpu.memory_space<vmem>>, vector<8x512xf32>,
    %c9_i32 = arith.constant 9 : i32
    %9 = arith.cmpi eq, %arg2, %c9_i32 : i32
    %10 = arith.extui %9 : i1 to i32
    %c0_i32_8 = arith.constant 0 : i32
    %11 = arith.cmpi ne, %10, %c0_i32_8 : i32
    scf.if %11 {
      %c0_9 = arith.constant 0 : index
      %c0_10 = arith.constant 0 : index
      %12 = vector.load %arg7[%c0_9, %c0_10] : memref<8x512xf32, #tpu.memory_space<vmem>>, vector<8x512xf32>
      %c0_11 = arith.constant 0 : index
      %c0_12 = arith.constant 0 : index
      %13 = vector.load %arg5[%c0_11, %c0_12] : memref<1x512xf32, #tpu.memory_space<vmem>>, vector<1x512xf32>
      %14 = vector.broadcast %13 : vector<1x512xf32> to vector<8x512xf32>
      %15 = arith.addf %12, %14 : vector<8x512xf32>
      %cst_13 = arith.constant 0.000000e+00 : f32
      %16 = vector.broadcast %cst_13 : f32 to vector<8x512xf32>
      %17 = arith.maximumf %15, %16 : vector<8x512xf32>
      %c0_14 = arith.constant 0 : index
      %c0_15 = arith.constant 0 : index
      %18 = vector.load %arg6[%c0_14, %c0_15] : memref<8x512xf32, #tpu.memory_space<vmem>>, vector<8x512xf32>
      tpu.vector_store %arg6[%c0_14, %c0_15], %17 {strides = array<i32>} : memref<8x512xf32, #tpu.memory_space<vmem>>, vector<8x512xf32>,
    } else {
    }
    return
  }
  func.func @transform_0(%arg0: i32, %arg1: i32, %arg2: i32) -> (i32, i32) {
    %c0_i32 = arith.constant 0 : i32
    return %arg0, %arg2 : i32, i32
  }
  func.func @transform_1(%arg0: i32, %arg1: i32, %arg2: i32) -> (i32, i32) {
    %c0_i32 = arith.constant 0 : i32
    return %arg2, %arg1 : i32, i32
  }
  func.func @transform_2(%arg0: i32, %arg1: i32, %arg2: i32) -> (i32, i32) {
    %c0_i32 = arith.constant 0 : i32
    %c0_i32_0 = arith.constant 0 : i32
    return %c0_i32, %arg1 : i32, i32
  }
  func.func @transform_3(%arg0: i32, %arg1: i32, %arg2: i32) -> (i32, i32) {
    %c0_i32 = arith.constant 0 : i32
    return %arg0, %arg1 : i32, i32
  }
}

module attributes {stable_mosaic.version = 11 : i64} {
  func.func @_final_kernel(%arg0: i32, %arg1: memref<8x2560xf32, #tpu.memory_space<vmem>>, %arg2: memref<2560x3xf32, #tpu.memory_space<vmem>>, %arg3: memref<1x3xf32, #tpu.memory_space<vmem>>, %arg4: memref<8x3xf32, #tpu.memory_space<vmem>>) attributes {dimension_semantics = [#tpu.dimension_semantics<parallel>], iteration_bounds = array<i64: 1>, scalar_prefetch = 0 : i64, scratch_operands = 0 : i64, tpu.core_type = #tpu.core_type<tc>, window_params = [{transform_indices = @transform_0, window_bounds = array<i64: 8, 2560>}, {pipeline_mode = #tpu.pipeline_mode<synchronous>, transform_indices = @transform_1, window_bounds = array<i64: 2560, 3>}, {pipeline_mode = #tpu.pipeline_mode<synchronous>, transform_indices = @transform_2, window_bounds = array<i64: 1, 3>}, {transform_indices = @transform_3, window_bounds = array<i64: 8, 3>}]} {
    %c0 = arith.constant 0 : index
    %c0_0 = arith.constant 0 : index
    %0 = vector.load %arg1[%c0, %c0_0] : memref<8x2560xf32, #tpu.memory_space<vmem>>, vector<8x2560xf32>
    %c0_1 = arith.constant 0 : index
    %c0_2 = arith.constant 0 : index
    %1 = vector.load %arg2[%c0_1, %c0_2] : memref<2560x3xf32, #tpu.memory_space<vmem>>, vector<2560x3xf32>
    %cst = arith.constant dense<0.000000e+00> : vector<8x3xf32>
    %2 = tpu.matmul %0, %1, %cst {dimension_numbers = #tpu.dot_dimension_numbers<[1], [0], [0], [1], [0, 0, 1, 1], [], []>} : vector<8x2560xf32>, vector<2560x3xf32>, vector<8x3xf32> -> vector<8x3xf32>
    %c0_3 = arith.constant 0 : index
    %c0_4 = arith.constant 0 : index
    %3 = vector.load %arg3[%c0_3, %c0_4] : memref<1x3xf32, #tpu.memory_space<vmem>>, vector<1x3xf32>
    %4 = vector.broadcast %3 : vector<1x3xf32> to vector<8x3xf32>
    %5 = arith.addf %2, %4 : vector<8x3xf32>
    %cst_5 = arith.constant dense<0xFF800000> : vector<8xf32>
    %6 = vector.multi_reduction <maximumf>, %5, %cst_5 [1] : vector<8x3xf32> to vector<8xf32>
    %7 = vector.shape_cast %6 : vector<8xf32> to vector<8x1xf32>
    %8 = vector.broadcast %7 : vector<8x1xf32> to vector<8x3xf32>
    %9 = arith.subf %5, %8 : vector<8x3xf32>
    %10 = math.exp %9 : vector<8x3xf32>
    %cst_6 = arith.constant dense<0.000000e+00> : vector<8xf32>
    %11 = vector.multi_reduction <add>, %10, %cst_6 [1] : vector<8x3xf32> to vector<8xf32>
    %12 = vector.shape_cast %11 : vector<8xf32> to vector<8x1xf32>
    %13 = math.log %12 : vector<8x1xf32>
    %14 = vector.broadcast %13 : vector<8x1xf32> to vector<8x3xf32>
    %15 = arith.subf %9, %14 : vector<8x3xf32>
    %c0_7 = arith.constant 0 : index
    %c0_8 = arith.constant 0 : index
    %16 = vector.load %arg4[%c0_7, %c0_8] : memref<8x3xf32, #tpu.memory_space<vmem>>, vector<8x3xf32>
    tpu.vector_store %arg4[%c0_7, %c0_8], %15 {strides = array<i32>} : memref<8x3xf32, #tpu.memory_space<vmem>>, vector<8x3xf32>,
    return
  }
  func.func @transform_0(%arg0: i32) -> (i32, i32) {
    %c0_i32 = arith.constant 0 : i32
    %c0_i32_0 = arith.constant 0 : i32
    return %arg0, %c0_i32 : i32, i32
  }
  func.func @transform_1(%arg0: i32) -> (i32, i32) {
    %c0_i32 = arith.constant 0 : i32
    %c0_i32_0 = arith.constant 0 : i32
    %c0_i32_1 = arith.constant 0 : i32
    return %c0_i32, %c0_i32_0 : i32, i32
  }
  func.func @transform_2(%arg0: i32) -> (i32, i32) {
    %c0_i32 = arith.constant 0 : i32
    %c0_i32_0 = arith.constant 0 : i32
    %c0_i32_1 = arith.constant 0 : i32
    return %c0_i32, %c0_i32_0 : i32, i32
  }
  func.func @transform_3(%arg0: i32) -> (i32, i32) {
    %c0_i32 = arith.constant 0 : i32
    %c0_i32_0 = arith.constant 0 : i32
    return %arg0, %c0_i32 : i32, i32
  }
}

</mosaic_0001>

<bundles_post_ra>
// kernel: nural_netwoek_1hl2gt_forward.4
= control target key start
LH: loop header
LB: loop body
LE: loop exit
PB: predicated region body
PF: predicated region fallthrough
CT: control target
= control target key end

     0   :  { %8 = vsyncpa [#allocation4], 0  ;;  %s1930_s0 = inlined_call_operand.vmem [shape: f32[8,5120], index: 0, kind: input, shape index: {}]   ;;  %s1931_s1 = inlined_call_operand.hbm [shape: f32[5120,2560], index: 1, kind: input, shape index: {}]   ;;  %s1932_s2 = inlined_call_operand.vmem [shape: f32[1,2560], index: 2, kind: input, shape index: {}]   ;;  %s1933_s3 = inlined_call_operand.vmem [shape: f32[8,2560], index: 3, kind: output, shape index: {}]  }
   0x1   :  { %10 = vsyncpa [#allocation4 + $0x1], 0  ;;  %s1496_s12 = smov 0   ;;  %s1498_s13 = smov 0  }
   0x2   :  { %s1500_s14 = smov 0   ;;  %s1502_s15 = smov 0  }
   0x3   :  { %s1504_s16 = smov 0   ;;  %s1506_s17 = smov 0  }
   0x4   :  { %s1508_s18 = smov 0   ;;  %s1510_s19 = smov 0  }
   0x5 LB: > { %s1017_s20 = sadd.s32 4294967295, %s1469_s19   ;;  %s28_s21 = sadd.s32 1, %s1461_s17  ;;  %s1469_s19 = sphi %s1510_s19, %s16_s19   ;;  %s1465_s18 = sphi %s1508_s18, %s1943_s18   ;;  %s1461_s17 = sphi %s1506_s17, %s1942_s17   ;;  %s1457_s16 = sphi %s1504_s16, %s1941_s16   ;;  %s1453_s15 = sphi %s1502_s15, %s1940_s15   ;;  %s1449_s14 = sphi %s1500_s14, %s1939_s14   ;;  %s1445_s13 = sphi %s1498_s13, %s1938_s13   ;;  %s1441_s12 = sphi %s1496_s12, %s1937_s12  }
   0x6   : > { %p29_p0 = scmp.ge.s32.totalorder %s28_s21, 10  ;;  %s31_s22 = sadd.s32 1, %s1465_s18 }
   0x7   : > { %s72_s23 = sadd.s32 1, %s1449_s14  ;;  %p79_p1 = scmp.ne.s32.totalorder %s1449_s14, %s1445_s13 }
   0x8   : > { %s1945_s21 = smov (%p29_p0, %s28_s21), 0  ;;  %s1947_s22 = smov (!%p29_p0, %s31_s22), %s1465_s18 }
   0x9   : > { %s67_s24 = ssub.s32 %s1461_s17, %s1945_s21  ;;  %p80_p2 = scmp.eq.s32.totalorder %s1469_s19, 0 }
   0xa   : > { %p33_p3 = scmp.ge.s32.totalorder %s1947_s22, 5  ;;  %p85_p4 = scmp.ne.s32.totalorder %s1445_s13, %s1441_s12 }
   0xb   : > { %p1547_p5 = por %p80_p2, %p79_p1  ;;  %p86_p6 = scmp.eq.s32.totalorder %s1017_s20, 0 }
   0xc   : > { %s1949_s22 = smov (%p33_p3, %s1947_s22), 0  ;;  %p1304_p8 = scmp.lt.s32.totalorder %s1469_s19, 50 }
   0xd   : > { %p1553_p7 = por %p86_p6, %p85_p4  ;;  %s68_s27 = ssub.s32 %s1465_s18, %s1949_s22 }
   0xe   : > { %s69_s28 = sor.u32 %s68_s27, %s67_s24  ;;  %s176_s29 = sand.u32 1, %s1449_s14  }
   0xf   : > { %p70_p9 = scmp.eq.s32.totalorder %s69_s28, 0  ;;  %s1021_s30 = sshll.u32 %s176_s29, 11 }
  0x10   : > { %s1023_s4 = sshll.u32 %s1465_s18, 2  ;;  %s1297_s6 = smul.u32 1280, %s1461_s17 }
  0x11   : > { %s1563_s5 = scalar_select %p70_p9, %s1449_s14, %s72_s23  }
  0x12   : > { %s180_s7 = scalar_lea.vmem [#allocation3], %s1021_s30  ;;  %p1568_p10 = pnand %p1304_p8, %p1547_p5 }
  0x13   : > { %s190_s8 = sshll.u32 %s180_s7, 4  ;;  %s187_s10 = sadd.s32 %s1297_s6, %s1023_s4  ;;  %s1572_s8 = int_to_ptr.vmem [resolvable:$true] %s190_s8 }
  0x14   : > { %s1025_s11 = sshll.u32 %s187_s10, 7  ;;  %s1579_s23 = scalar_lea.sflag [#allocation4], %s176_s29 }
  0x15   : > { %s1577_s24 = scalar_lea.hbm %s1931_s1, %s1025_s11  ;;  %p1375_p12 = pneg %p1568_p10 }
  0x16   : > { %s1373_s25 = scalar_lea.hbm %s1577_s24, 32768  ;;  %s1378_s30 = scalar_lea.hbm %s1931_s1, 1638400 }
  0x17   : > { %p1374_p11 = scmp.ne.s32.totalorder %s1577_s24, %s1373_s25  ;;  %p1379_p1 = scmp.lt.u32.totalorder %s1577_s24, %s1931_s1 }
  0x18   : > { %p1380_p2 = scmp.lt.u32.totalorder %s1378_s30, %s1373_s25  ;;  %p1382_p4 = scmp.lt.u32.totalorder %s1373_s25, %s1577_s24 }
  0x19   : > { %p1376_p13 = pnand %p1375_p12, %p1374_p11 }
  0x1a   : > { %p1381_p3 = por %p1380_p2, %p1379_p1 }
  0x1b   : > { %p1377_p0 = pneg %p1376_p13 }
  0x1c   : > { %p1383_p5 = por %p1382_p4, %p1381_p3 }
  0x1e   : > { %p1384_p6 = pnand %p1383_p5, %p1377_p0 }
  0x20   : > { %1387 = shalt.err (!%p1384_p6)
}
  0x21   : > { %s1388_s29 = scalar_lea.vmem %s1572_s8, 32768  ;;  %s1471_s7 = smov [#allocation3]  }
  0x22   : > { %p1389_p8 = scmp.ne.s32.totalorder %s1572_s8, %s1388_s29  ;;  %s1393_s10 = sshll.u32 %s1471_s7, 4  ;;  %s1394_s10 = int_to_ptr.vmem [resolvable:$false] %s1393_s10 }
  0x23   : > { %s1395_s11 = scalar_lea.vmem %s1394_s10, 65536  ;;  %p1396_p13 = scmp.lt.s32.totalorder %s1572_s8, %s1394_s10 }
  0x24   : > { %p1391_p9 = pnand %p1389_p8, %p1375_p12  ;;  %p1397_p1 = scmp.lt.s32.totalorder %s1395_s11, %s1388_s29 }
  0x26   : > { %p1392_p11 = pneg %p1391_p9  ;;  %p1398_p2 = por %p1397_p1, %p1396_p13 }
  0x28   : > { %p1399_p3 = pnand %p1398_p2, %p1392_p11 }
  0x2a   : > { %1402 = shalt.err (!%p1399_p3)
}
  0x2b   : > { %s1472_s12 = smov 2560   ;;  %s1473_s20 = smov 512  }
  0x2c   : > { %s1474_s25 = smov 32   ;;  %p1026_p12 = scmp.ge.s32.totalorder %s1469_s19, 1 }
  0x2d   : > { %1303 = dma.hbm_to_vmem [thread:$0]  (!%p1568_p10), %s1577_s24, 32768, %s1572_s8, %s1579_s23, %s1472_s12, %s1473_s20, %s1474_s25  }
  0x2e   : > { %p206_p0 = scmp.lt.s32.totalorder %s1469_s19, 51 }
  0x30   : > { %p207_p4 = pnand %p1026_p12, %p206_p0 }
  0x31   : > { %s212_s27 = sand.u32 (!%p207_p4), 1, %s1445_s13  }
  0x32   : > { %210 = sbr.rel (%p207_p4) target bundleno = 432 (0x1b0), region = 32  ;;  %s1027_s28 = sshll.u32 (!%p207_p4), %s212_s27, 11 }
  0x33   : > { %s213_s30 = scalar_lea.sflag (!%p207_p4), [#allocation4], %s212_s27  ;;  %s1610_s4 = scalar_lea.vmem (!%p207_p4), [#allocation3], %s1027_s28 }
  0x39   : > { %1436 = dma.done.wait (%p1553_p7), %s213_s30, 32768  }
  0x3a   : > { %1438 = vsyncadd (%p1553_p7), %s213_s30, 4294934528  ;;  %s1028_s9 = sshll.u32 %s1453_s15, 2  ;;  %s1030_s8 = sshll.u32 %s1457_s16, 2 }
  0x3b   : > { %p259_p10 = scmp.lt.s32.totalorder %s1028_s9, 39  ;;  %p269_p5 = scmp.lt.s32.totalorder %s1030_s8, 19 }
  0x3c   : > { %p1033_p7 = scmp.ne.s32.totalorder %s1453_s15, 0 }
  0x3d   : > { %s1951_s9 = smov (!%p259_p10, %s1028_s9), 39  ;;  %s1953_s8 = smov (!%p269_p5, %s1030_s8), 19 }
  0x3e   : > { %s1029_s24 = sshll.u32 %s1951_s9, 3  ;;  %s271_s10 = scalar_lea.vmem %s1932_s2, %s1953_s8  ;;  %v1475_v0 = vmov (!%p1033_p7), 0.0  }
  0x3f   : > { %s1623_s29 = scalar_lea.vmem %s1930_s0, %s1029_s24  ;;  %s1032_s11 = sshll.u32 %s1953_s8, 3  ;;  %287 = vst [vmem:[#allocation2] sm:$0xff] (!%p1033_p7), %v1475_v0  ;;  %288 = vst [vmem:[#allocation2 + $0x8] sm:$0xff] (!%p1033_p7), %v1475_v0 }
  0x40   : > { %s1633_s20 = scalar_lea.vmem %s1933_s3, %s1032_s11  ;;  %286 = sbr.rel (%p1033_p7) target bundleno = 71 (0x47), region = 40  ;;  %289 = vst [vmem:[#allocation2 + $0x10] sm:$0xff] (!%p1033_p7), %v1475_v0  ;;  %290 = vst [vmem:[#allocation2 + $0x18] sm:$0xff] (!%p1033_p7), %v1475_v0 }
  0x47 PF: > { %v300_v1 = vld [vmem:[%s1610_s4 + $0x8] sm:$0xff]  ;;  %v302_v3 = vld [vmem:[%s1610_s4 + $0x18] sm:$0xff]  ;;  %v299_v6 = vld [vmem:[%s1610_s4] sm:$0xff]  ;;  %p1034_p6 = scmp.ne.s32.totalorder %s1453_s15, 9 }
  0x48   : > { %v304_v2 = vld [vmem:[%s1610_s4 + $0x28] sm:$0xff]  ;;  %v306_v5 = vld [vmem:[%s1610_s4 + $0x38] sm:$0xff]  ;;  %v303_v7 = vld [vmem:[%s1610_s4 + $0x20] sm:$0xff] }
  0x49   : > { %v1037_v4 = vpack.c.bf16 %v304_v2, %v300_v1  ;;  %v1165_v8 = vpack.c.bf16 %v306_v5, %v302_v3  ;;  %v1039_v9 = vpack.c.bf16 %v303_v7, %v299_v6  ;;  %v301_v10 = vld [vmem:[%s1610_s4 + $0x10] sm:$0xff]  ;;  %v308_v12 = vld [vmem:[%s1610_s4 + $0x48] sm:$0xff]  ;;  %v310_v15 = vld [vmem:[%s1610_s4 + $0x58] sm:$0xff] }
  0x4a   : > { %v305_v11 = vld [vmem:[%s1610_s4 + $0x30] sm:$0xff]  ;;  %v312_v14 = vld [vmem:[%s1610_s4 + $0x68] sm:$0xff]  ;;  %v314_v16 = vld [vmem:[%s1610_s4 + $0x78] sm:$0xff] }
  0x4b   : > { %1038 = vmatprep.subr.bf16.mxu0 %v1037_v4  ;;  %v1167_v13 = vpack.c.bf16 %v305_v11, %v301_v10  ;;  %1166 = vmatprep.subr.bf16.mxu1 %v1165_v8  ;;  %v1041_v17 = vpack.c.bf16 %v312_v14, %v308_v12  ;;  %v1169_v18 = vpack.c.bf16 %v314_v16, %v310_v15  ;;  %v307_v19 = vld [vmem:[%s1610_s4 + $0x40] sm:$0xff]  ;;  %v309_v21 = vld [vmem:[%s1610_s4 + $0x50] sm:$0xff]  ;;  %v316_v24 = vld [vmem:[%s1610_s4 + $0x88] sm:$0xff] }
  0x4c   : > { %1040 = vmatpush1.bf16.msra.mxu0 %v1039_v9  ;;  %v311_v20 = vld [vmem:[%s1610_s4 + $0x60] sm:$0xff]  ;;  %v313_v23 = vld [vmem:[%s1610_s4 + $0x70] sm:$0xff]  ;;  %v320_v25 = vld [vmem:[%s1610_s4 + $0xa8] sm:$0xff] }
  0x4d   : > { %1168 = vmatpush1.bf16.msra.mxu1 %v1167_v13  ;;  %v1043_v22 = vpack.c.bf16 %v311_v20, %v307_v19  ;;  %1042 = vmatprep.subr.bf16.mxu0 %v1041_v17  ;;  %v1171_v26 = vpack.c.bf16 %v313_v23, %v309_v21  ;;  %v1045_v27 = vpack.c.bf16 %v320_v25, %v316_v24  ;;  %v318_v28 = vld [vmem:[%s1610_s4 + $0x98] sm:$0xff]  ;;  %v315_v30 = vld [vmem:[%s1610_s4 + $0x80] sm:$0xff]  ;;  %v317_v33 = vld [vmem:[%s1610_s4 + $0x90] sm:$0xff] }
  0x4e   : > { %1170 = vmatprep.subr.bf16.mxu1 %v1169_v18  ;;  %v322_v29 = vld [vmem:[%s1610_s4 + $0xb8] sm:$0xff]  ;;  %v319_v32 = vld [vmem:[%s1610_s4 + $0xa0] sm:$0xff]  ;;  %v321_v34 = vld [vmem:[%s1610_s4 + $0xb0] sm:$0xff] }
  0x4f   : > { %v1173_v31 = vpack.c.bf16 %v322_v29, %v318_v28  ;;  %v1047_v35 = vpack.c.bf16 %v319_v32, %v315_v30  ;;  %v324_v36 = vld [vmem:[%s1610_s4 + $0xc8] sm:$0xff]  ;;  %v326_v38 = vld [vmem:[%s1610_s4 + $0xd8] sm:$0xff]  ;;  %v1175_v39 = vpack.c.bf16 %v321_v34, %v317_v33  ;;  %v323_v42 = vld [vmem:[%s1610_s4 + $0xc0] sm:$0xff] }
  0x50   : > { %1044 = vmatpush1.bf16.msra.mxu0 %v1043_v22  ;;  %v328_v37 = vld [vmem:[%s1610_s4 + $0xe8] sm:$0xff]  ;;  %v330_v41 = vld [vmem:[%s1610_s4 + $0xf8] sm:$0xff]  ;;  %v327_v43 = vld [vmem:[%s1610_s4 + $0xe0] sm:$0xff] }
  0x51   : > { %1172 = vmatpush1.bf16.msra.mxu1 %v1171_v26  ;;  %1046 = vmatprep.subr.bf16.mxu0 %v1045_v27  ;;  %v1049_v40 = vpack.c.bf16 %v328_v37, %v324_v36  ;;  %v1177_v44 = vpack.c.bf16 %v330_v41, %v326_v38  ;;  %v325_v45 = vld [vmem:[%s1610_s4 + $0xd0] sm:$0xff]  ;;  %v332_v47 = vld [vmem:[%s1610_s4 + $0x108] sm:$0xff]  ;;  %v334_v49 = vld [vmem:[%s1610_s4 + $0x118] sm:$0xff]  ;;  %v1051_v51 = vpack.c.bf16 %v327_v43, %v323_v42 }
  0x52   : > { %1174 = vmatprep.subr.bf16.mxu1 %v1173_v31  ;;  %v329_v46 = vld [vmem:[%s1610_s4 + $0xf0] sm:$0xff]  ;;  %v336_v48 = vld [vmem:[%s1610_s4 + $0x128] sm:$0xff]  ;;  %v338_v50 = vld [vmem:[%s1610_s4 + $0x138] sm:$0xff] }
  0x53   : > { %v1179_v52 = vpack.c.bf16 %v329_v46, %v325_v45  ;;  %v1053_v53 = vpack.c.bf16 %v336_v48, %v332_v47  ;;  %v331_v54 = vld [vmem:[%s1610_s4 + $0x100] sm:$0xff]  ;;  %v333_v56 = vld [vmem:[%s1610_s4 + $0x110] sm:$0xff]  ;;  %v1181_v57 = vpack.c.bf16 %v338_v50, %v334_v49  ;;  %v340_v59 = vld [vmem:[%s1610_s4 + $0x148] sm:$0xff] }
  0x54   : > { %1048 = vmatpush1.bf16.msra.mxu0 %v1047_v35  ;;  %v335_v55 = vld [vmem:[%s1610_s4 + $0x120] sm:$0xff]  ;;  %v337_v58 = vld [vmem:[%s1610_s4 + $0x130] sm:$0xff]  ;;  %v344_v60 = vld [vmem:[%s1610_s4 + $0x168] sm:$0xff] }
  0x55   : > { %1176 = vmatpush1.bf16.msra.mxu1 %v1175_v39  ;;  %1050 = vmatprep.subr.bf16.mxu0 %v1049_v40  ;;  %v342_v61 = vld [vmem:[%s1610_s4 + $0x158] sm:$0xff]  ;;  %v1055_v63 = vpack.c.bf16 %v335_v55, %v331_v54  ;;  %v1183_v0 = vpack.c.bf16 %v337_v58, %v333_v56  ;;  %v1057_v1 = vpack.c.bf16 %v344_v60, %v340_v59  ;;  %v339_v2 = vld [vmem:[%s1610_s4 + $0x140] sm:$0xff]  ;;  %v341_v4 = vld [vmem:[%s1610_s4 + $0x150] sm:$0xff] }
  0x56   : > { %1178 = vmatprep.subr.bf16.mxu1 %v1177_v44  ;;  %v346_v62 = vld [vmem:[%s1610_s4 + $0x178] sm:$0xff]  ;;  %v343_v3 = vld [vmem:[%s1610_s4 + $0x160] sm:$0xff]  ;;  %v345_v6 = vld [vmem:[%s1610_s4 + $0x170] sm:$0xff] }
  0x57   : > { %v1185_v5 = vpack.c.bf16 %v346_v62, %v342_v61  ;;  %v348_v7 = vld [vmem:[%s1610_s4 + $0x188] sm:$0xff]  ;;  %v350_v9 = vld [vmem:[%s1610_s4 + $0x198] sm:$0xff]  ;;  %v1059_v11 = vpack.c.bf16 %v343_v3, %v339_v2  ;;  %v1187_v12 = vpack.c.bf16 %v345_v6, %v341_v4  ;;  %v347_v14 = vld [vmem:[%s1610_s4 + $0x180] sm:$0xff] }
  0x58   : > { %1052 = vmatpush1.bf16.msra.mxu0 %v1051_v51  ;;  %v352_v8 = vld [vmem:[%s1610_s4 + $0x1a8] sm:$0xff]  ;;  %v354_v10 = vld [vmem:[%s1610_s4 + $0x1b8] sm:$0xff]  ;;  %v351_v15 = vld [vmem:[%s1610_s4 + $0x1a0] sm:$0xff] }
  0x59   : > { %1180 = vmatpush1.bf16.msra.mxu1 %v1179_v52  ;;  %1054 = vmatprep.subr.bf16.mxu0 %v1053_v53  ;;  %v1061_v13 = vpack.c.bf16 %v352_v8, %v348_v7  ;;  %v349_v16 = vld [vmem:[%s1610_s4 + $0x190] sm:$0xff]  ;;  %v1189_v17 = vpack.c.bf16 %v354_v10, %v350_v9  ;;  %v356_v19 = vld [vmem:[%s1610_s4 + $0x1c8] sm:$0xff]  ;;  %v358_v21 = vld [vmem:[%s1610_s4 + $0x1d8] sm:$0xff]  ;;  %v1063_v23 = vpack.c.bf16 %v351_v15, %v347_v14 }
  0x5a   : > { %1182 = vmatprep.subr.bf16.mxu1 %v1181_v57  ;;  %v353_v18 = vld [vmem:[%s1610_s4 + $0x1b0] sm:$0xff]  ;;  %v360_v20 = vld [vmem:[%s1610_s4 + $0x1e8] sm:$0xff]  ;;  %v362_v22 = vld [vmem:[%s1610_s4 + $0x1f8] sm:$0xff] }
  0x5b   : > { %v1191_v24 = vpack.c.bf16 %v353_v18, %v349_v16  ;;  %v1065_v25 = vpack.c.bf16 %v360_v20, %v356_v19  ;;  %v355_v26 = vld [vmem:[%s1610_s4 + $0x1c0] sm:$0xff]  ;;  %v357_v28 = vld [vmem:[%s1610_s4 + $0x1d0] sm:$0xff]  ;;  %v1193_v29 = vpack.c.bf16 %v362_v22, %v358_v21  ;;  %v364_v31 = vld [vmem:[%s1610_s4 + $0x208] sm:$0xff] }
  0x5c   : > { %1056 = vmatpush1.bf16.msra.mxu0 %v1055_v63  ;;  %v359_v27 = vld [vmem:[%s1610_s4 + $0x1e0] sm:$0xff]  ;;  %v361_v30 = vld [vmem:[%s1610_s4 + $0x1f0] sm:$0xff]  ;;  %v368_v32 = vld [vmem:[%s1610_s4 + $0x228] sm:$0xff] }
  0x5d   : > { %1184 = vmatpush1.bf16.msra.mxu1 %v1183_v0  ;;  %1058 = vmatprep.subr.bf16.mxu0 %v1057_v1  ;;  %v366_v33 = vld [vmem:[%s1610_s4 + $0x218] sm:$0xff]  ;;  %v1067_v35 = vpack.c.bf16 %v359_v27, %v355_v26  ;;  %v1195_v36 = vpack.c.bf16 %v361_v30, %v357_v28  ;;  %v1069_v37 = vpack.c.bf16 %v368_v32, %v364_v31  ;;  %v363_v38 = vld [vmem:[%s1610_s4 + $0x200] sm:$0xff]  ;;  %v365_v40 = vld [vmem:[%s1610_s4 + $0x210] sm:$0xff] }
  0x5e   : > { %1186 = vmatprep.subr.bf16.mxu1 %v1185_v5  ;;  %v370_v34 = vld [vmem:[%s1610_s4 + $0x238] sm:$0xff]  ;;  %v367_v39 = vld [vmem:[%s1610_s4 + $0x220] sm:$0xff]  ;;  %v369_v42 = vld [vmem:[%s1610_s4 + $0x230] sm:$0xff] }
  0x5f   : > { %v1197_v41 = vpack.c.bf16 %v370_v34, %v366_v33  ;;  %v372_v43 = vld [vmem:[%s1610_s4 + $0x248] sm:$0xff]  ;;  %v374_v45 = vld [vmem:[%s1610_s4 + $0x258] sm:$0xff]  ;;  %v1071_v47 = vpack.c.bf16 %v367_v39, %v363_v38  ;;  %v1199_v48 = vpack.c.bf16 %v369_v42, %v365_v40  ;;  %v371_v50 = vld [vmem:[%s1610_s4 + $0x240] sm:$0xff] }
  0x60   : > { %1060 = vmatpush1.bf16.msra.mxu0 %v1059_v11  ;;  %v376_v44 = vld [vmem:[%s1610_s4 + $0x268] sm:$0xff]  ;;  %v378_v46 = vld [vmem:[%s1610_s4 + $0x278] sm:$0xff]  ;;  %v375_v51 = vld [vmem:[%s1610_s4 + $0x260] sm:$0xff] }
  0x61   : > { %1188 = vmatpush1.bf16.msra.mxu1 %v1187_v12  ;;  %1062 = vmatprep.subr.bf16.mxu0 %v1061_v13  ;;  %v1073_v49 = vpack.c.bf16 %v376_v44, %v372_v43  ;;  %v373_v52 = vld [vmem:[%s1610_s4 + $0x250] sm:$0xff]  ;;  %v1201_v53 = vpack.c.bf16 %v378_v46, %v374_v45  ;;  %v380_v55 = vld [vmem:[%s1610_s4 + $0x288] sm:$0xff]  ;;  %v382_v57 = vld [vmem:[%s1610_s4 + $0x298] sm:$0xff]  ;;  %v1075_v59 = vpack.c.bf16 %v375_v51, %v371_v50 }
  0x62   : > { %1190 = vmatprep.subr.bf16.mxu1 %v1189_v17  ;;  %v377_v54 = vld [vmem:[%s1610_s4 + $0x270] sm:$0xff]  ;;  %v384_v56 = vld [vmem:[%s1610_s4 + $0x2a8] sm:$0xff]  ;;  %v386_v58 = vld [vmem:[%s1610_s4 + $0x2b8] sm:$0xff] }
  0x63   : > { %v1203_v60 = vpack.c.bf16 %v377_v54, %v373_v52  ;;  %v1077_v61 = vpack.c.bf16 %v384_v56, %v380_v55  ;;  %v379_v62 = vld [vmem:[%s1610_s4 + $0x280] sm:$0xff]  ;;  %v381_v0 = vld [vmem:[%s1610_s4 + $0x290] sm:$0xff]  ;;  %v1205_v1 = vpack.c.bf16 %v386_v58, %v382_v57  ;;  %v388_v3 = vld [vmem:[%s1610_s4 + $0x2c8] sm:$0xff] }
  0x64   : > { %1064 = vmatpush1.bf16.msra.mxu0 %v1063_v23  ;;  %v383_v63 = vld [vmem:[%s1610_s4 + $0x2a0] sm:$0xff]  ;;  %v385_v2 = vld [vmem:[%s1610_s4 + $0x2b0] sm:$0xff]  ;;  %v392_v4 = vld [vmem:[%s1610_s4 + $0x2e8] sm:$0xff] }
  0x65   : > { %1192 = vmatpush1.bf16.msra.mxu1 %v1191_v24  ;;  %1066 = vmatprep.subr.bf16.mxu0 %v1065_v25  ;;  %v390_v5 = vld [vmem:[%s1610_s4 + $0x2d8] sm:$0xff]  ;;  %v1079_v7 = vpack.c.bf16 %v383_v63, %v379_v62  ;;  %v387_v8 = vld [vmem:[%s1610_s4 + $0x2c0] sm:$0xff]  ;;  %v1207_v9 = vpack.c.bf16 %v385_v2, %v381_v0  ;;  %v1081_v10 = vpack.c.bf16 %v392_v4, %v388_v3  ;;  %v389_v12 = vld [vmem:[%s1610_s4 + $0x2d0] sm:$0xff] }
  0x66   : > { %1194 = vmatprep.subr.bf16.mxu1 %v1193_v29  ;;  %v394_v6 = vld [vmem:[%s1610_s4 + $0x2f8] sm:$0xff]  ;;  %v391_v11 = vld [vmem:[%s1610_s4 + $0x2e0] sm:$0xff]  ;;  %v393_v13 = vld [vmem:[%s1610_s4 + $0x2f0] sm:$0xff] }
  0x67   : > { %v1209_v14 = vpack.c.bf16 %v394_v6, %v390_v5  ;;  %v396_v15 = vld [vmem:[%s1610_s4 + $0x308] sm:$0xff]  ;;  %v398_v18 = vld [vmem:[%s1610_s4 + $0x318] sm:$0xff]  ;;  %v1083_v20 = vpack.c.bf16 %v391_v11, %v387_v8  ;;  %v1211_v21 = vpack.c.bf16 %v393_v13, %v389_v12  ;;  %v395_v23 = vld [vmem:[%s1610_s4 + $0x300] sm:$0xff] }
  0x68   : > { %1068 = vmatpush1.bf16.msra.mxu0 %v1067_v35  ;;  %v400_v16 = vld [vmem:[%s1610_s4 + $0x328] sm:$0xff]  ;;  %v402_v19 = vld [vmem:[%s1610_s4 + $0x338] sm:$0xff]  ;;  %v399_v24 = vld [vmem:[%s1610_s4 + $0x320] sm:$0xff] }
  0x69   : > { %1196 = vmatpush1.bf16.msra.mxu1 %v1195_v36  ;;  %1070 = vmatprep.subr.bf16.mxu0 %v1069_v37  ;;  %v296_v17 = vld [vmem:[%s1623_s29 + $0x8] sm:$0xff]  ;;  %v1085_v22 = vpack.c.bf16 %v400_v16, %v396_v15  ;;  %v397_v25 = vld [vmem:[%s1610_s4 + $0x310] sm:$0xff]  ;;  %v1213_v26 = vpack.c.bf16 %v402_v19, %v398_v18  ;;  %v406_v30 = vld [vmem:[%s1610_s4 + $0x358] sm:$0xff]  ;;  %v1087_v32 = vpack.c.bf16 %v399_v24, %v395_v23 }
  0x6a   : > { %1198 = vmatprep.subr.bf16.mxu1 %v1197_v41  ;;  %619 = vmatprep.mubr.f32.mxu0 %v296_v17  ;;  %v401_v27 = vld [vmem:[%s1610_s4 + $0x330] sm:$0xff]  ;;  %v404_v28 = vld [vmem:[%s1610_s4 + $0x348] sm:$0xff]  ;;  %v410_v31 = vld [vmem:[%s1610_s4 + $0x378] sm:$0xff] }
  0x6b   : > { %761 = vmatprep.mubr.f32.mxu1 %v296_v17  ;;  %v408_v29 = vld [vmem:[%s1610_s4 + $0x368] sm:$0xff]  ;;  %v1215_v33 = vpack.c.bf16 %v401_v27, %v397_v25  ;;  %v403_v35 = vld [vmem:[%s1610_s4 + $0x340] sm:$0xff]  ;;  %v405_v37 = vld [vmem:[%s1610_s4 + $0x350] sm:$0xff]  ;;  %v1217_v38 = vpack.c.bf16 %v410_v31, %v406_v30 }
  0x6c   : > { %1072 = vmatpush1.bf16.msra.mxu0 %v1071_v47  ;;  %v1089_v34 = vpack.c.bf16 %v408_v29, %v404_v28  ;;  %v407_v36 = vld [vmem:[%s1610_s4 + $0x360] sm:$0xff]  ;;  %v409_v39 = vld [vmem:[%s1610_s4 + $0x370] sm:$0xff]  ;;  %v412_v40 = vld [vmem:[%s1610_s4 + $0x388] sm:$0xff] }
  0x6d   : > { %1200 = vmatpush1.bf16.msra.mxu1 %v1199_v48  ;;  %1074 = vmatprep.subr.bf16.mxu0 %v1073_v49  ;;  %v416_v41 = vld [vmem:[%s1610_s4 + $0x3a8] sm:$0xff]  ;;  %v414_v42 = vld [vmem:[%s1610_s4 + $0x398] sm:$0xff]  ;;  %v1091_v44 = vpack.c.bf16 %v407_v36, %v403_v35  ;;  %v1219_v45 = vpack.c.bf16 %v409_v39, %v405_v37  ;;  %v411_v47 = vld [vmem:[%s1610_s4 + $0x380] sm:$0xff] }
  0x6e   : > { %1202 = vmatprep.subr.bf16.mxu1 %v1201_v53  ;;  %v418_v43 = vld [vmem:[%s1610_s4 + $0x3b8] sm:$0xff]  ;;  %v1093_v46 = vpack.c.bf16 %v416_v41, %v412_v40  ;;  %v415_v48 = vld [vmem:[%s1610_s4 + $0x3a0] sm:$0xff]  ;;  %v413_v49 = vld [vmem:[%s1610_s4 + $0x390] sm:$0xff] }
  0x6f   : > { %v1221_v50 = vpack.c.bf16 %v418_v43, %v414_v42  ;;  %v417_v51 = vld [vmem:[%s1610_s4 + $0x3b0] sm:$0xff]  ;;  %v420_v52 = vld [vmem:[%s1610_s4 + $0x3c8] sm:$0xff]  ;;  %v422_v54 = vld [vmem:[%s1610_s4 + $0x3d8] sm:$0xff]  ;;  %v1095_v56 = vpack.c.bf16 %v415_v48, %v411_v47 }
  0x70   : > { %1076 = vmatpush1.bf16.msra.mxu0 %v1075_v59  ;;  %v424_v53 = vld [vmem:[%s1610_s4 + $0x3e8] sm:$0xff]  ;;  %v426_v55 = vld [vmem:[%s1610_s4 + $0x3f8] sm:$0xff]  ;;  %v1223_v57 = vpack.c.bf16 %v417_v51, %v413_v49  ;;  %v419_v59 = vld [vmem:[%s1610_s4 + $0x3c0] sm:$0xff] }
  0x71   : > { %1204 = vmatpush1.bf16.msra.mxu1 %v1203_v60  ;;  %1078 = vmatprep.subr.bf16.mxu0 %v1077_v61  ;;  %v1097_v58 = vpack.c.bf16 %v424_v53, %v420_v52  ;;  %v423_v60 = vld [vmem:[%s1610_s4 + $0x3e0] sm:$0xff]  ;;  %v421_v61 = vld [vmem:[%s1610_s4 + $0x3d0] sm:$0xff]  ;;  %v1225_v62 = vpack.c.bf16 %v426_v55, %v422_v54  ;;  %v428_v0 = vld [vmem:[%s1610_s4 + $0x408] sm:$0xff] }
  0x72   : > { %1206 = vmatprep.subr.bf16.mxu1 %v1205_v1  ;;  %v425_v63 = vld [vmem:[%s1610_s4 + $0x3f0] sm:$0xff]  ;;  %v432_v1 = vld [vmem:[%s1610_s4 + $0x428] sm:$0xff]  ;;  %v430_v2 = vld [vmem:[%s1610_s4 + $0x418] sm:$0xff]  ;;  %v1099_v4 = vpack.c.bf16 %v423_v60, %v419_v59 }
  0x73   : > { %v434_v3 = vld [vmem:[%s1610_s4 + $0x438] sm:$0xff]  ;;  %v1227_v5 = vpack.c.bf16 %v425_v63, %v421_v61  ;;  %v1101_v6 = vpack.c.bf16 %v432_v1, %v428_v0  ;;  %v431_v8 = vld [vmem:[%s1610_s4 + $0x420] sm:$0xff]  ;;  %v433_v11 = vld [vmem:[%s1610_s4 + $0x430] sm:$0xff] }
  0x74   : > { %1080 = vmatpush1.bf16.msra.mxu0 %v1079_v7  ;;  %v427_v7 = vld [vmem:[%s1610_s4 + $0x400] sm:$0xff]  ;;  %v436_v12 = vld [vmem:[%s1610_s4 + $0x448] sm:$0xff]  ;;  %v442_v15 = vld [vmem:[%s1610_s4 + $0x478] sm:$0xff] }
  0x75   : > { %1208 = vmatpush1.bf16.msra.mxu1 %v1207_v9  ;;  %1082 = vmatprep.subr.bf16.mxu0 %v1081_v10  ;;  %v429_v9 = vld [vmem:[%s1610_s4 + $0x410] sm:$0xff]  ;;  %v1229_v10 = vpack.c.bf16 %v434_v3, %v430_v2  ;;  %v440_v13 = vld [vmem:[%s1610_s4 + $0x468] sm:$0xff]  ;;  %v295_v16 = vld [vmem:[%s1623_s29] sm:$0xff]  ;;  %v1103_v17 = vpack.c.bf16 %v431_v8, %v427_v7 }
  0x76   : > { %1210 = vmatprep.subr.bf16.mxu1 %v1209_v14  ;;  %v438_v14 = vld [vmem:[%s1610_s4 + $0x458] sm:$0xff]  ;;  %v1231_v18 = vpack.c.bf16 %v433_v11, %v429_v9  ;;  %v1105_v19 = vpack.c.bf16 %v440_v13, %v436_v12  ;;  %v441_v24 = vld [vmem:[%s1610_s4 + $0x470] sm:$0xff]  ;;  %v444_v25 = vld [vmem:[%s1610_s4 + $0x488] sm:$0xff] }
  0x77   : > { %v1233_v23 = vpack.c.bf16 %v442_v15, %v438_v14  ;;  %v446_v27 = vld [vmem:[%s1610_s4 + $0x498] sm:$0xff]  ;;  %v449_v36 = vld [vmem:[%s1610_s4 + $0x4b0] sm:$0xff]  ;;  %v452_v37 = vld [vmem:[%s1610_s4 + $0x4c8] sm:$0xff] }
  0x78   : > { %1084 = vmatpush1.bf16.msra.mxu0 %v1083_v20  ;;  %v435_v20 = vld [vmem:[%s1610_s4 + $0x440] sm:$0xff]  ;;  %v450_v28 = vld [vmem:[%s1610_s4 + $0x4b8] sm:$0xff]  ;;  %v457_v48 = vld [vmem:[%s1610_s4 + $0x4f0] sm:$0xff] }
  0x79   : > { %1212 = vmatpush1.bf16.msra.mxu1 %v1211_v21  ;;  %1086 = vmatprep.subr.bf16.mxu0 %v1085_v22  ;;  %v439_v21 = vld [vmem:[%s1610_s4 + $0x460] sm:$0xff]  ;;  %v437_v22 = vld [vmem:[%s1610_s4 + $0x450] sm:$0xff]  ;;  %v1237_v35 = vpack.c.bf16 %v450_v28, %v446_v27  ;;  %v454_v39 = vld [vmem:[%s1610_s4 + $0x4d8] sm:$0xff] }
  0x7a   : > { %1214 = vmatprep.subr.bf16.mxu1 %v1213_v26  ;;  %v448_v26 = vld [vmem:[%s1610_s4 + $0x4a8] sm:$0xff]  ;;  %v1107_v29 = vpack.c.bf16 %v439_v21, %v435_v20  ;;  %v1235_v30 = vpack.c.bf16 %v441_v24, %v437_v22  ;;  %v458_v40 = vld [vmem:[%s1610_s4 + $0x4f8] sm:$0xff]  ;;  %v465_v60 = vld [vmem:[%s1610_s4 + $0x530] sm:$0xff] }
  0x7b   : > { %v1109_v31 = vpack.c.bf16 %v448_v26, %v444_v25  ;;  %v1241_v47 = vpack.c.bf16 %v458_v40, %v454_v39  ;;  %v460_v49 = vld [vmem:[%s1610_s4 + $0x508] sm:$0xff]  ;;  %v462_v51 = vld [vmem:[%s1610_s4 + $0x518] sm:$0xff]  ;;  %v473_v8 = vld [vmem:[%s1610_s4 + $0x570] sm:$0xff] }
  0x7c   : > { %1088 = vmatpush1.bf16.msra.mxu0 %v1087_v32  ;;  %v443_v32 = vld [vmem:[%s1610_s4 + $0x480] sm:$0xff]  ;;  %v466_v52 = vld [vmem:[%s1610_s4 + $0x538] sm:$0xff]  ;;  %v468_v61 = vld [vmem:[%s1610_s4 + $0x548] sm:$0xff] }
  0x7d   : > { %1216 = vmatpush1.bf16.msra.mxu1 %v1215_v33  ;;  %1090 = vmatprep.subr.bf16.mxu0 %v1089_v34  ;;  %v447_v33 = vld [vmem:[%s1610_s4 + $0x4a0] sm:$0xff]  ;;  %v445_v34 = vld [vmem:[%s1610_s4 + $0x490] sm:$0xff]  ;;  %v1245_v59 = vpack.c.bf16 %v466_v52, %v462_v51  ;;  %v470_v63 = vld [vmem:[%s1610_s4 + $0x558] sm:$0xff] }
  0x7e   : > { %1218 = vmatprep.subr.bf16.mxu1 %v1217_v38  ;;  %v456_v38 = vld [vmem:[%s1610_s4 + $0x4e8] sm:$0xff]  ;;  %v1111_v41 = vpack.c.bf16 %v447_v33, %v443_v32  ;;  %v1239_v42 = vpack.c.bf16 %v449_v36, %v445_v34  ;;  %v474_v0 = vld [vmem:[%s1610_s4 + $0x578] sm:$0xff]  ;;  %v475_v14 = vld [vmem:[%s1610_s4 + $0x580] sm:$0xff] }
  0x7f   : > { %v1113_v43 = vpack.c.bf16 %v456_v38, %v452_v37  ;;  %v1249_v7 = vpack.c.bf16 %v474_v0, %v470_v63  ;;  %v476_v9 = vld [vmem:[%s1610_s4 + $0x588] sm:$0xff]  ;;  %v478_v11 = vld [vmem:[%s1610_s4 + $0x598] sm:$0xff]  ;;  %v489_v33 = vld [vmem:[%s1610_s4 + $0x5f0] sm:$0xff] }
  0x80   : > { %1092 = vmatpush1.bf16.msra.mxu0 %v1091_v44  ;;  %v451_v44 = vld [vmem:[%s1610_s4 + $0x4c0] sm:$0xff]  ;;  %v482_v12 = vld [vmem:[%s1610_s4 + $0x5b8] sm:$0xff]  ;;  %v484_v21 = vld [vmem:[%s1610_s4 + $0x5c8] sm:$0xff] }
  0x81   : > { %1220 = vmatpush1.bf16.msra.mxu1 %v1219_v45  ;;  %1094 = vmatprep.subr.bf16.mxu0 %v1093_v46  ;;  %v455_v45 = vld [vmem:[%s1610_s4 + $0x4e0] sm:$0xff]  ;;  %v453_v46 = vld [vmem:[%s1610_s4 + $0x4d0] sm:$0xff]  ;;  %v1253_v20 = vpack.c.bf16 %v482_v12, %v478_v11  ;;  %v488_v22 = vld [vmem:[%s1610_s4 + $0x5e8] sm:$0xff] }
  0x82   : > { %1222 = vmatprep.subr.bf16.mxu1 %v1221_v50  ;;  %v464_v50 = vld [vmem:[%s1610_s4 + $0x528] sm:$0xff]  ;;  %v1115_v53 = vpack.c.bf16 %v455_v45, %v451_v44  ;;  %v1243_v54 = vpack.c.bf16 %v457_v48, %v453_v46  ;;  %v486_v24 = vld [vmem:[%s1610_s4 + $0x5d8] sm:$0xff]  ;;  %v1129_v28 = vpack.c.bf16 %v488_v22, %v484_v21  ;;  %v497_v45 = vld [vmem:[%s1610_s4 + $0x630] sm:$0xff] }
  0x83   : > { %v1117_v55 = vpack.c.bf16 %v464_v50, %v460_v49  ;;  %v490_v25 = vld [vmem:[%s1610_s4 + $0x5f8] sm:$0xff]  ;;  %v492_v34 = vld [vmem:[%s1610_s4 + $0x608] sm:$0xff] }
  0x84   : > { %1096 = vmatpush1.bf16.msra.mxu0 %v1095_v56  ;;  %v459_v56 = vld [vmem:[%s1610_s4 + $0x500] sm:$0xff]  ;;  %v1257_v32 = vpack.c.bf16 %v490_v25, %v486_v24  ;;  %v494_v36 = vld [vmem:[%s1610_s4 + $0x618] sm:$0xff]  ;;  %v500_v46 = vld [vmem:[%s1610_s4 + $0x648] sm:$0xff] }
  0x85   : > { %1224 = vmatpush1.bf16.msra.mxu1 %v1223_v57  ;;  %1098 = vmatprep.subr.bf16.mxu0 %v1097_v58  ;;  %v463_v57 = vld [vmem:[%s1610_s4 + $0x520] sm:$0xff]  ;;  %v461_v58 = vld [vmem:[%s1610_s4 + $0x510] sm:$0xff]  ;;  %v498_v37 = vld [vmem:[%s1610_s4 + $0x638] sm:$0xff] }
  0x86   : > { %1226 = vmatprep.subr.bf16.mxu1 %v1225_v62  ;;  %v472_v62 = vld [vmem:[%s1610_s4 + $0x568] sm:$0xff]  ;;  %v1119_v1 = vpack.c.bf16 %v463_v57, %v459_v56  ;;  %v1247_v2 = vpack.c.bf16 %v465_v60, %v461_v58  ;;  %v1261_v44 = vpack.c.bf16 %v498_v37, %v494_v36  ;;  %v502_v48 = vld [vmem:[%s1610_s4 + $0x658] sm:$0xff]  ;;  %v505_v57 = vld [vmem:[%s1610_s4 + $0x670] sm:$0xff] }
  0x87   : > { %v1121_v3 = vpack.c.bf16 %v472_v62, %v468_v61  ;;  %v506_v49 = vld [vmem:[%s1610_s4 + $0x678] sm:$0xff]  ;;  %v508_v58 = vld [vmem:[%s1610_s4 + $0x688] sm:$0xff]  ;;  %v523_v25 = vld [vmem:[%s1610_s4 + $0x700] sm:$0xff] }
  0x88   : > { %1100 = vmatpush1.bf16.msra.mxu0 %v1099_v4  ;;  %v467_v4 = vld [vmem:[%s1610_s4 + $0x540] sm:$0xff]  ;;  %v1265_v56 = vpack.c.bf16 %v506_v49, %v502_v48  ;;  %v510_v60 = vld [vmem:[%s1610_s4 + $0x698] sm:$0xff] }
  0x89   : > { %1228 = vmatpush1.bf16.msra.mxu1 %v1227_v5  ;;  %1102 = vmatprep.subr.bf16.mxu0 %v1101_v6  ;;  %v471_v5 = vld [vmem:[%s1610_s4 + $0x560] sm:$0xff]  ;;  %v469_v6 = vld [vmem:[%s1610_s4 + $0x550] sm:$0xff]  ;;  %v514_v61 = vld [vmem:[%s1610_s4 + $0x6b8] sm:$0xff] }
  0x8a   : > { %1230 = vmatprep.subr.bf16.mxu1 %v1229_v10  ;;  %v480_v10 = vld [vmem:[%s1610_s4 + $0x5a8] sm:$0xff]  ;;  %v1123_v13 = vpack.c.bf16 %v471_v5, %v467_v4  ;;  %v1251_v15 = vpack.c.bf16 %v473_v8, %v469_v6  ;;  %v1269_v4 = vpack.c.bf16 %v514_v61, %v510_v60  ;;  %v513_v5 = vld [vmem:[%s1610_s4 + $0x6b0] sm:$0xff]  ;;  %v518_v8 = vld [vmem:[%s1610_s4 + $0x6d8] sm:$0xff] }
  0x8b   : > { %620 = vmatmul.mubr.f32.vlgmr.msra.gmra.mrb[0].mxu0 %v295_v16  ;;  %v516_v6 = vld [vmem:[%s1610_s4 + $0x6c8] sm:$0xff]  ;;  %v530_v21 = vld [vmem:[%s1610_s4 + $0x738] sm:$0xff]  ;;  %v531_v37 = vld [vmem:[%s1610_s4 + $0x740] sm:$0xff] }
  0x8c   : > { %1104 = vmatpush1.bf16.msra.mxu0 %v1103_v17  ;;  %762 = vmatmul.mubr.f32.vlgmr.msra.gmra.mrb[0].mxu1 %v295_v16  ;;  %v1125_v16 = vpack.c.bf16 %v480_v10, %v476_v9  ;;  %v479_v17 = vld [vmem:[%s1610_s4 + $0x5a0] sm:$0xff]  ;;  %v522_v9 = vld [vmem:[%s1610_s4 + $0x6f8] sm:$0xff] }
  0x8d   : > { %1232 = vmatpush1.bf16.msra.mxu1 %v1231_v18  ;;  %1106 = vmatprep.subr.bf16.mxu0 %v1105_v19  ;;  %v477_v18 = vld [vmem:[%s1610_s4 + $0x590] sm:$0xff]  ;;  %v1127_v26 = vpack.c.bf16 %v479_v17, %v475_v14  ;;  %v519_v14 = vld [vmem:[%s1610_s4 + $0x6e0] sm:$0xff] }
  0x8e   : > { %1234 = vmatprep.subr.bf16.mxu1 %v1233_v23  ;;  %v481_v19 = vld [vmem:[%s1610_s4 + $0x5b0] sm:$0xff]  ;;  %v298_v23 = vld [vmem:[%s1623_s29 + $0x18] sm:$0xff]  ;;  %v539_v49 = vld [vmem:[%s1610_s4 + $0x780] sm:$0xff] }
  0x8f   : > { %690 = vmatprep.mubr.f32.mxu0 %v298_v23  ;;  %832 = vmatprep.mubr.f32.mxu1 %v298_v23  ;;  %v1255_v27 = vpack.c.bf16 %v481_v19, %v477_v18  ;;  %v521_v17 = vld [vmem:[%s1610_s4 + $0x6f0] sm:$0xff]  ;;  %v524_v18 = vld [vmem:[%s1610_s4 + $0x708] sm:$0xff]  ;;  %v547_v61 = vld [vmem:[%s1610_s4 + $0x7c0] sm:$0xff] }
  0x90   : > { %1108 = vmatpush1.bf16.msra.mxu0 %v1107_v29  ;;  %v483_v29 = vld [vmem:[%s1610_s4 + $0x5c0] sm:$0xff]  ;;  %v528_v19 = vld [vmem:[%s1610_s4 + $0x728] sm:$0xff] }
  0x91   : > { %1236 = vmatpush1.bf16.msra.mxu1 %v1235_v30  ;;  %1110 = vmatprep.subr.bf16.mxu0 %v1109_v31  ;;  %v487_v30 = vld [vmem:[%s1610_s4 + $0x5e0] sm:$0xff]  ;;  %v485_v31 = vld [vmem:[%s1610_s4 + $0x5d0] sm:$0xff]  ;;  %v1149_v24 = vpack.c.bf16 %v528_v19, %v524_v18 }
  0x92   : > { %1238 = vmatprep.subr.bf16.mxu1 %v1237_v35  ;;  %v496_v35 = vld [vmem:[%s1610_s4 + $0x628] sm:$0xff]  ;;  %v1131_v38 = vpack.c.bf16 %v487_v30, %v483_v29  ;;  %v1259_v39 = vpack.c.bf16 %v489_v33, %v485_v31  ;;  %v529_v29 = vld [vmem:[%s1610_s4 + $0x730] sm:$0xff]  ;;  %v538_v33 = vld [vmem:[%s1610_s4 + $0x778] sm:$0xff] }
  0x93   : > { %v1133_v40 = vpack.c.bf16 %v496_v35, %v492_v34  ;;  %v532_v30 = vld [vmem:[%s1610_s4 + $0x748] sm:$0xff]  ;;  %v855_v19 = vld [vmem:[%s271_s10] sm:$0xf] (!%p1034_p6) }
  0x94   : > { %1112 = vmatpush1.bf16.msra.mxu0 %v1111_v41  ;;  %v491_v41 = vld [vmem:[%s1610_s4 + $0x600] sm:$0xff]  ;;  %v536_v31 = vld [vmem:[%s1610_s4 + $0x768] sm:$0xff] }
  0x95   : > { %1240 = vmatpush1.bf16.msra.mxu1 %v1239_v42  ;;  %1114 = vmatprep.subr.bf16.mxu0 %v1113_v43  ;;  %v495_v42 = vld [vmem:[%s1610_s4 + $0x620] sm:$0xff]  ;;  %v493_v43 = vld [vmem:[%s1610_s4 + $0x610] sm:$0xff]  ;;  %v1153_v36 = vpack.c.bf16 %v536_v31, %v532_v30 }
  0x96   : > { %1242 = vmatprep.subr.bf16.mxu1 %v1241_v47  ;;  %v504_v47 = vld [vmem:[%s1610_s4 + $0x668] sm:$0xff]  ;;  %v1135_v50 = vpack.c.bf16 %v495_v42, %v491_v41  ;;  %v1263_v51 = vpack.c.bf16 %v497_v45, %v493_v43  ;;  %v537_v41 = vld [vmem:[%s1610_s4 + $0x770] sm:$0xff]  ;;  %v546_v45 = vld [vmem:[%s1610_s4 + $0x7b8] sm:$0xff] }
  0x97   : > { %v1137_v52 = vpack.c.bf16 %v504_v47, %v500_v46  ;;  %v540_v42 = vld [vmem:[%s1610_s4 + $0x788] sm:$0xff] }
  0x98   : > { %1116 = vmatpush1.bf16.msra.mxu0 %v1115_v53  ;;  %v499_v53 = vld [vmem:[%s1610_s4 + $0x640] sm:$0xff]  ;;  %v544_v43 = vld [vmem:[%s1610_s4 + $0x7a8] sm:$0xff] }
  0x99   : > { %1244 = vmatpush1.bf16.msra.mxu1 %v1243_v54  ;;  %1118 = vmatprep.subr.bf16.mxu0 %v1117_v55  ;;  %v503_v54 = vld [vmem:[%s1610_s4 + $0x660] sm:$0xff]  ;;  %v501_v55 = vld [vmem:[%s1610_s4 + $0x650] sm:$0xff]  ;;  %v1157_v48 = vpack.c.bf16 %v544_v43, %v540_v42 }
  0x9a   : > { %1246 = vmatprep.subr.bf16.mxu1 %v1245_v59  ;;  %v512_v59 = vld [vmem:[%s1610_s4 + $0x6a8] sm:$0xff]  ;;  %v1139_v62 = vpack.c.bf16 %v503_v54, %v499_v53  ;;  %v1267_v63 = vpack.c.bf16 %v505_v57, %v501_v55  ;;  %v545_v53 = vld [vmem:[%s1610_s4 + $0x7b0] sm:$0xff]  ;;  %v554_v57 = vld [vmem:[%s1610_s4 + $0x7f8] sm:$0xff] }
  0x9b   : > { %v1141_v0 = vpack.c.bf16 %v512_v59, %v508_v58  ;;  %v548_v54 = vld [vmem:[%s1610_s4 + $0x7c8] sm:$0xff] }
  0x9c   : > { %1120 = vmatpush1.bf16.msra.mxu0 %v1119_v1  ;;  %v507_v1 = vld [vmem:[%s1610_s4 + $0x680] sm:$0xff]  ;;  %v552_v55 = vld [vmem:[%s1610_s4 + $0x7e8] sm:$0xff] }
  0x9d   : > { %1248 = vmatpush1.bf16.msra.mxu1 %v1247_v2  ;;  %1122 = vmatprep.subr.bf16.mxu0 %v1121_v3  ;;  %v511_v2 = vld [vmem:[%s1610_s4 + $0x6a0] sm:$0xff]  ;;  %v509_v3 = vld [vmem:[%s1610_s4 + $0x690] sm:$0xff]  ;;  %v1161_v60 = vpack.c.bf16 %v552_v55, %v548_v54 }
  0x9e   : > { %1250 = vmatprep.subr.bf16.mxu1 %v1249_v7  ;;  %v520_v7 = vld [vmem:[%s1610_s4 + $0x6e8] sm:$0xff]  ;;  %v1143_v10 = vpack.c.bf16 %v511_v2, %v507_v1  ;;  %v1271_v11 = vpack.c.bf16 %v513_v5, %v509_v3  ;;  %v553_v1 = vld [vmem:[%s1610_s4 + $0x7f0] sm:$0xff]  ;;  %v291_v5 = vld [vmem:[#allocation2] sm:$0xff] }
  0x9f   : > { %v1145_v12 = vpack.c.bf16 %v520_v7, %v516_v6  ;;  %v293_v6 = vld [vmem:[#allocation2 + $0x10] sm:$0xff]  ;;  %v292_v7 = vld [vmem:[#allocation2 + $0x8] sm:$0xff] }
  0xa0   : > { %1124 = vmatpush1.bf16.msra.mxu0 %v1123_v13  ;;  %v515_v13 = vld [vmem:[%s1610_s4 + $0x6c0] sm:$0xff] }
  0xa1   : > { %1252 = vmatpush1.bf16.msra.mxu1 %v1251_v15  ;;  %1126 = vmatprep.subr.bf16.mxu0 %v1125_v16  ;;  %v517_v15 = vld [vmem:[%s1610_s4 + $0x6d0] sm:$0xff]  ;;  %v1273_v16 = vpack.c.bf16 %v522_v9, %v518_v8  ;;  %v1147_v22 = vpack.c.bf16 %v519_v14, %v515_v13  ;;  %v294_v9 = vld [vmem:[#allocation2 + $0x18] sm:$0xff] }
  0xa2   : > { %1254 = vmatprep.subr.bf16.mxu1 %v1253_v20  ;;  %v526_v20 = vld [vmem:[%s1610_s4 + $0x718] sm:$0xff]  ;;  %v1275_v23 = vpack.c.bf16 %v521_v17, %v517_v15  ;;  %v857_v17 = vlaneseq (!%p1034_p6) }
  0xa4   : > { %1128 = vmatpush1.bf16.msra.mxu0 %v1127_v26  ;;  %v527_v26 = vld [vmem:[%s1610_s4 + $0x720] sm:$0xff]  ;;  %v858_v18 = vshrl.u32 (!%p1034_p6), %v857_v17, 7 }
  0xa5   : > { %1256 = vmatpush1.bf16.msra.mxu1 %v1255_v27  ;;  %1130 = vmatprep.subr.bf16.mxu0 %v1129_v28  ;;  %v525_v27 = vld [vmem:[%s1610_s4 + $0x710] sm:$0xff]  ;;  %v1277_v28 = vpack.c.bf16 %v530_v21, %v526_v20  ;;  %v1151_v34 = vpack.c.bf16 %v527_v26, %v523_v25 }
  0xa6   : > { %1258 = vmatprep.subr.bf16.mxu1 %v1257_v32  ;;  %v534_v32 = vld [vmem:[%s1610_s4 + $0x758] sm:$0xff]  ;;  %v1279_v35 = vpack.c.bf16 %v529_v29, %v525_v27  ;;  %v859_v21 = vsub.s32 (!%p1034_p6), 0, %v858_v18 }
  0xa8   : > { %1132 = vmatpush1.bf16.msra.mxu0 %v1131_v38  ;;  %v535_v38 = vld [vmem:[%s1610_s4 + $0x760] sm:$0xff] }
  0xa9   : > { %1260 = vmatpush1.bf16.msra.mxu1 %v1259_v39  ;;  %1134 = vmatprep.subr.bf16.mxu0 %v1133_v40  ;;  %v533_v39 = vld [vmem:[%s1610_s4 + $0x750] sm:$0xff]  ;;  %v1281_v40 = vpack.c.bf16 %v538_v33, %v534_v32  ;;  %v1155_v46 = vpack.c.bf16 %v535_v38, %v531_v37 }
  0xaa   : > { %1262 = vmatprep.subr.bf16.mxu1 %v1261_v44  ;;  %v542_v44 = vld [vmem:[%s1610_s4 + $0x798] sm:$0xff]  ;;  %v1283_v47 = vpack.c.bf16 %v537_v41, %v533_v39 }
  0xac   : > { %1136 = vmatpush1.bf16.msra.mxu0 %v1135_v50  ;;  %v543_v50 = vld [vmem:[%s1610_s4 + $0x7a0] sm:$0xff] }
  0xad   : > { %1264 = vmatpush1.bf16.msra.mxu1 %v1263_v51  ;;  %1138 = vmatprep.subr.bf16.mxu0 %v1137_v52  ;;  %v541_v51 = vld [vmem:[%s1610_s4 + $0x790] sm:$0xff]  ;;  %v1285_v52 = vpack.c.bf16 %v546_v45, %v542_v44  ;;  %v1159_v58 = vpack.c.bf16 %v543_v50, %v539_v49 }
  0xae   : > { %1266 = vmatprep.subr.bf16.mxu1 %v1265_v56  ;;  %v550_v56 = vld [vmem:[%s1610_s4 + $0x7d8] sm:$0xff]  ;;  %v1287_v59 = vpack.c.bf16 %v545_v53, %v541_v51 }
  0xb0   : > { %1140 = vmatpush1.bf16.msra.mxu0 %v1139_v62  ;;  %v551_v62 = vld [vmem:[%s1610_s4 + $0x7e0] sm:$0xff] }
  0xb1   : > { %1268 = vmatpush1.bf16.msra.mxu1 %v1267_v63  ;;  %1142 = vmatprep.subr.bf16.mxu0 %v1141_v0  ;;  %v1289_v63 = vpack.c.bf16 %v554_v57, %v550_v56  ;;  %v549_v0 = vld [vmem:[%s1610_s4 + $0x7d0] sm:$0xff]  ;;  %v1163_v2 = vpack.c.bf16 %v551_v62, %v547_v61 }
  0xb2   : > { %1270 = vmatprep.subr.bf16.mxu1 %v1269_v4  ;;  %v1291_v3 = vpack.c.bf16 %v553_v1, %v549_v0  ;;  %v297_v4 = vld [vmem:[%s1623_s29 + $0x10] sm:$0xff] }
  0xb4   : > { %1144 = vmatpush1.bf16.msra.mxu0 %v1143_v10 }
  0xb5   : > { %1272 = vmatpush1.bf16.msra.mxu1 %v1271_v11  ;;  %1146 = vmatprep.subr.bf16.mxu0 %v1145_v12 }
  0xb6   : > { %1274 = vmatprep.subr.bf16.mxu1 %v1273_v16 }
  0xb8   : > { %1148 = vmatpush1.bf16.msra.mxu0 %v1147_v22  ;;  %v863_v22 = vsub.s32 (!%p1034_p6), 1, %v858_v18 }
  0xb9   : > { %1276 = vmatpush1.bf16.msra.mxu1 %v1275_v23  ;;  %1150 = vmatprep.subr.bf16.mxu0 %v1149_v24  ;;  %v867_v23 = vsub.s32 (!%p1034_p6), 2, %v858_v18  ;;  %v871_v24 = vsub.s32 (!%p1034_p6), 3, %v858_v18 }
  0xba   : > { %1278 = vmatprep.subr.bf16.mxu1 %v1277_v28  ;;  %v860_v28 = vrot.slane (!%p1034_p6), %v855_v19, %v859_v21  ;;  %v864_v29 = vrot.slane (!%p1034_p6), %v855_v19, %v863_v22 }
  0xbb   : > { %v868_v30 = vrot.slane (!%p1034_p6), %v855_v19, %v867_v23  ;;  %v872_v31 = vrot.slane (!%p1034_p6), %v855_v19, %v871_v24 }
  0xbc   : > { %1152 = vmatpush1.bf16.msra.mxu0 %v1151_v34 }
  0xbd   : > { %1280 = vmatpush1.bf16.msra.mxu1 %v1279_v35  ;;  %1154 = vmatprep.subr.bf16.mxu0 %v1153_v36 }
  0xbe   : > { %1282 = vmatprep.subr.bf16.mxu1 %v1281_v40 }
  0xc0   : > { %1156 = vmatpush1.bf16.msra.mxu0 %v1155_v46 }
  0xc1   : > { %1284 = vmatpush1.bf16.msra.mxu1 %v1283_v47  ;;  %1158 = vmatprep.subr.bf16.mxu0 %v1157_v48 }
  0xc2   : > { %1286 = vmatprep.subr.bf16.mxu1 %v1285_v52 }
  0xc4   : > { %1160 = vmatpush1.bf16.msra.mxu0 %v1159_v58 }
  0xc5   : > { %1288 = vmatpush1.bf16.msra.mxu1 %v1287_v59  ;;  %1162 = vmatprep.subr.bf16.mxu0 %v1161_v60 }
  0xc6   : > { %1290 = vmatprep.subr.bf16.mxu1 %v1289_v63 }
  0xc8   : > { %1164 = vmatpush1.bf16.msra.mxu0 %v1163_v2 }
  0xc9   : > { %1292 = vmatpush1.bf16.msra.mxu1 %v1291_v3 }
  0xcb   : > { %691 = vmatmul.mubr.f32.vlgmr.msra.gmra.mrb[0].mxu0 %v297_v4 }
  0xcc   : > { %833 = vmatmul.mubr.f32.vlgmr.msra.gmra.mrb[0].mxu1 %v297_v4 }
 0x19d   : > { %850 = sbr.rel (%p1034_p6) target bundleno = 432 (0x1b0), region = 44 }
 0x19e   : > { %v692_v8 = vpop.f32.mrb[0].mxu0 }
 0x19f   : > { %v839_v10 = vadd.f32 %v692_v8, %v291_v5  ;;  %v834_v11 = vpop.f32.mrb[0].mxu1  ;;  %v694_v12 = vpop.f32.mrb[1].mxu0 }
 0x1a0   : > { %v841_v13 = vadd.f32 %v834_v11, %v293_v6  ;;  %v840_v14 = vadd.f32 %v694_v12, %v292_v7  ;;  %v836_v15 = vpop.f32.mrb[1].mxu1 }
 0x1a1   : > { %843 = vst [vmem:[#allocation2] sm:$0xff] %v839_v10  ;;  %v842_v16 = vadd.f32 %v836_v15, %v294_v9 }
 0x1a2   : > { %845 = vst [vmem:[#allocation2 + $0x10] sm:$0xff] %v841_v13  ;;  %844 = vst [vmem:[#allocation2 + $0x8] sm:$0xff] %v840_v14 }
 0x1a3   : > { %846 = vst [vmem:[#allocation2 + $0x18] sm:$0xff] %v842_v16 }
 0x1a8   : > { %v851_v20 = vld [vmem:[#allocation2] sm:$0xff] }
 0x1a9   : > { %v852_v25 = vld [vmem:[#allocation2 + $0x8] sm:$0xff]  ;;  %v853_v26 = vld [vmem:[#allocation2 + $0x10] sm:$0xff]  ;;  %v877_v32 = vadd.f32 %v860_v28, %v851_v20 }
 0x1aa   : > { %v854_v27 = vld [vmem:[#allocation2 + $0x18] sm:$0xff]  ;;  %v878_v33 = vadd.f32 %v864_v29, %v852_v25  ;;  %v879_v34 = vadd.f32 %v868_v30, %v853_v26 }
 0x1ab   : > { %v880_v35 = vadd.f32 %v872_v31, %v854_v27  ;;  %v881_v36 = vmax.f32 %v877_v32, 0.0 }
 0x1ac   : > { %v882_v37 = vmax.f32 %v878_v33, 0.0  ;;  %v883_v38 = vmax.f32 %v879_v34, 0.0 }
 0x1ad   : > { %v884_v39 = vmax.f32 %v880_v35, 0.0  ;;  %885 = vst [vmem:[%s1633_s20] sm:$0xff] %v881_v36 }
 0x1ae   : > { %886 = vst [vmem:[%s1633_s20 + $0x8] sm:$0xff] %v882_v37  ;;  %887 = vst [vmem:[%s1633_s20 + $0x10] sm:$0xff] %v883_v38 }
 0x1af   : > { %888 = vst [vmem:[%s1633_s20 + $0x18] sm:$0xff] %v884_v39 }
 0x1b0 PF: > { %s16_s19 = sadd.s32 1, %s1469_s19   ;;  %s1937_s12 = smov %s1445_s13 }
 0x1b1   : > { %p13_p8 = scmp.ge.s32.totalorder %s16_s19, 52   ;;  %s1938_s13 = smov %s1449_s14 }
 0x1b2   : > { %s1939_s14 = smov %s1563_s5  ;;  %s1940_s15 = smov %s1461_s17 }
 0x1b3   : > { %s1941_s16 = smov %s1465_s18  ;;  %s1942_s17 = smov %s1945_s21 }
 0x1b4   : > { %s1943_s18 = smov %s1949_s22  ;;  %15 = sbr.rel (!%p13_p8) target bundleno = 5 (0x5), region = 86 }
 0x1bb   :  { %919 = vsyncpa [#allocation4], 1 }
 0x1bc   :  { %921 = vsyncpa [#allocation4 + $0x1], 1 }

// kernel: nural_netwoek_1hl2gt_forward.3
= control target key start
LH: loop header
LB: loop body
LE: loop exit
PB: predicated region body
PF: predicated region fallthrough
CT: control target
= control target key end

     0   :  { %s2168_s0 = inlined_call_operand.vmem [shape: f32[8,9728], index: 0, kind: input, shape index: {}]   ;;  %s2169_s1 = inlined_call_operand.hbm [shape: f32[9728,5120], index: 1, kind: input, shape index: {}]   ;;  %s2170_s2 = inlined_call_operand.hbm [shape: f32[1,5120], index: 2, kind: input, shape index: {}]   ;;  %s2171_s3 = inlined_call_operand.vmem [shape: f32[8,5120], index: 3, kind: output, shape index: {}]  }
   0x1   :  { %2177 = sst [smem:[#allocation10_spill]] %s2169_s1 }
   0x2   :  { %8 = vsyncpa [#allocation4], 0 }
   0x3   :  { %10 = vsyncpa [#allocation4 + $0x1], 0 }
   0x4   :  { %11 = vsyncpa [#allocation6], 0 }
   0x5   :  { %13 = vsyncpa [#allocation6 + $0x1], 0  ;;  %s1622_s12 = smov 0   ;;  %s1624_s13 = smov 0  }
   0x6   :  { %s1626_s14 = smov 0   ;;  %s1628_s15 = smov 0  }
   0x7   :  { %s1630_s16 = smov 0   ;;  %s1632_s17 = smov 0  }
   0x8   :  { %s1634_s18 = smov 0   ;;  %s1636_s19 = smov 0  }
   0x9   :  { %s1638_s20 = smov 0   ;;  %s1640_s21 = smov 0  }
   0xa   :  { %s1642_s22 = smov 0  }
   0xb LB: > { %s31_s23 = sadd.s32 1, %s1586_s20  ;;  %s75_s24 = sadd.s32 1, %s1574_s17  ;;  %s1594_s22 = sphi %s1642_s22, %s19_s22   ;;  %s1590_s21 = sphi %s1640_s21, %s2203_s21   ;;  %s1586_s20 = sphi %s1638_s20, %s2202_s20   ;;  %s1582_s19 = sphi %s1636_s19, %s2201_s19   ;;  %s1578_s18 = sphi %s1634_s18, %s2200_s18   ;;  %s1574_s17 = sphi %s1632_s17, %s2199_s17   ;;  %s1570_s16 = sphi %s1630_s16, %s2198_s16   ;;  %s1566_s15 = sphi %s1628_s15, %s2197_s15   ;;  %s1562_s14 = sphi %s1626_s14, %s2196_s14   ;;  %s1558_s13 = sphi %s1624_s13, %s2195_s13   ;;  %s1554_s12 = sphi %s1622_s12, %s2194_s12  }
   0xc   : > { %p1679_p0 = scmp.ge.s32.totalorder %s31_s23, 19  ;;  %p82_p1 = scmp.ne.s32.totalorder %s1574_s17, %s1570_s16 }
   0xd   : > { %p2173_p2 = scmp.eq.s32.totalorder %s1594_s22, 0  ;;  %p2172_p4 = scmp.lt.s32.totalorder %s1594_s22, 190 }
   0xe   : > { %s2205_s23 = smov (%p1679_p0, %s31_s23), 0  ;;  %s179_s27 = sand.u32 1, %s1574_s17  }
   0xf   : > { %p84_p3 = por %p2173_p2, %p82_p1  ;;  %s70_s26 = ssub.s32 %s1586_s20, %s2205_s23 }
  0x10   : > { %s1055_s28 = sshll.u32 %s179_s27, 11  ;;  %s1057_s29 = sshll.u32 %s1590_s21, 2 }
  0x11   : > { %s1335_s30 = smul.u32 2560, %s1586_s20  ;;  %s183_s4 = scalar_lea.vmem [#allocation3], %s1055_s28 }
  0x12   : > { %s193_s5 = sshll.u32 %s183_s4, 4  ;;  %p1702_p5 = pnand %p2172_p4, %p84_p3  ;;  %s1698_s5 = int_to_ptr.vmem [resolvable:$true] %s193_s5 }
  0x13   : > { %s190_s7 = sadd.s32 %s1335_s30, %s1057_s29  ;;  %s2180_s1 = sld [smem:[#allocation10_spill]] }
  0x14   : > { %s1059_s8 = sshll.u32 %s190_s7, 7  ;;  %s1712_s28 = scalar_lea.sflag [#allocation4], %s179_s27 }
  0x15   : > { %p1442_p8 = pneg %p1702_p5 }
  0x19   : > { %s1709_s11 = scalar_lea.hbm %s2180_s1, %s1059_s8  ;;  %s1445_s7 = scalar_lea.hbm %s2180_s1, 6225920 }
  0x1a   : > { %s1440_s4 = scalar_lea.hbm %s1709_s11, 32768  ;;  %p1446_p11 = scmp.lt.u32.totalorder %s1709_s11, %s2180_s1 }
  0x1b   : > { %p1441_p7 = scmp.ne.s32.totalorder %s1709_s11, %s1440_s4  ;;  %p1447_p12 = scmp.lt.u32.totalorder %s1445_s7, %s1440_s4 }
  0x1c   : > { %p1449_p1 = scmp.lt.u32.totalorder %s1440_s4, %s1709_s11 }
  0x1d   : > { %p1443_p9 = pnand %p1442_p8, %p1441_p7  ;;  %p1448_p13 = por %p1447_p12, %p1446_p11 }
  0x1f   : > { %p1444_p10 = pneg %p1443_p9  ;;  %p1450_p3 = por %p1449_p1, %p1448_p13 }
  0x21   : > { %p1451_p4 = pnand %p1450_p3, %p1444_p10 }
  0x23   : > { %1454 = shalt.err (!%p1451_p4)
}
  0x24   : > { %s1455_s27 = scalar_lea.vmem %s1698_s5, 32768  ;;  %s1596_s10 = smov [#allocation3]  }
  0x25   : > { %p1456_p7 = scmp.ne.s32.totalorder %s1698_s5, %s1455_s27  ;;  %s1460_s29 = sshll.u32 %s1596_s10, 4  ;;  %s1461_s29 = int_to_ptr.vmem [resolvable:$false] %s1460_s29 }
  0x26   : > { %s1462_s30 = scalar_lea.vmem %s1461_s29, 65536  ;;  %p1463_p6 = scmp.lt.s32.totalorder %s1698_s5, %s1461_s29 }
  0x27   : > { %p1458_p9 = pnand %p1456_p7, %p1442_p8  ;;  %p1464_p11 = scmp.lt.s32.totalorder %s1462_s30, %s1455_s27 }
  0x29   : > { %p1459_p2 = pneg %p1458_p9  ;;  %p1465_p12 = por %p1464_p11, %p1463_p6 }
  0x2b   : > { %p1466_p13 = pnand %p1465_p12, %p1459_p2 }
  0x2d   : > { %1469 = shalt.err (!%p1466_p13)
}
  0x2e   : > { %s1597_s4 = smov 5120   ;;  %s1598_s7 = smov 512  }
  0x2f   : > { %s1599_s8 = smov 32   ;;  %p220_p2 = scmp.lt.s32.totalorder %s1594_s22, 191 }
  0x30   : > { %1343 = dma.hbm_to_vmem [thread:$0]  (!%p1702_p5), %s1709_s11, 32768, %s1698_s5, %s1712_s28, %s1597_s4, %s1598_s7, %s1599_s8  }
  0x31   : > { %p2181_p4 = scmp.ge.s32.totalorder %s1594_s22, 1  ;;  %s1051_s27 = sadd.s32 4294967295, %s1594_s22  }
  0x32   : > { %s34_s10 = sadd.s32 1, %s1590_s21  ;;  %p88_p8 = scmp.ne.s32.totalorder %s1570_s16, %s1566_s15 }
  0x33   : > { %p1743_p6 = pnand %p2181_p4, %p220_p2  ;;  %s2207_s10 = smov (!%p1679_p0, %s34_s10), %s1590_s21 }
  0x34   : > { %p1754_p10 = scmp.eq.s32.totalorder %s1051_s27, 0  ;;  %p36_p5 = scmp.ge.s32.totalorder %s2207_s10, 10 }
  0x35   : > { %s101_s5 = sadd.s32 1, %s1562_s14  ;;  %p108_p3 = scmp.ne.s32.totalorder %s1562_s14, %s1558_s13 }
  0x36   : > { %p1761_p1 = por %p1754_p10, %p88_p8  ;;  %s2209_s10 = smov (%p36_p5, %s2207_s10), 0 }
  0x37   : > { %2185 = sst [smem:[#allocation9_spill]] %s2209_s10  ;;  %p2186_p0 = scmp.eq.s32.totalorder %s1594_s22, 0 }
  0x38   : > { %s2184_s11 = scalar_select %p1761_p1, 1, 0 }
  0x39   : > { %p1771_p7 = por %p108_p3, %p2186_p0  ;;  %p114_p9 = scmp.ne.s32.totalorder %s1558_s13, %s1554_s12 }
  0x3a   : > { %s71_s25 = ssub.s32 %s1590_s21, %s2209_s10  ;;  %s203_s28 = sand.u32 1, %s1562_s14  }
  0x3b   : > { %s72_s29 = sor.u32 %s71_s25, %s70_s26  ;;  %p99_p11 = scmp.eq.s32.totalorder %s71_s25, 0 }
  0x3c   : > { %p73_p12 = scmp.eq.s32.totalorder %s72_s29, 0  ;;  %p1785_p13 = por %p114_p9, %p1754_p10 }
  0x3d   : > { %s1790_s4 = scalar_select %p99_p11, %s1562_s14, %s101_s5  }
  0x3e   : > { %s2188_s30 = scalar_select %p1785_p13, 1, 0 }
  0x3f   : > { %s1795_s7 = scalar_select %p73_p12, %s1574_s17, %s75_s24  }
  0x40   : > { %s1060_s8 = sshll.u32 %s203_s28, 2  ;;  %s1074_s27 = sshll.u32 %s1590_s21, 6 }
  0x41   : > { %s1801_s10 = scalar_lea.hbm %s2170_s2, %s1074_s27  ;;  %s207_s26 = scalar_lea.vmem [#allocation5], %s1060_s8 }
  0x42   : > { %s215_s6 = sshll.u32 %s207_s26, 4  ;;  %p2189_p2 = scmp.lt.s32.totalorder %s1594_s22, 190  ;;  %s1803_s6 = int_to_ptr.vmem [resolvable:$true] %s215_s6 }
  0x43   : > { %s204_s5 = scalar_lea.sflag [#allocation6], %s203_s28  ;;  %s1470_s1 = scalar_lea.hbm %s1801_s10, 64 }
  0x44   : > { %p1809_p4 = pnand %p2189_p2, %p1771_p7  ;;  %p1471_p8 = scmp.ne.s32.totalorder %s1801_s10, %s1470_s1 }
  0x45   : > { %s1475_s15 = scalar_lea.hbm %s2170_s2, 640  ;;  %p1476_p0 = scmp.lt.u32.totalorder %s1801_s10, %s2170_s2 }
  0x46   : > { %p1472_p10 = pneg %p1809_p4  ;;  %p1477_p7 = scmp.lt.u32.totalorder %s1475_s15, %s1470_s1 }
  0x47   : > { %p1479_p11 = scmp.lt.u32.totalorder %s1470_s1, %s1801_s10 }
  0x48   : > { %p1473_p5 = pnand %p1472_p10, %p1471_p8  ;;  %p1478_p9 = por %p1477_p7, %p1476_p0 }
  0x4a   : > { %p1474_p3 = pneg %p1473_p5  ;;  %p1480_p12 = por %p1479_p11, %p1478_p9 }
  0x4c   : > { %p1481_p2 = pnand %p1480_p12, %p1474_p3 }
  0x4e   : > { %1484 = shalt.err (!%p1481_p2)
}
  0x4f   : > { %s1485_s28 = scalar_lea.vmem %s1803_s6, 64  ;;  %s1600_s12 = smov [#allocation5]  }
  0x50   : > { %p1486_p8 = scmp.ne.s32.totalorder %s1803_s6, %s1485_s28  ;;  %s1490_s26 = sshll.u32 %s1600_s12, 4  ;;  %s1491_s26 = int_to_ptr.vmem [resolvable:$false] %s1490_s26 }
  0x51   : > { %s1492_s25 = scalar_lea.vmem %s1491_s26, 128  ;;  %p1493_p1 = scmp.lt.s32.totalorder %s1803_s6, %s1491_s26 }
  0x52   : > { %p1488_p5 = pnand %p1486_p8, %p1472_p10  ;;  %p1494_p0 = scmp.lt.s32.totalorder %s1492_s25, %s1485_s28 }
  0x54   : > { %p1489_p13 = pneg %p1488_p5  ;;  %p1495_p7 = por %p1494_p0, %p1493_p1 }
  0x56   : > { %p1496_p9 = pnand %p1495_p7, %p1489_p13 }
  0x58   : > { %1499 = shalt.err (!%p1496_p9)
}
  0x59   : > { %1346 = dma.hbm_to_vmem [thread:$0]  (!%p1809_p4), %s1801_s10, 64, %s1803_s6, %s204_s5  }
  0x5a   : > { %224 = sbr.rel (%p1743_p6) target bundleno = 476 (0x1dc), region = 32  ;;  %s226_s1 = sand.u32 (!%p1743_p6), 1, %s1570_s16  }
  0x5b   : > { %s1064_s29 = sshll.u32 (!%p1743_p6), %s226_s1, 11  ;;  %s227_s15 = scalar_lea.sflag (!%p1743_p6), [#allocation4], %s226_s1 }
  0x5c   : > { %s1841_s8 = scalar_lea.vmem (!%p1743_p6), [#allocation3], %s1064_s29  ;;  %p2191_p10 = scmp.ne.s32.totalorder (!%p1743_p6), %s2184_s11, 0 }
  0x61   : > { %1545 = dma.done.wait (%p2191_p10), %s227_s15, 32768  }
  0x62   : > { %1547 = vsyncadd (%p2191_p10), %s227_s15, 4294934528  ;;  %s235_s24 = sand.u32 1, %s1558_s13   ;;  %p2192_p6 = scmp.ne.s32.totalorder %s2188_s30, 0 }
  0x63   : > { %s1848_s27 = sshll.u32 %s235_s24, 2  ;;  %s236_s9 = scalar_lea.sflag [#allocation6], %s235_s24 }
  0x64   : > { %s239_s10 = scalar_lea.vmem [#allocation5], %s1848_s27 }
  0x65   : > { %1549 = dma.done.wait (%p2192_p6), %s236_s9, 64  }
  0x66   : > { %1551 = vsyncadd (%p2192_p6), %s236_s9, 4294967232  ;;  %s1066_s6 = sshll.u32 %s1578_s18, 2  ;;  %s1068_s5 = sshll.u32 %s1582_s19, 2 }
  0x67   : > { %p283_p1 = scmp.lt.s32.totalorder %s1066_s6, 75  ;;  %p296_p13 = scmp.lt.s32.totalorder %s1068_s5, 39 }
  0x68   : > { %p1070_p4 = scmp.ne.s32.totalorder %s1578_s18, 0 }
  0x69   : > { %s2211_s6 = smov (!%p283_p1, %s1066_s6), 75  ;;  %s2213_s5 = smov (!%p296_p13, %s1068_s5), 39 }
  0x6a   : > { %s1067_s11 = sshll.u32 %s2211_s6, 3  ;;  %s1069_s25 = sshll.u32 %s2213_s5, 3  ;;  %v1601_v0 = vmov (!%p1070_p4), 0.0  }
  0x6b   : > { %s1860_s26 = scalar_lea.vmem %s2168_s0, %s1067_s11  ;;  %s1865_s30 = scalar_lea.vmem %s2171_s3, %s1069_s25  ;;  %307 = vst [vmem:[#allocation2] sm:$0xff] (!%p1070_p4), %v1601_v0  ;;  %308 = vst [vmem:[#allocation2 + $0x8] sm:$0xff] (!%p1070_p4), %v1601_v0 }
  0x6c   : > { %306 = sbr.rel (%p1070_p4) target bundleno = 115 (0x73), region = 44  ;;  %309 = vst [vmem:[#allocation2 + $0x10] sm:$0xff] (!%p1070_p4), %v1601_v0  ;;  %310 = vst [vmem:[#allocation2 + $0x18] sm:$0xff] (!%p1070_p4), %v1601_v0 }
  0x73 PF: > { %v320_v1 = vld [vmem:[%s1841_s8 + $0x8] sm:$0xff]  ;;  %v322_v3 = vld [vmem:[%s1841_s8 + $0x18] sm:$0xff]  ;;  %v319_v6 = vld [vmem:[%s1841_s8] sm:$0xff]  ;;  %p1071_p3 = scmp.ne.s32.totalorder %s1578_s18, 18 }
  0x74   : > { %v324_v2 = vld [vmem:[%s1841_s8 + $0x28] sm:$0xff]  ;;  %v326_v5 = vld [vmem:[%s1841_s8 + $0x38] sm:$0xff]  ;;  %v323_v7 = vld [vmem:[%s1841_s8 + $0x20] sm:$0xff] }
  0x75   : > { %v1075_v4 = vpack.c.bf16 %v324_v2, %v320_v1  ;;  %v1203_v8 = vpack.c.bf16 %v326_v5, %v322_v3  ;;  %v1077_v9 = vpack.c.bf16 %v323_v7, %v319_v6  ;;  %v321_v10 = vld [vmem:[%s1841_s8 + $0x10] sm:$0xff]  ;;  %v328_v12 = vld [vmem:[%s1841_s8 + $0x48] sm:$0xff]  ;;  %v330_v15 = vld [vmem:[%s1841_s8 + $0x58] sm:$0xff] }
  0x76   : > { %v325_v11 = vld [vmem:[%s1841_s8 + $0x30] sm:$0xff]  ;;  %v332_v14 = vld [vmem:[%s1841_s8 + $0x68] sm:$0xff]  ;;  %v334_v16 = vld [vmem:[%s1841_s8 + $0x78] sm:$0xff] }
  0x77   : > { %1076 = vmatprep.subr.bf16.mxu0 %v1075_v4  ;;  %v1205_v13 = vpack.c.bf16 %v325_v11, %v321_v10  ;;  %1204 = vmatprep.subr.bf16.mxu1 %v1203_v8  ;;  %v1079_v17 = vpack.c.bf16 %v332_v14, %v328_v12  ;;  %v1207_v18 = vpack.c.bf16 %v334_v16, %v330_v15  ;;  %v327_v19 = vld [vmem:[%s1841_s8 + $0x40] sm:$0xff]  ;;  %v329_v21 = vld [vmem:[%s1841_s8 + $0x50] sm:$0xff]  ;;  %v336_v24 = vld [vmem:[%s1841_s8 + $0x88] sm:$0xff] }
  0x78   : > { %1078 = vmatpush1.bf16.msra.mxu0 %v1077_v9  ;;  %v331_v20 = vld [vmem:[%s1841_s8 + $0x60] sm:$0xff]  ;;  %v333_v23 = vld [vmem:[%s1841_s8 + $0x70] sm:$0xff]  ;;  %v340_v25 = vld [vmem:[%s1841_s8 + $0xa8] sm:$0xff] }
  0x79   : > { %1206 = vmatpush1.bf16.msra.mxu1 %v1205_v13  ;;  %v1081_v22 = vpack.c.bf16 %v331_v20, %v327_v19  ;;  %1080 = vmatprep.subr.bf16.mxu0 %v1079_v17  ;;  %v1209_v26 = vpack.c.bf16 %v333_v23, %v329_v21  ;;  %v1083_v27 = vpack.c.bf16 %v340_v25, %v336_v24  ;;  %v338_v28 = vld [vmem:[%s1841_s8 + $0x98] sm:$0xff]  ;;  %v335_v30 = vld [vmem:[%s1841_s8 + $0x80] sm:$0xff]  ;;  %v337_v33 = vld [vmem:[%s1841_s8 + $0x90] sm:$0xff] }
  0x7a   : > { %1208 = vmatprep.subr.bf16.mxu1 %v1207_v18  ;;  %v342_v29 = vld [vmem:[%s1841_s8 + $0xb8] sm:$0xff]  ;;  %v339_v32 = vld [vmem:[%s1841_s8 + $0xa0] sm:$0xff]  ;;  %v341_v34 = vld [vmem:[%s1841_s8 + $0xb0] sm:$0xff] }
  0x7b   : > { %v1211_v31 = vpack.c.bf16 %v342_v29, %v338_v28  ;;  %v1085_v35 = vpack.c.bf16 %v339_v32, %v335_v30  ;;  %v344_v36 = vld [vmem:[%s1841_s8 + $0xc8] sm:$0xff]  ;;  %v346_v38 = vld [vmem:[%s1841_s8 + $0xd8] sm:$0xff]  ;;  %v1213_v39 = vpack.c.bf16 %v341_v34, %v337_v33  ;;  %v343_v42 = vld [vmem:[%s1841_s8 + $0xc0] sm:$0xff] }
  0x7c   : > { %1082 = vmatpush1.bf16.msra.mxu0 %v1081_v22  ;;  %v348_v37 = vld [vmem:[%s1841_s8 + $0xe8] sm:$0xff]  ;;  %v350_v41 = vld [vmem:[%s1841_s8 + $0xf8] sm:$0xff]  ;;  %v347_v43 = vld [vmem:[%s1841_s8 + $0xe0] sm:$0xff] }
  0x7d   : > { %1210 = vmatpush1.bf16.msra.mxu1 %v1209_v26  ;;  %1084 = vmatprep.subr.bf16.mxu0 %v1083_v27  ;;  %v1087_v40 = vpack.c.bf16 %v348_v37, %v344_v36  ;;  %v1215_v44 = vpack.c.bf16 %v350_v41, %v346_v38  ;;  %v345_v45 = vld [vmem:[%s1841_s8 + $0xd0] sm:$0xff]  ;;  %v352_v47 = vld [vmem:[%s1841_s8 + $0x108] sm:$0xff]  ;;  %v354_v49 = vld [vmem:[%s1841_s8 + $0x118] sm:$0xff]  ;;  %v1089_v51 = vpack.c.bf16 %v347_v43, %v343_v42 }
  0x7e   : > { %1212 = vmatprep.subr.bf16.mxu1 %v1211_v31  ;;  %v349_v46 = vld [vmem:[%s1841_s8 + $0xf0] sm:$0xff]  ;;  %v356_v48 = vld [vmem:[%s1841_s8 + $0x128] sm:$0xff]  ;;  %v358_v50 = vld [vmem:[%s1841_s8 + $0x138] sm:$0xff] }
  0x7f   : > { %v1217_v52 = vpack.c.bf16 %v349_v46, %v345_v45  ;;  %v1091_v53 = vpack.c.bf16 %v356_v48, %v352_v47  ;;  %v351_v54 = vld [vmem:[%s1841_s8 + $0x100] sm:$0xff]  ;;  %v353_v56 = vld [vmem:[%s1841_s8 + $0x110] sm:$0xff]  ;;  %v1219_v57 = vpack.c.bf16 %v358_v50, %v354_v49  ;;  %v360_v59 = vld [vmem:[%s1841_s8 + $0x148] sm:$0xff] }
  0x80   : > { %1086 = vmatpush1.bf16.msra.mxu0 %v1085_v35  ;;  %v355_v55 = vld [vmem:[%s1841_s8 + $0x120] sm:$0xff]  ;;  %v357_v58 = vld [vmem:[%s1841_s8 + $0x130] sm:$0xff]  ;;  %v364_v60 = vld [vmem:[%s1841_s8 + $0x168] sm:$0xff] }
  0x81   : > { %1214 = vmatpush1.bf16.msra.mxu1 %v1213_v39  ;;  %1088 = vmatprep.subr.bf16.mxu0 %v1087_v40  ;;  %v362_v61 = vld [vmem:[%s1841_s8 + $0x158] sm:$0xff]  ;;  %v1093_v63 = vpack.c.bf16 %v355_v55, %v351_v54  ;;  %v1221_v0 = vpack.c.bf16 %v357_v58, %v353_v56  ;;  %v1095_v1 = vpack.c.bf16 %v364_v60, %v360_v59  ;;  %v359_v2 = vld [vmem:[%s1841_s8 + $0x140] sm:$0xff]  ;;  %v361_v4 = vld [vmem:[%s1841_s8 + $0x150] sm:$0xff] }
  0x82   : > { %1216 = vmatprep.subr.bf16.mxu1 %v1215_v44  ;;  %v366_v62 = vld [vmem:[%s1841_s8 + $0x178] sm:$0xff]  ;;  %v363_v3 = vld [vmem:[%s1841_s8 + $0x160] sm:$0xff]  ;;  %v365_v6 = vld [vmem:[%s1841_s8 + $0x170] sm:$0xff] }
  0x83   : > { %v1223_v5 = vpack.c.bf16 %v366_v62, %v362_v61  ;;  %v368_v7 = vld [vmem:[%s1841_s8 + $0x188] sm:$0xff]  ;;  %v370_v9 = vld [vmem:[%s1841_s8 + $0x198] sm:$0xff]  ;;  %v1097_v11 = vpack.c.bf16 %v363_v3, %v359_v2  ;;  %v1225_v12 = vpack.c.bf16 %v365_v6, %v361_v4  ;;  %v367_v14 = vld [vmem:[%s1841_s8 + $0x180] sm:$0xff] }
  0x84   : > { %1090 = vmatpush1.bf16.msra.mxu0 %v1089_v51  ;;  %v372_v8 = vld [vmem:[%s1841_s8 + $0x1a8] sm:$0xff]  ;;  %v374_v10 = vld [vmem:[%s1841_s8 + $0x1b8] sm:$0xff]  ;;  %v371_v15 = vld [vmem:[%s1841_s8 + $0x1a0] sm:$0xff] }
  0x85   : > { %1218 = vmatpush1.bf16.msra.mxu1 %v1217_v52  ;;  %1092 = vmatprep.subr.bf16.mxu0 %v1091_v53  ;;  %v1099_v13 = vpack.c.bf16 %v372_v8, %v368_v7  ;;  %v369_v16 = vld [vmem:[%s1841_s8 + $0x190] sm:$0xff]  ;;  %v1227_v17 = vpack.c.bf16 %v374_v10, %v370_v9  ;;  %v376_v19 = vld [vmem:[%s1841_s8 + $0x1c8] sm:$0xff]  ;;  %v378_v21 = vld [vmem:[%s1841_s8 + $0x1d8] sm:$0xff]  ;;  %v1101_v23 = vpack.c.bf16 %v371_v15, %v367_v14 }
  0x86   : > { %1220 = vmatprep.subr.bf16.mxu1 %v1219_v57  ;;  %v373_v18 = vld [vmem:[%s1841_s8 + $0x1b0] sm:$0xff]  ;;  %v380_v20 = vld [vmem:[%s1841_s8 + $0x1e8] sm:$0xff]  ;;  %v382_v22 = vld [vmem:[%s1841_s8 + $0x1f8] sm:$0xff] }
  0x87   : > { %v1229_v24 = vpack.c.bf16 %v373_v18, %v369_v16  ;;  %v1103_v25 = vpack.c.bf16 %v380_v20, %v376_v19  ;;  %v375_v26 = vld [vmem:[%s1841_s8 + $0x1c0] sm:$0xff]  ;;  %v377_v28 = vld [vmem:[%s1841_s8 + $0x1d0] sm:$0xff]  ;;  %v1231_v29 = vpack.c.bf16 %v382_v22, %v378_v21  ;;  %v384_v31 = vld [vmem:[%s1841_s8 + $0x208] sm:$0xff] }
  0x88   : > { %1094 = vmatpush1.bf16.msra.mxu0 %v1093_v63  ;;  %v379_v27 = vld [vmem:[%s1841_s8 + $0x1e0] sm:$0xff]  ;;  %v381_v30 = vld [vmem:[%s1841_s8 + $0x1f0] sm:$0xff]  ;;  %v388_v32 = vld [vmem:[%s1841_s8 + $0x228] sm:$0xff] }
  0x89   : > { %1222 = vmatpush1.bf16.msra.mxu1 %v1221_v0  ;;  %1096 = vmatprep.subr.bf16.mxu0 %v1095_v1  ;;  %v386_v33 = vld [vmem:[%s1841_s8 + $0x218] sm:$0xff]  ;;  %v1105_v35 = vpack.c.bf16 %v379_v27, %v375_v26  ;;  %v1233_v36 = vpack.c.bf16 %v381_v30, %v377_v28  ;;  %v1107_v37 = vpack.c.bf16 %v388_v32, %v384_v31  ;;  %v383_v38 = vld [vmem:[%s1841_s8 + $0x200] sm:$0xff]  ;;  %v385_v40 = vld [vmem:[%s1841_s8 + $0x210] sm:$0xff] }
  0x8a   : > { %1224 = vmatprep.subr.bf16.mxu1 %v1223_v5  ;;  %v390_v34 = vld [vmem:[%s1841_s8 + $0x238] sm:$0xff]  ;;  %v387_v39 = vld [vmem:[%s1841_s8 + $0x220] sm:$0xff]  ;;  %v389_v42 = vld [vmem:[%s1841_s8 + $0x230] sm:$0xff] }
  0x8b   : > { %v1235_v41 = vpack.c.bf16 %v390_v34, %v386_v33  ;;  %v392_v43 = vld [vmem:[%s1841_s8 + $0x248] sm:$0xff]  ;;  %v394_v45 = vld [vmem:[%s1841_s8 + $0x258] sm:$0xff]  ;;  %v1109_v47 = vpack.c.bf16 %v387_v39, %v383_v38  ;;  %v1237_v48 = vpack.c.bf16 %v389_v42, %v385_v40  ;;  %v391_v50 = vld [vmem:[%s1841_s8 + $0x240] sm:$0xff] }
  0x8c   : > { %1098 = vmatpush1.bf16.msra.mxu0 %v1097_v11  ;;  %v396_v44 = vld [vmem:[%s1841_s8 + $0x268] sm:$0xff]  ;;  %v398_v46 = vld [vmem:[%s1841_s8 + $0x278] sm:$0xff]  ;;  %v395_v51 = vld [vmem:[%s1841_s8 + $0x260] sm:$0xff] }
  0x8d   : > { %1226 = vmatpush1.bf16.msra.mxu1 %v1225_v12  ;;  %1100 = vmatprep.subr.bf16.mxu0 %v1099_v13  ;;  %v1111_v49 = vpack.c.bf16 %v396_v44, %v392_v43  ;;  %v393_v52 = vld [vmem:[%s1841_s8 + $0x250] sm:$0xff]  ;;  %v1239_v53 = vpack.c.bf16 %v398_v46, %v394_v45  ;;  %v400_v55 = vld [vmem:[%s1841_s8 + $0x288] sm:$0xff]  ;;  %v402_v57 = vld [vmem:[%s1841_s8 + $0x298] sm:$0xff]  ;;  %v1113_v59 = vpack.c.bf16 %v395_v51, %v391_v50 }
  0x8e   : > { %1228 = vmatprep.subr.bf16.mxu1 %v1227_v17  ;;  %v397_v54 = vld [vmem:[%s1841_s8 + $0x270] sm:$0xff]  ;;  %v404_v56 = vld [vmem:[%s1841_s8 + $0x2a8] sm:$0xff]  ;;  %v406_v58 = vld [vmem:[%s1841_s8 + $0x2b8] sm:$0xff] }
  0x8f   : > { %v1241_v60 = vpack.c.bf16 %v397_v54, %v393_v52  ;;  %v1115_v61 = vpack.c.bf16 %v404_v56, %v400_v55  ;;  %v399_v62 = vld [vmem:[%s1841_s8 + $0x280] sm:$0xff]  ;;  %v401_v0 = vld [vmem:[%s1841_s8 + $0x290] sm:$0xff]  ;;  %v1243_v1 = vpack.c.bf16 %v406_v58, %v402_v57  ;;  %v408_v3 = vld [vmem:[%s1841_s8 + $0x2c8] sm:$0xff] }
  0x90   : > { %1102 = vmatpush1.bf16.msra.mxu0 %v1101_v23  ;;  %v403_v63 = vld [vmem:[%s1841_s8 + $0x2a0] sm:$0xff]  ;;  %v405_v2 = vld [vmem:[%s1841_s8 + $0x2b0] sm:$0xff]  ;;  %v412_v4 = vld [vmem:[%s1841_s8 + $0x2e8] sm:$0xff] }
  0x91   : > { %1230 = vmatpush1.bf16.msra.mxu1 %v1229_v24  ;;  %1104 = vmatprep.subr.bf16.mxu0 %v1103_v25  ;;  %v410_v5 = vld [vmem:[%s1841_s8 + $0x2d8] sm:$0xff]  ;;  %v1117_v7 = vpack.c.bf16 %v403_v63, %v399_v62  ;;  %v407_v8 = vld [vmem:[%s1841_s8 + $0x2c0] sm:$0xff]  ;;  %v1245_v9 = vpack.c.bf16 %v405_v2, %v401_v0  ;;  %v1119_v10 = vpack.c.bf16 %v412_v4, %v408_v3  ;;  %v409_v12 = vld [vmem:[%s1841_s8 + $0x2d0] sm:$0xff] }
  0x92   : > { %1232 = vmatprep.subr.bf16.mxu1 %v1231_v29  ;;  %v414_v6 = vld [vmem:[%s1841_s8 + $0x2f8] sm:$0xff]  ;;  %v411_v11 = vld [vmem:[%s1841_s8 + $0x2e0] sm:$0xff]  ;;  %v413_v13 = vld [vmem:[%s1841_s8 + $0x2f0] sm:$0xff] }
  0x93   : > { %v1247_v14 = vpack.c.bf16 %v414_v6, %v410_v5  ;;  %v416_v15 = vld [vmem:[%s1841_s8 + $0x308] sm:$0xff]  ;;  %v418_v18 = vld [vmem:[%s1841_s8 + $0x318] sm:$0xff]  ;;  %v1121_v20 = vpack.c.bf16 %v411_v11, %v407_v8  ;;  %v1249_v21 = vpack.c.bf16 %v413_v13, %v409_v12  ;;  %v415_v23 = vld [vmem:[%s1841_s8 + $0x300] sm:$0xff] }
  0x94   : > { %1106 = vmatpush1.bf16.msra.mxu0 %v1105_v35  ;;  %v420_v16 = vld [vmem:[%s1841_s8 + $0x328] sm:$0xff]  ;;  %v422_v19 = vld [vmem:[%s1841_s8 + $0x338] sm:$0xff]  ;;  %v419_v24 = vld [vmem:[%s1841_s8 + $0x320] sm:$0xff] }
  0x95   : > { %1234 = vmatpush1.bf16.msra.mxu1 %v1233_v36  ;;  %1108 = vmatprep.subr.bf16.mxu0 %v1107_v37  ;;  %v316_v17 = vld [vmem:[%s1860_s26 + $0x8] sm:$0xff]  ;;  %v1123_v22 = vpack.c.bf16 %v420_v16, %v416_v15  ;;  %v417_v25 = vld [vmem:[%s1841_s8 + $0x310] sm:$0xff]  ;;  %v1251_v26 = vpack.c.bf16 %v422_v19, %v418_v18  ;;  %v426_v30 = vld [vmem:[%s1841_s8 + $0x358] sm:$0xff]  ;;  %v1125_v32 = vpack.c.bf16 %v419_v24, %v415_v23 }
  0x96   : > { %1236 = vmatprep.subr.bf16.mxu1 %v1235_v41  ;;  %639 = vmatprep.mubr.f32.mxu0 %v316_v17  ;;  %v421_v27 = vld [vmem:[%s1841_s8 + $0x330] sm:$0xff]  ;;  %v424_v28 = vld [vmem:[%s1841_s8 + $0x348] sm:$0xff]  ;;  %v430_v31 = vld [vmem:[%s1841_s8 + $0x378] sm:$0xff] }
  0x97   : > { %781 = vmatprep.mubr.f32.mxu1 %v316_v17  ;;  %v428_v29 = vld [vmem:[%s1841_s8 + $0x368] sm:$0xff]  ;;  %v1253_v33 = vpack.c.bf16 %v421_v27, %v417_v25  ;;  %v423_v35 = vld [vmem:[%s1841_s8 + $0x340] sm:$0xff]  ;;  %v425_v37 = vld [vmem:[%s1841_s8 + $0x350] sm:$0xff]  ;;  %v1255_v38 = vpack.c.bf16 %v430_v31, %v426_v30 }
  0x98   : > { %1110 = vmatpush1.bf16.msra.mxu0 %v1109_v47  ;;  %v1127_v34 = vpack.c.bf16 %v428_v29, %v424_v28  ;;  %v427_v36 = vld [vmem:[%s1841_s8 + $0x360] sm:$0xff]  ;;  %v429_v39 = vld [vmem:[%s1841_s8 + $0x370] sm:$0xff]  ;;  %v432_v40 = vld [vmem:[%s1841_s8 + $0x388] sm:$0xff] }
  0x99   : > { %1238 = vmatpush1.bf16.msra.mxu1 %v1237_v48  ;;  %1112 = vmatprep.subr.bf16.mxu0 %v1111_v49  ;;  %v436_v41 = vld [vmem:[%s1841_s8 + $0x3a8] sm:$0xff]  ;;  %v434_v42 = vld [vmem:[%s1841_s8 + $0x398] sm:$0xff]  ;;  %v1129_v44 = vpack.c.bf16 %v427_v36, %v423_v35  ;;  %v1257_v45 = vpack.c.bf16 %v429_v39, %v425_v37  ;;  %v431_v47 = vld [vmem:[%s1841_s8 + $0x380] sm:$0xff] }
  0x9a   : > { %1240 = vmatprep.subr.bf16.mxu1 %v1239_v53  ;;  %v438_v43 = vld [vmem:[%s1841_s8 + $0x3b8] sm:$0xff]  ;;  %v1131_v46 = vpack.c.bf16 %v436_v41, %v432_v40  ;;  %v435_v48 = vld [vmem:[%s1841_s8 + $0x3a0] sm:$0xff]  ;;  %v433_v49 = vld [vmem:[%s1841_s8 + $0x390] sm:$0xff] }
  0x9b   : > { %v1259_v50 = vpack.c.bf16 %v438_v43, %v434_v42  ;;  %v437_v51 = vld [vmem:[%s1841_s8 + $0x3b0] sm:$0xff]  ;;  %v440_v52 = vld [vmem:[%s1841_s8 + $0x3c8] sm:$0xff]  ;;  %v442_v54 = vld [vmem:[%s1841_s8 + $0x3d8] sm:$0xff]  ;;  %v1133_v56 = vpack.c.bf16 %v435_v48, %v431_v47 }
  0x9c   : > { %1114 = vmatpush1.bf16.msra.mxu0 %v1113_v59  ;;  %v444_v53 = vld [vmem:[%s1841_s8 + $0x3e8] sm:$0xff]  ;;  %v446_v55 = vld [vmem:[%s1841_s8 + $0x3f8] sm:$0xff]  ;;  %v1261_v57 = vpack.c.bf16 %v437_v51, %v433_v49  ;;  %v439_v59 = vld [vmem:[%s1841_s8 + $0x3c0] sm:$0xff] }
  0x9d   : > { %1242 = vmatpush1.bf16.msra.mxu1 %v1241_v60  ;;  %1116 = vmatprep.subr.bf16.mxu0 %v1115_v61  ;;  %v1135_v58 = vpack.c.bf16 %v444_v53, %v440_v52  ;;  %v443_v60 = vld [vmem:[%s1841_s8 + $0x3e0] sm:$0xff]  ;;  %v441_v61 = vld [vmem:[%s1841_s8 + $0x3d0] sm:$0xff]  ;;  %v1263_v62 = vpack.c.bf16 %v446_v55, %v442_v54  ;;  %v448_v0 = vld [vmem:[%s1841_s8 + $0x408] sm:$0xff] }
  0x9e   : > { %1244 = vmatprep.subr.bf16.mxu1 %v1243_v1  ;;  %v445_v63 = vld [vmem:[%s1841_s8 + $0x3f0] sm:$0xff]  ;;  %v452_v1 = vld [vmem:[%s1841_s8 + $0x428] sm:$0xff]  ;;  %v450_v2 = vld [vmem:[%s1841_s8 + $0x418] sm:$0xff]  ;;  %v1137_v4 = vpack.c.bf16 %v443_v60, %v439_v59 }
  0x9f   : > { %v454_v3 = vld [vmem:[%s1841_s8 + $0x438] sm:$0xff]  ;;  %v1265_v5 = vpack.c.bf16 %v445_v63, %v441_v61  ;;  %v1139_v6 = vpack.c.bf16 %v452_v1, %v448_v0  ;;  %v451_v8 = vld [vmem:[%s1841_s8 + $0x420] sm:$0xff]  ;;  %v453_v11 = vld [vmem:[%s1841_s8 + $0x430] sm:$0xff] }
  0xa0   : > { %1118 = vmatpush1.bf16.msra.mxu0 %v1117_v7  ;;  %v447_v7 = vld [vmem:[%s1841_s8 + $0x400] sm:$0xff]  ;;  %v456_v12 = vld [vmem:[%s1841_s8 + $0x448] sm:$0xff]  ;;  %v462_v15 = vld [vmem:[%s1841_s8 + $0x478] sm:$0xff] }
  0xa1   : > { %1246 = vmatpush1.bf16.msra.mxu1 %v1245_v9  ;;  %1120 = vmatprep.subr.bf16.mxu0 %v1119_v10  ;;  %v449_v9 = vld [vmem:[%s1841_s8 + $0x410] sm:$0xff]  ;;  %v1267_v10 = vpack.c.bf16 %v454_v3, %v450_v2  ;;  %v460_v13 = vld [vmem:[%s1841_s8 + $0x468] sm:$0xff]  ;;  %v315_v16 = vld [vmem:[%s1860_s26] sm:$0xff]  ;;  %v1141_v17 = vpack.c.bf16 %v451_v8, %v447_v7 }
  0xa2   : > { %1248 = vmatprep.subr.bf16.mxu1 %v1247_v14  ;;  %v458_v14 = vld [vmem:[%s1841_s8 + $0x458] sm:$0xff]  ;;  %v1269_v18 = vpack.c.bf16 %v453_v11, %v449_v9  ;;  %v1143_v19 = vpack.c.bf16 %v460_v13, %v456_v12  ;;  %v461_v24 = vld [vmem:[%s1841_s8 + $0x470] sm:$0xff]  ;;  %v464_v25 = vld [vmem:[%s1841_s8 + $0x488] sm:$0xff] }
  0xa3   : > { %v1271_v23 = vpack.c.bf16 %v462_v15, %v458_v14  ;;  %v466_v27 = vld [vmem:[%s1841_s8 + $0x498] sm:$0xff]  ;;  %v469_v36 = vld [vmem:[%s1841_s8 + $0x4b0] sm:$0xff]  ;;  %v472_v37 = vld [vmem:[%s1841_s8 + $0x4c8] sm:$0xff] }
  0xa4   : > { %1122 = vmatpush1.bf16.msra.mxu0 %v1121_v20  ;;  %v455_v20 = vld [vmem:[%s1841_s8 + $0x440] sm:$0xff]  ;;  %v470_v28 = vld [vmem:[%s1841_s8 + $0x4b8] sm:$0xff]  ;;  %v477_v48 = vld [vmem:[%s1841_s8 + $0x4f0] sm:$0xff] }
  0xa5   : > { %1250 = vmatpush1.bf16.msra.mxu1 %v1249_v21  ;;  %1124 = vmatprep.subr.bf16.mxu0 %v1123_v22  ;;  %v459_v21 = vld [vmem:[%s1841_s8 + $0x460] sm:$0xff]  ;;  %v457_v22 = vld [vmem:[%s1841_s8 + $0x450] sm:$0xff]  ;;  %v1275_v35 = vpack.c.bf16 %v470_v28, %v466_v27  ;;  %v474_v39 = vld [vmem:[%s1841_s8 + $0x4d8] sm:$0xff] }
  0xa6   : > { %1252 = vmatprep.subr.bf16.mxu1 %v1251_v26  ;;  %v468_v26 = vld [vmem:[%s1841_s8 + $0x4a8] sm:$0xff]  ;;  %v1145_v29 = vpack.c.bf16 %v459_v21, %v455_v20  ;;  %v1273_v30 = vpack.c.bf16 %v461_v24, %v457_v22  ;;  %v478_v40 = vld [vmem:[%s1841_s8 + $0x4f8] sm:$0xff]  ;;  %v485_v60 = vld [vmem:[%s1841_s8 + $0x530] sm:$0xff] }
  0xa7   : > { %v1147_v31 = vpack.c.bf16 %v468_v26, %v464_v25  ;;  %v1279_v47 = vpack.c.bf16 %v478_v40, %v474_v39  ;;  %v480_v49 = vld [vmem:[%s1841_s8 + $0x508] sm:$0xff]  ;;  %v482_v51 = vld [vmem:[%s1841_s8 + $0x518] sm:$0xff]  ;;  %v493_v8 = vld [vmem:[%s1841_s8 + $0x570] sm:$0xff] }
  0xa8   : > { %1126 = vmatpush1.bf16.msra.mxu0 %v1125_v32  ;;  %v463_v32 = vld [vmem:[%s1841_s8 + $0x480] sm:$0xff]  ;;  %v486_v52 = vld [vmem:[%s1841_s8 + $0x538] sm:$0xff]  ;;  %v488_v61 = vld [vmem:[%s1841_s8 + $0x548] sm:$0xff] }
  0xa9   : > { %1254 = vmatpush1.bf16.msra.mxu1 %v1253_v33  ;;  %1128 = vmatprep.subr.bf16.mxu0 %v1127_v34  ;;  %v467_v33 = vld [vmem:[%s1841_s8 + $0x4a0] sm:$0xff]  ;;  %v465_v34 = vld [vmem:[%s1841_s8 + $0x490] sm:$0xff]  ;;  %v1283_v59 = vpack.c.bf16 %v486_v52, %v482_v51  ;;  %v490_v63 = vld [vmem:[%s1841_s8 + $0x558] sm:$0xff] }
  0xaa   : > { %1256 = vmatprep.subr.bf16.mxu1 %v1255_v38  ;;  %v476_v38 = vld [vmem:[%s1841_s8 + $0x4e8] sm:$0xff]  ;;  %v1149_v41 = vpack.c.bf16 %v467_v33, %v463_v32  ;;  %v1277_v42 = vpack.c.bf16 %v469_v36, %v465_v34  ;;  %v494_v0 = vld [vmem:[%s1841_s8 + $0x578] sm:$0xff]  ;;  %v495_v14 = vld [vmem:[%s1841_s8 + $0x580] sm:$0xff] }
  0xab   : > { %v1151_v43 = vpack.c.bf16 %v476_v38, %v472_v37  ;;  %v1287_v7 = vpack.c.bf16 %v494_v0, %v490_v63  ;;  %v496_v9 = vld [vmem:[%s1841_s8 + $0x588] sm:$0xff]  ;;  %v498_v11 = vld [vmem:[%s1841_s8 + $0x598] sm:$0xff]  ;;  %v509_v33 = vld [vmem:[%s1841_s8 + $0x5f0] sm:$0xff] }
  0xac   : > { %1130 = vmatpush1.bf16.msra.mxu0 %v1129_v44  ;;  %v471_v44 = vld [vmem:[%s1841_s8 + $0x4c0] sm:$0xff]  ;;  %v502_v12 = vld [vmem:[%s1841_s8 + $0x5b8] sm:$0xff]  ;;  %v504_v21 = vld [vmem:[%s1841_s8 + $0x5c8] sm:$0xff] }
  0xad   : > { %1258 = vmatpush1.bf16.msra.mxu1 %v1257_v45  ;;  %1132 = vmatprep.subr.bf16.mxu0 %v1131_v46  ;;  %v475_v45 = vld [vmem:[%s1841_s8 + $0x4e0] sm:$0xff]  ;;  %v473_v46 = vld [vmem:[%s1841_s8 + $0x4d0] sm:$0xff]  ;;  %v1291_v20 = vpack.c.bf16 %v502_v12, %v498_v11  ;;  %v508_v22 = vld [vmem:[%s1841_s8 + $0x5e8] sm:$0xff] }
  0xae   : > { %1260 = vmatprep.subr.bf16.mxu1 %v1259_v50  ;;  %v484_v50 = vld [vmem:[%s1841_s8 + $0x528] sm:$0xff]  ;;  %v1153_v53 = vpack.c.bf16 %v475_v45, %v471_v44  ;;  %v1281_v54 = vpack.c.bf16 %v477_v48, %v473_v46  ;;  %v506_v24 = vld [vmem:[%s1841_s8 + $0x5d8] sm:$0xff]  ;;  %v1167_v28 = vpack.c.bf16 %v508_v22, %v504_v21  ;;  %v517_v45 = vld [vmem:[%s1841_s8 + $0x630] sm:$0xff] }
  0xaf   : > { %v1155_v55 = vpack.c.bf16 %v484_v50, %v480_v49  ;;  %v510_v25 = vld [vmem:[%s1841_s8 + $0x5f8] sm:$0xff]  ;;  %v512_v34 = vld [vmem:[%s1841_s8 + $0x608] sm:$0xff] }
  0xb0   : > { %1134 = vmatpush1.bf16.msra.mxu0 %v1133_v56  ;;  %v479_v56 = vld [vmem:[%s1841_s8 + $0x500] sm:$0xff]  ;;  %v1295_v32 = vpack.c.bf16 %v510_v25, %v506_v24  ;;  %v514_v36 = vld [vmem:[%s1841_s8 + $0x618] sm:$0xff]  ;;  %v520_v46 = vld [vmem:[%s1841_s8 + $0x648] sm:$0xff] }
  0xb1   : > { %1262 = vmatpush1.bf16.msra.mxu1 %v1261_v57  ;;  %1136 = vmatprep.subr.bf16.mxu0 %v1135_v58  ;;  %v483_v57 = vld [vmem:[%s1841_s8 + $0x520] sm:$0xff]  ;;  %v481_v58 = vld [vmem:[%s1841_s8 + $0x510] sm:$0xff]  ;;  %v518_v37 = vld [vmem:[%s1841_s8 + $0x638] sm:$0xff] }
  0xb2   : > { %1264 = vmatprep.subr.bf16.mxu1 %v1263_v62  ;;  %v492_v62 = vld [vmem:[%s1841_s8 + $0x568] sm:$0xff]  ;;  %v1157_v1 = vpack.c.bf16 %v483_v57, %v479_v56  ;;  %v1285_v2 = vpack.c.bf16 %v485_v60, %v481_v58  ;;  %v1299_v44 = vpack.c.bf16 %v518_v37, %v514_v36  ;;  %v522_v48 = vld [vmem:[%s1841_s8 + $0x658] sm:$0xff]  ;;  %v525_v57 = vld [vmem:[%s1841_s8 + $0x670] sm:$0xff] }
  0xb3   : > { %v1159_v3 = vpack.c.bf16 %v492_v62, %v488_v61  ;;  %v526_v49 = vld [vmem:[%s1841_s8 + $0x678] sm:$0xff]  ;;  %v528_v58 = vld [vmem:[%s1841_s8 + $0x688] sm:$0xff]  ;;  %v543_v25 = vld [vmem:[%s1841_s8 + $0x700] sm:$0xff] }
  0xb4   : > { %1138 = vmatpush1.bf16.msra.mxu0 %v1137_v4  ;;  %v487_v4 = vld [vmem:[%s1841_s8 + $0x540] sm:$0xff]  ;;  %v1303_v56 = vpack.c.bf16 %v526_v49, %v522_v48  ;;  %v530_v60 = vld [vmem:[%s1841_s8 + $0x698] sm:$0xff] }
  0xb5   : > { %1266 = vmatpush1.bf16.msra.mxu1 %v1265_v5  ;;  %1140 = vmatprep.subr.bf16.mxu0 %v1139_v6  ;;  %v491_v5 = vld [vmem:[%s1841_s8 + $0x560] sm:$0xff]  ;;  %v489_v6 = vld [vmem:[%s1841_s8 + $0x550] sm:$0xff]  ;;  %v534_v61 = vld [vmem:[%s1841_s8 + $0x6b8] sm:$0xff] }
  0xb6   : > { %1268 = vmatprep.subr.bf16.mxu1 %v1267_v10  ;;  %v500_v10 = vld [vmem:[%s1841_s8 + $0x5a8] sm:$0xff]  ;;  %v1161_v13 = vpack.c.bf16 %v491_v5, %v487_v4  ;;  %v1289_v15 = vpack.c.bf16 %v493_v8, %v489_v6  ;;  %v1307_v4 = vpack.c.bf16 %v534_v61, %v530_v60  ;;  %v533_v5 = vld [vmem:[%s1841_s8 + $0x6b0] sm:$0xff]  ;;  %v538_v8 = vld [vmem:[%s1841_s8 + $0x6d8] sm:$0xff] }
  0xb7   : > { %640 = vmatmul.mubr.f32.vlgmr.msra.gmra.mrb[0].mxu0 %v315_v16  ;;  %v536_v6 = vld [vmem:[%s1841_s8 + $0x6c8] sm:$0xff]  ;;  %v550_v21 = vld [vmem:[%s1841_s8 + $0x738] sm:$0xff]  ;;  %v551_v37 = vld [vmem:[%s1841_s8 + $0x740] sm:$0xff] }
  0xb8   : > { %1142 = vmatpush1.bf16.msra.mxu0 %v1141_v17  ;;  %782 = vmatmul.mubr.f32.vlgmr.msra.gmra.mrb[0].mxu1 %v315_v16  ;;  %v1163_v16 = vpack.c.bf16 %v500_v10, %v496_v9  ;;  %v499_v17 = vld [vmem:[%s1841_s8 + $0x5a0] sm:$0xff]  ;;  %v542_v9 = vld [vmem:[%s1841_s8 + $0x6f8] sm:$0xff] }
  0xb9   : > { %1270 = vmatpush1.bf16.msra.mxu1 %v1269_v18  ;;  %1144 = vmatprep.subr.bf16.mxu0 %v1143_v19  ;;  %v497_v18 = vld [vmem:[%s1841_s8 + $0x590] sm:$0xff]  ;;  %v1165_v26 = vpack.c.bf16 %v499_v17, %v495_v14  ;;  %v539_v14 = vld [vmem:[%s1841_s8 + $0x6e0] sm:$0xff] }
  0xba   : > { %1272 = vmatprep.subr.bf16.mxu1 %v1271_v23  ;;  %v501_v19 = vld [vmem:[%s1841_s8 + $0x5b0] sm:$0xff]  ;;  %v318_v23 = vld [vmem:[%s1860_s26 + $0x18] sm:$0xff]  ;;  %v559_v49 = vld [vmem:[%s1841_s8 + $0x780] sm:$0xff] }
  0xbb   : > { %710 = vmatprep.mubr.f32.mxu0 %v318_v23  ;;  %852 = vmatprep.mubr.f32.mxu1 %v318_v23  ;;  %v1293_v27 = vpack.c.bf16 %v501_v19, %v497_v18  ;;  %v541_v17 = vld [vmem:[%s1841_s8 + $0x6f0] sm:$0xff]  ;;  %v544_v18 = vld [vmem:[%s1841_s8 + $0x708] sm:$0xff]  ;;  %v567_v61 = vld [vmem:[%s1841_s8 + $0x7c0] sm:$0xff] }
  0xbc   : > { %1146 = vmatpush1.bf16.msra.mxu0 %v1145_v29  ;;  %v503_v29 = vld [vmem:[%s1841_s8 + $0x5c0] sm:$0xff]  ;;  %v548_v19 = vld [vmem:[%s1841_s8 + $0x728] sm:$0xff] }
  0xbd   : > { %1274 = vmatpush1.bf16.msra.mxu1 %v1273_v30  ;;  %1148 = vmatprep.subr.bf16.mxu0 %v1147_v31  ;;  %v507_v30 = vld [vmem:[%s1841_s8 + $0x5e0] sm:$0xff]  ;;  %v505_v31 = vld [vmem:[%s1841_s8 + $0x5d0] sm:$0xff]  ;;  %v1187_v24 = vpack.c.bf16 %v548_v19, %v544_v18 }
  0xbe   : > { %1276 = vmatprep.subr.bf16.mxu1 %v1275_v35  ;;  %v516_v35 = vld [vmem:[%s1841_s8 + $0x628] sm:$0xff]  ;;  %v1169_v38 = vpack.c.bf16 %v507_v30, %v503_v29  ;;  %v1297_v39 = vpack.c.bf16 %v509_v33, %v505_v31  ;;  %v549_v29 = vld [vmem:[%s1841_s8 + $0x730] sm:$0xff]  ;;  %v558_v33 = vld [vmem:[%s1841_s8 + $0x778] sm:$0xff] }
  0xbf   : > { %v1171_v40 = vpack.c.bf16 %v516_v35, %v512_v34  ;;  %v552_v30 = vld [vmem:[%s1841_s8 + $0x748] sm:$0xff]  ;;  %v875_v19 = vld [vmem:[%s239_s10] sm:$0xf] (!%p1071_p3) }
  0xc0   : > { %1150 = vmatpush1.bf16.msra.mxu0 %v1149_v41  ;;  %v511_v41 = vld [vmem:[%s1841_s8 + $0x600] sm:$0xff]  ;;  %v556_v31 = vld [vmem:[%s1841_s8 + $0x768] sm:$0xff] }
  0xc1   : > { %1278 = vmatpush1.bf16.msra.mxu1 %v1277_v42  ;;  %1152 = vmatprep.subr.bf16.mxu0 %v1151_v43  ;;  %v515_v42 = vld [vmem:[%s1841_s8 + $0x620] sm:$0xff]  ;;  %v513_v43 = vld [vmem:[%s1841_s8 + $0x610] sm:$0xff]  ;;  %v1191_v36 = vpack.c.bf16 %v556_v31, %v552_v30 }
  0xc2   : > { %1280 = vmatprep.subr.bf16.mxu1 %v1279_v47  ;;  %v524_v47 = vld [vmem:[%s1841_s8 + $0x668] sm:$0xff]  ;;  %v1173_v50 = vpack.c.bf16 %v515_v42, %v511_v41  ;;  %v1301_v51 = vpack.c.bf16 %v517_v45, %v513_v43  ;;  %v557_v41 = vld [vmem:[%s1841_s8 + $0x770] sm:$0xff]  ;;  %v566_v45 = vld [vmem:[%s1841_s8 + $0x7b8] sm:$0xff] }
  0xc3   : > { %v1175_v52 = vpack.c.bf16 %v524_v47, %v520_v46  ;;  %v560_v42 = vld [vmem:[%s1841_s8 + $0x788] sm:$0xff] }
  0xc4   : > { %1154 = vmatpush1.bf16.msra.mxu0 %v1153_v53  ;;  %v519_v53 = vld [vmem:[%s1841_s8 + $0x640] sm:$0xff]  ;;  %v564_v43 = vld [vmem:[%s1841_s8 + $0x7a8] sm:$0xff] }
  0xc5   : > { %1282 = vmatpush1.bf16.msra.mxu1 %v1281_v54  ;;  %1156 = vmatprep.subr.bf16.mxu0 %v1155_v55  ;;  %v523_v54 = vld [vmem:[%s1841_s8 + $0x660] sm:$0xff]  ;;  %v521_v55 = vld [vmem:[%s1841_s8 + $0x650] sm:$0xff]  ;;  %v1195_v48 = vpack.c.bf16 %v564_v43, %v560_v42 }
  0xc6   : > { %1284 = vmatprep.subr.bf16.mxu1 %v1283_v59  ;;  %v532_v59 = vld [vmem:[%s1841_s8 + $0x6a8] sm:$0xff]  ;;  %v1177_v62 = vpack.c.bf16 %v523_v54, %v519_v53  ;;  %v1305_v63 = vpack.c.bf16 %v525_v57, %v521_v55  ;;  %v565_v53 = vld [vmem:[%s1841_s8 + $0x7b0] sm:$0xff]  ;;  %v574_v57 = vld [vmem:[%s1841_s8 + $0x7f8] sm:$0xff] }
  0xc7   : > { %v1179_v0 = vpack.c.bf16 %v532_v59, %v528_v58  ;;  %v568_v54 = vld [vmem:[%s1841_s8 + $0x7c8] sm:$0xff] }
  0xc8   : > { %1158 = vmatpush1.bf16.msra.mxu0 %v1157_v1  ;;  %v527_v1 = vld [vmem:[%s1841_s8 + $0x680] sm:$0xff]  ;;  %v572_v55 = vld [vmem:[%s1841_s8 + $0x7e8] sm:$0xff] }
  0xc9   : > { %1286 = vmatpush1.bf16.msra.mxu1 %v1285_v2  ;;  %1160 = vmatprep.subr.bf16.mxu0 %v1159_v3  ;;  %v531_v2 = vld [vmem:[%s1841_s8 + $0x6a0] sm:$0xff]  ;;  %v529_v3 = vld [vmem:[%s1841_s8 + $0x690] sm:$0xff]  ;;  %v1199_v60 = vpack.c.bf16 %v572_v55, %v568_v54 }
  0xca   : > { %1288 = vmatprep.subr.bf16.mxu1 %v1287_v7  ;;  %v540_v7 = vld [vmem:[%s1841_s8 + $0x6e8] sm:$0xff]  ;;  %v1181_v10 = vpack.c.bf16 %v531_v2, %v527_v1  ;;  %v1309_v11 = vpack.c.bf16 %v533_v5, %v529_v3  ;;  %v573_v1 = vld [vmem:[%s1841_s8 + $0x7f0] sm:$0xff]  ;;  %v311_v5 = vld [vmem:[#allocation2] sm:$0xff] }
  0xcb   : > { %v1183_v12 = vpack.c.bf16 %v540_v7, %v536_v6  ;;  %v313_v6 = vld [vmem:[#allocation2 + $0x10] sm:$0xff]  ;;  %v312_v7 = vld [vmem:[#allocation2 + $0x8] sm:$0xff] }
  0xcc   : > { %1162 = vmatpush1.bf16.msra.mxu0 %v1161_v13  ;;  %v535_v13 = vld [vmem:[%s1841_s8 + $0x6c0] sm:$0xff] }
  0xcd   : > { %1290 = vmatpush1.bf16.msra.mxu1 %v1289_v15  ;;  %1164 = vmatprep.subr.bf16.mxu0 %v1163_v16  ;;  %v537_v15 = vld [vmem:[%s1841_s8 + $0x6d0] sm:$0xff]  ;;  %v1311_v16 = vpack.c.bf16 %v542_v9, %v538_v8  ;;  %v1185_v22 = vpack.c.bf16 %v539_v14, %v535_v13  ;;  %v314_v9 = vld [vmem:[#allocation2 + $0x18] sm:$0xff] }
  0xce   : > { %1292 = vmatprep.subr.bf16.mxu1 %v1291_v20  ;;  %v546_v20 = vld [vmem:[%s1841_s8 + $0x718] sm:$0xff]  ;;  %v1313_v23 = vpack.c.bf16 %v541_v17, %v537_v15  ;;  %v877_v17 = vlaneseq (!%p1071_p3) }
  0xd0   : > { %1166 = vmatpush1.bf16.msra.mxu0 %v1165_v26  ;;  %v547_v26 = vld [vmem:[%s1841_s8 + $0x720] sm:$0xff]  ;;  %v878_v18 = vshrl.u32 (!%p1071_p3), %v877_v17, 7 }
  0xd1   : > { %1294 = vmatpush1.bf16.msra.mxu1 %v1293_v27  ;;  %1168 = vmatprep.subr.bf16.mxu0 %v1167_v28  ;;  %v545_v27 = vld [vmem:[%s1841_s8 + $0x710] sm:$0xff]  ;;  %v1315_v28 = vpack.c.bf16 %v550_v21, %v546_v20  ;;  %v1189_v34 = vpack.c.bf16 %v547_v26, %v543_v25 }
  0xd2   : > { %1296 = vmatprep.subr.bf16.mxu1 %v1295_v32  ;;  %v554_v32 = vld [vmem:[%s1841_s8 + $0x758] sm:$0xff]  ;;  %v1317_v35 = vpack.c.bf16 %v549_v29, %v545_v27  ;;  %v879_v21 = vsub.s32 (!%p1071_p3), 0, %v878_v18 }
  0xd4   : > { %1170 = vmatpush1.bf16.msra.mxu0 %v1169_v38  ;;  %v555_v38 = vld [vmem:[%s1841_s8 + $0x760] sm:$0xff] }
  0xd5   : > { %1298 = vmatpush1.bf16.msra.mxu1 %v1297_v39  ;;  %1172 = vmatprep.subr.bf16.mxu0 %v1171_v40  ;;  %v553_v39 = vld [vmem:[%s1841_s8 + $0x750] sm:$0xff]  ;;  %v1319_v40 = vpack.c.bf16 %v558_v33, %v554_v32  ;;  %v1193_v46 = vpack.c.bf16 %v555_v38, %v551_v37 }
  0xd6   : > { %1300 = vmatprep.subr.bf16.mxu1 %v1299_v44  ;;  %v562_v44 = vld [vmem:[%s1841_s8 + $0x798] sm:$0xff]  ;;  %v1321_v47 = vpack.c.bf16 %v557_v41, %v553_v39 }
  0xd8   : > { %1174 = vmatpush1.bf16.msra.mxu0 %v1173_v50  ;;  %v563_v50 = vld [vmem:[%s1841_s8 + $0x7a0] sm:$0xff] }
  0xd9   : > { %1302 = vmatpush1.bf16.msra.mxu1 %v1301_v51  ;;  %1176 = vmatprep.subr.bf16.mxu0 %v1175_v52  ;;  %v561_v51 = vld [vmem:[%s1841_s8 + $0x790] sm:$0xff]  ;;  %v1323_v52 = vpack.c.bf16 %v566_v45, %v562_v44  ;;  %v1197_v58 = vpack.c.bf16 %v563_v50, %v559_v49 }
  0xda   : > { %1304 = vmatprep.subr.bf16.mxu1 %v1303_v56  ;;  %v570_v56 = vld [vmem:[%s1841_s8 + $0x7d8] sm:$0xff]  ;;  %v1325_v59 = vpack.c.bf16 %v565_v53, %v561_v51 }
  0xdc   : > { %1178 = vmatpush1.bf16.msra.mxu0 %v1177_v62  ;;  %v571_v62 = vld [vmem:[%s1841_s8 + $0x7e0] sm:$0xff] }
  0xdd   : > { %1306 = vmatpush1.bf16.msra.mxu1 %v1305_v63  ;;  %1180 = vmatprep.subr.bf16.mxu0 %v1179_v0  ;;  %v1327_v63 = vpack.c.bf16 %v574_v57, %v570_v56  ;;  %v569_v0 = vld [vmem:[%s1841_s8 + $0x7d0] sm:$0xff]  ;;  %v1201_v2 = vpack.c.bf16 %v571_v62, %v567_v61 }
  0xde   : > { %1308 = vmatprep.subr.bf16.mxu1 %v1307_v4  ;;  %v1329_v3 = vpack.c.bf16 %v573_v1, %v569_v0  ;;  %v317_v4 = vld [vmem:[%s1860_s26 + $0x10] sm:$0xff] }
  0xe0   : > { %1182 = vmatpush1.bf16.msra.mxu0 %v1181_v10 }
  0xe1   : > { %1310 = vmatpush1.bf16.msra.mxu1 %v1309_v11  ;;  %1184 = vmatprep.subr.bf16.mxu0 %v1183_v12 }
  0xe2   : > { %1312 = vmatprep.subr.bf16.mxu1 %v1311_v16 }
  0xe4   : > { %1186 = vmatpush1.bf16.msra.mxu0 %v1185_v22  ;;  %v883_v22 = vsub.s32 (!%p1071_p3), 1, %v878_v18 }
  0xe5   : > { %1314 = vmatpush1.bf16.msra.mxu1 %v1313_v23  ;;  %1188 = vmatprep.subr.bf16.mxu0 %v1187_v24  ;;  %v887_v23 = vsub.s32 (!%p1071_p3), 2, %v878_v18  ;;  %v891_v24 = vsub.s32 (!%p1071_p3), 3, %v878_v18 }
  0xe6   : > { %1316 = vmatprep.subr.bf16.mxu1 %v1315_v28  ;;  %v880_v28 = vrot.slane (!%p1071_p3), %v875_v19, %v879_v21  ;;  %v884_v29 = vrot.slane (!%p1071_p3), %v875_v19, %v883_v22 }
  0xe7   : > { %v888_v30 = vrot.slane (!%p1071_p3), %v875_v19, %v887_v23  ;;  %v892_v31 = vrot.slane (!%p1071_p3), %v875_v19, %v891_v24 }
  0xe8   : > { %1190 = vmatpush1.bf16.msra.mxu0 %v1189_v34 }
  0xe9   : > { %1318 = vmatpush1.bf16.msra.mxu1 %v1317_v35  ;;  %1192 = vmatprep.subr.bf16.mxu0 %v1191_v36 }
  0xea   : > { %1320 = vmatprep.subr.bf16.mxu1 %v1319_v40 }
  0xec   : > { %1194 = vmatpush1.bf16.msra.mxu0 %v1193_v46 }
  0xed   : > { %1322 = vmatpush1.bf16.msra.mxu1 %v1321_v47  ;;  %1196 = vmatprep.subr.bf16.mxu0 %v1195_v48 }
  0xee   : > { %1324 = vmatprep.subr.bf16.mxu1 %v1323_v52 }
  0xf0   : > { %1198 = vmatpush1.bf16.msra.mxu0 %v1197_v58 }
  0xf1   : > { %1326 = vmatpush1.bf16.msra.mxu1 %v1325_v59  ;;  %1200 = vmatprep.subr.bf16.mxu0 %v1199_v60 }
  0xf2   : > { %1328 = vmatprep.subr.bf16.mxu1 %v1327_v63 }
  0xf4   : > { %1202 = vmatpush1.bf16.msra.mxu0 %v1201_v2 }
  0xf5   : > { %1330 = vmatpush1.bf16.msra.mxu1 %v1329_v3 }
  0xf7   : > { %711 = vmatmul.mubr.f32.vlgmr.msra.gmra.mrb[0].mxu0 %v317_v4 }
  0xf8   : > { %853 = vmatmul.mubr.f32.vlgmr.msra.gmra.mrb[0].mxu1 %v317_v4 }
 0x1c9   : > { %870 = sbr.rel (%p1071_p3) target bundleno = 476 (0x1dc), region = 48 }
 0x1ca   : > { %v712_v8 = vpop.f32.mrb[0].mxu0 }
 0x1cb   : > { %v859_v10 = vadd.f32 %v712_v8, %v311_v5  ;;  %v854_v11 = vpop.f32.mrb[0].mxu1  ;;  %v714_v12 = vpop.f32.mrb[1].mxu0 }
 0x1cc   : > { %v861_v13 = vadd.f32 %v854_v11, %v313_v6  ;;  %v860_v14 = vadd.f32 %v714_v12, %v312_v7  ;;  %v856_v15 = vpop.f32.mrb[1].mxu1 }
 0x1cd   : > { %863 = vst [vmem:[#allocation2] sm:$0xff] %v859_v10  ;;  %v862_v16 = vadd.f32 %v856_v15, %v314_v9 }
 0x1ce   : > { %865 = vst [vmem:[#allocation2 + $0x10] sm:$0xff] %v861_v13  ;;  %864 = vst [vmem:[#allocation2 + $0x8] sm:$0xff] %v860_v14 }
 0x1cf   : > { %866 = vst [vmem:[#allocation2 + $0x18] sm:$0xff] %v862_v16 }
 0x1d4   : > { %v871_v20 = vld [vmem:[#allocation2] sm:$0xff] }
 0x1d5   : > { %v872_v25 = vld [vmem:[#allocation2 + $0x8] sm:$0xff]  ;;  %v873_v26 = vld [vmem:[#allocation2 + $0x10] sm:$0xff]  ;;  %v897_v32 = vadd.f32 %v880_v28, %v871_v20 }
 0x1d6   : > { %v874_v27 = vld [vmem:[#allocation2 + $0x18] sm:$0xff]  ;;  %v898_v33 = vadd.f32 %v884_v29, %v872_v25  ;;  %v899_v34 = vadd.f32 %v888_v30, %v873_v26 }
 0x1d7   : > { %v900_v35 = vadd.f32 %v892_v31, %v874_v27  ;;  %v901_v36 = vmax.f32 %v897_v32, 0.0 }
 0x1d8   : > { %v902_v37 = vmax.f32 %v898_v33, 0.0  ;;  %v903_v38 = vmax.f32 %v899_v34, 0.0 }
 0x1d9   : > { %v904_v39 = vmax.f32 %v900_v35, 0.0  ;;  %905 = vst [vmem:[%s1865_s30] sm:$0xff] %v901_v36 }
 0x1da   : > { %906 = vst [vmem:[%s1865_s30 + $0x8] sm:$0xff] %v902_v37  ;;  %907 = vst [vmem:[%s1865_s30 + $0x10] sm:$0xff] %v903_v38 }
 0x1db   : > { %908 = vst [vmem:[%s1865_s30 + $0x18] sm:$0xff] %v904_v39 }
 0x1dc PF: > { %s19_s22 = sadd.s32 1, %s1594_s22   ;;  %s2193_s8 = sld [smem:[#allocation9_spill]] }
 0x1dd   : > { %p16_p11 = scmp.ge.s32.totalorder %s19_s22, 192   ;;  %s2194_s12 = smov %s1558_s13 }
 0x1de   : > { %s2195_s13 = smov %s1562_s14  ;;  %s2196_s14 = smov %s1790_s4 }
 0x1df   : > { %s2197_s15 = smov %s1570_s16  ;;  %s2198_s16 = smov %s1574_s17 }
 0x1e0   : > { %s2199_s17 = smov %s1795_s7  ;;  %s2200_s18 = smov %s1586_s20 }
 0x1e1   : > { %s2201_s19 = smov %s1590_s21  ;;  %s2202_s20 = smov %s2205_s23 }
 0x1e2   : > { %s2203_s21 = smov %s2193_s8  ;;  %18 = sbr.rel (!%p16_p11) target bundleno = 11 (0xb), region = 96 }
 0x1e9   :  { %939 = vsyncpa [#allocation4], 1 }
 0x1ea   :  { %941 = vsyncpa [#allocation4 + $0x1], 1 }
 0x1eb   :  { %942 = vsyncpa [#allocation6], 1 }
 0x1ec   :  { %944 = vsyncpa [#allocation6 + $0x1], 1 }

// kernel: nural_netwoek_1hl2gt_forward.5
= control target key start
LH: loop header
LB: loop body
LE: loop exit
PB: predicated region body
PF: predicated region fallthrough
CT: control target
= control target key end

     0   :  { %vm1061_vm0 = vcmask 23552   ;;  %s2803_s1 = inlined_call_operand.vmem [shape: f32[2560,3], index: 1, kind: input, shape index: {}]   ;;  %s2804_s0 = inlined_call_operand.vmem [shape: f32[8,2560], index: 0, kind: input, shape index: {}]   ;;  %s2805_s2 = inlined_call_operand.vmem [shape: f32[1,3], index: 2, kind: input, shape index: {}]   ;;  %s2806_s3 = inlined_call_operand.vmem [shape: f32[8,3], index: 3, kind: output, shape index: {}]  }
   0x1   :  { %v50_v0 = vld [vmem:[%s2803_s1 + $0x80] sm:$0xff]  ;;  %v51_v1 = vld [vmem:[%s2803_s1 + $0x88] sm:$0xff]  ;;  %v52_v11 = vld [vmem:[%s2803_s1 + $0x90] sm:$0xff] }
   0x2   :  { %v34_v2 = vld [vmem:[%s2803_s1] sm:$0xff]  ;;  %v1430_v3 = vpack.c.bf16 %v51_v1, %v50_v0  ;;  %v35_v4 = vld [vmem:[%s2803_s1 + $0x8] sm:$0xff]  ;;  %v53_v13 = vld [vmem:[%s2803_s1 + $0x98] sm:$0xff] }
   0x3   :  { %v82_v5 = vld [vmem:[%s2803_s1 + $0x180] sm:$0xff]  ;;  %v83_v6 = vld [vmem:[%s2803_s1 + $0x188] sm:$0xff]  ;;  %v1432_v7 = vpack.c.bf16 %v35_v4, %v34_v2  ;;  %v36_v14 = vld [vmem:[%s2803_s1 + $0x10] sm:$0xff]  ;;  %v1434_v16 = vpack.c.bf16 %v53_v13, %v52_v11 }
   0x4   :  { %v1462_v8 = vpack.c.bf16 %v83_v6, %v82_v5  ;;  %v66_v9 = vld [vmem:[%s2803_s1 + $0x100] sm:$0xff]  ;;  %v67_v10 = vld [vmem:[%s2803_s1 + $0x108] sm:$0xff]  ;;  %1431 = vmatprep.subr.bf16.mxu0 %v1430_v3  ;;  %v37_v15 = vld [vmem:[%s2803_s1 + $0x18] sm:$0xff] }
   0x5   :  { %v1464_v12 = vpack.c.bf16 %v67_v10, %v66_v9  ;;  %1433 = vmatpush3.bf16.msra.mxu0 %v1432_v7  ;;  %v1436_v17 = vpack.c.bf16 %v37_v15, %v36_v14  ;;  %v84_v18 = vld [vmem:[%s2803_s1 + $0x190] sm:$0xff]  ;;  %v85_v19 = vld [vmem:[%s2803_s1 + $0x198] sm:$0xff]  ;;  %v54_v23 = vld [vmem:[%s2803_s1 + $0xa0] sm:$0xff] }
   0x6   :  { %1463 = vmatprep.subr.bf16.mxu1 %v1462_v8  ;;  %v68_v20 = vld [vmem:[%s2803_s1 + $0x110] sm:$0xff]  ;;  %v1466_v21 = vpack.c.bf16 %v85_v19, %v84_v18  ;;  %v69_v22 = vld [vmem:[%s2803_s1 + $0x118] sm:$0xff]  ;;  %v55_v24 = vld [vmem:[%s2803_s1 + $0xa8] sm:$0xff]  ;;  %1435 = vmatprep.subr.bf16.mxu0 %v1434_v16 }
   0x7   :  { %1465 = vmatpush3.bf16.msra.mxu1 %v1464_v12  ;;  %v1468_v25 = vpack.c.bf16 %v69_v22, %v68_v20  ;;  %v1438_v26 = vpack.c.bf16 %v55_v24, %v54_v23  ;;  %v38_v27 = vld [vmem:[%s2803_s1 + $0x20] sm:$0xff]  ;;  %v39_v28 = vld [vmem:[%s2803_s1 + $0x28] sm:$0xff]  ;;  %v56_v35 = vld [vmem:[%s2803_s1 + $0xb0] sm:$0xff] }
   0x8   :  { %v86_v29 = vld [vmem:[%s2803_s1 + $0x1a0] sm:$0xff]  ;;  %1467 = vmatprep.subr.bf16.mxu1 %v1466_v21  ;;  %v87_v30 = vld [vmem:[%s2803_s1 + $0x1a8] sm:$0xff]  ;;  %v1440_v33 = vpack.c.bf16 %v39_v28, %v38_v27  ;;  %v57_v36 = vld [vmem:[%s2803_s1 + $0xb8] sm:$0xff] }
   0x9   :  { %v70_v31 = vld [vmem:[%s2803_s1 + $0x120] sm:$0xff]  ;;  %v71_v32 = vld [vmem:[%s2803_s1 + $0x128] sm:$0xff]  ;;  %1437 = vmatpush3.bf16.msra.mxu0 %v1436_v17  ;;  %v1470_v34 = vpack.c.bf16 %v87_v30, %v86_v29  ;;  %v40_v37 = vld [vmem:[%s2803_s1 + $0x30] sm:$0xff]  ;;  %v1442_v39 = vpack.c.bf16 %v57_v36, %v56_v35 }
   0xa   :  { %1439 = vmatprep.subr.bf16.mxu0 %v1438_v26  ;;  %v1472_v38 = vpack.c.bf16 %v71_v32, %v70_v31  ;;  %v41_v40 = vld [vmem:[%s2803_s1 + $0x38] sm:$0xff]  ;;  %v88_v41 = vld [vmem:[%s2803_s1 + $0x1b0] sm:$0xff]  ;;  %v58_v46 = vld [vmem:[%s2803_s1 + $0xc0] sm:$0xff] }
   0xb   :  { %1469 = vmatpush3.bf16.msra.mxu1 %v1468_v25  ;;  %v89_v42 = vld [vmem:[%s2803_s1 + $0x1b8] sm:$0xff]  ;;  %v72_v44 = vld [vmem:[%s2803_s1 + $0x130] sm:$0xff]  ;;  %v59_v47 = vld [vmem:[%s2803_s1 + $0xc8] sm:$0xff]  ;;  %v1444_v48 = vpack.c.bf16 %v41_v40, %v40_v37 }
   0xc   :  { %1471 = vmatprep.subr.bf16.mxu1 %v1470_v34  ;;  %v1474_v43 = vpack.c.bf16 %v89_v42, %v88_v41  ;;  %v73_v45 = vld [vmem:[%s2803_s1 + $0x138] sm:$0xff]  ;;  %v90_v49 = vld [vmem:[%s2803_s1 + $0x1c0] sm:$0xff]  ;;  %v91_v50 = vld [vmem:[%s2803_s1 + $0x1c8] sm:$0xff]  ;;  %v1446_v52 = vpack.c.bf16 %v59_v47, %v58_v46 }
   0xd   :  { %1441 = vmatpush3.bf16.msra.mxu0 %v1440_v33  ;;  %v1476_v51 = vpack.c.bf16 %v73_v45, %v72_v44  ;;  %v42_v53 = vld [vmem:[%s2803_s1 + $0x40] sm:$0xff]  ;;  %v43_v54 = vld [vmem:[%s2803_s1 + $0x48] sm:$0xff]  ;;  %v1478_v56 = vpack.c.bf16 %v91_v50, %v90_v49  ;;  %v60_v58 = vld [vmem:[%s2803_s1 + $0xd0] sm:$0xff] }
   0xe   :  { %1443 = vmatprep.subr.bf16.mxu0 %v1442_v39  ;;  %v74_v55 = vld [vmem:[%s2803_s1 + $0x140] sm:$0xff]  ;;  %v75_v57 = vld [vmem:[%s2803_s1 + $0x148] sm:$0xff]  ;;  %v61_v59 = vld [vmem:[%s2803_s1 + $0xd8] sm:$0xff]  ;;  %v1448_v62 = vpack.c.bf16 %v43_v54, %v42_v53 }
   0xf   :  { %1473 = vmatpush3.bf16.msra.mxu1 %v1472_v38  ;;  %v92_v60 = vld [vmem:[%s2803_s1 + $0x1d0] sm:$0xff]  ;;  %v93_v61 = vld [vmem:[%s2803_s1 + $0x1d8] sm:$0xff]  ;;  %v1480_v63 = vpack.c.bf16 %v75_v57, %v74_v55  ;;  %v1450_v0 = vpack.c.bf16 %v61_v59, %v60_v58  ;;  %v62_v6 = vld [vmem:[%s2803_s1 + $0xe0] sm:$0xff] }
  0x10   :  { %1475 = vmatprep.subr.bf16.mxu1 %v1474_v43  ;;  %v44_v1 = vld [vmem:[%s2803_s1 + $0x50] sm:$0xff]  ;;  %v45_v2 = vld [vmem:[%s2803_s1 + $0x58] sm:$0xff]  ;;  %v1482_v4 = vpack.c.bf16 %v93_v61, %v92_v60  ;;  %v63_v7 = vld [vmem:[%s2803_s1 + $0xe8] sm:$0xff] }
  0x11   :  { %1445 = vmatpush3.bf16.msra.mxu0 %v1444_v48  ;;  %v76_v3 = vld [vmem:[%s2803_s1 + $0x150] sm:$0xff]  ;;  %v77_v5 = vld [vmem:[%s2803_s1 + $0x158] sm:$0xff]  ;;  %v94_v8 = vld [vmem:[%s2803_s1 + $0x1e0] sm:$0xff]  ;;  %v1452_v10 = vpack.c.bf16 %v45_v2, %v44_v1  ;;  %v1454_v14 = vpack.c.bf16 %v63_v7, %v62_v6 }
  0x12   :  { %1447 = vmatprep.subr.bf16.mxu0 %v1446_v52  ;;  %v95_v9 = vld [vmem:[%s2803_s1 + $0x1e8] sm:$0xff]  ;;  %v46_v11 = vld [vmem:[%s2803_s1 + $0x60] sm:$0xff]  ;;  %v1484_v13 = vpack.c.bf16 %v77_v5, %v76_v3  ;;  %v64_v19 = vld [vmem:[%s2803_s1 + $0xf0] sm:$0xff] }
  0x13   :  { %1477 = vmatpush3.bf16.msra.mxu1 %v1476_v51  ;;  %v47_v12 = vld [vmem:[%s2803_s1 + $0x68] sm:$0xff]  ;;  %v78_v15 = vld [vmem:[%s2803_s1 + $0x160] sm:$0xff]  ;;  %v1486_v18 = vpack.c.bf16 %v95_v9, %v94_v8  ;;  %v65_v20 = vld [vmem:[%s2803_s1 + $0xf8] sm:$0xff] }
  0x14   :  { %1479 = vmatprep.subr.bf16.mxu1 %v1478_v56  ;;  %v79_v16 = vld [vmem:[%s2803_s1 + $0x168] sm:$0xff]  ;;  %v17_v21 = vld [vmem:[%s2804_s0 + $0x18] sm:$0xff]  ;;  %v96_v22 = vld [vmem:[%s2803_s1 + $0x1f0] sm:$0xff]  ;;  %v1456_v24 = vpack.c.bf16 %v47_v12, %v46_v11  ;;  %v1458_v26 = vpack.c.bf16 %v65_v20, %v64_v19 }
  0x15   :  { %1449 = vmatpush3.bf16.msra.mxu0 %v1448_v62  ;;  %v15_v17 = vld [vmem:[%s2804_s0 + $0x8] sm:$0xff]  ;;  %v97_v23 = vld [vmem:[%s2803_s1 + $0x1f8] sm:$0xff]  ;;  %495 = vmatprep.mubr.f32.mxu1 %v17_v21  ;;  %v1488_v25 = vpack.c.bf16 %v79_v16, %v78_v15  ;;  %v48_v27 = vld [vmem:[%s2803_s1 + $0x70] sm:$0xff] }
  0x16   :  { %1451 = vmatprep.subr.bf16.mxu0 %v1450_v0  ;;  %425 = vmatprep.mubr.f32.mxu0 %v15_v17  ;;  %v49_v28 = vld [vmem:[%s2803_s1 + $0x78] sm:$0xff]  ;;  %v80_v29 = vld [vmem:[%s2803_s1 + $0x170] sm:$0xff]  ;;  %v1490_v30 = vpack.c.bf16 %v97_v23, %v96_v22  ;;  %v114_v32 = vld [vmem:[%s2803_s1 + $0x280] sm:$0xff] }
  0x17   :  { %1481 = vmatpush3.bf16.msra.mxu1 %v1480_v63  ;;  %v81_v31 = vld [vmem:[%s2803_s1 + $0x178] sm:$0xff]  ;;  %v115_v33 = vld [vmem:[%s2803_s1 + $0x288] sm:$0xff]  ;;  %v146_v34 = vld [vmem:[%s2803_s1 + $0x380] sm:$0xff]  ;;  %v1460_v36 = vpack.c.bf16 %v49_v28, %v48_v27 }
  0x18   :  { %1483 = vmatprep.subr.bf16.mxu1 %v1482_v4  ;;  %v147_v35 = vld [vmem:[%s2803_s1 + $0x388] sm:$0xff]  ;;  %v1492_v37 = vpack.c.bf16 %v81_v31, %v80_v29  ;;  %v1494_v38 = vpack.c.bf16 %v115_v33, %v114_v32  ;;  %v98_v39 = vld [vmem:[%s2803_s1 + $0x200] sm:$0xff]  ;;  %v116_v44 = vld [vmem:[%s2803_s1 + $0x290] sm:$0xff] }
  0x19   :  { %1453 = vmatpush3.bf16.msra.mxu0 %v1452_v10  ;;  %v99_v40 = vld [vmem:[%s2803_s1 + $0x208] sm:$0xff]  ;;  %v130_v41 = vld [vmem:[%s2803_s1 + $0x300] sm:$0xff]  ;;  %v1526_v42 = vpack.c.bf16 %v147_v35, %v146_v34  ;;  %v117_v45 = vld [vmem:[%s2803_s1 + $0x298] sm:$0xff] }
  0x1a   :  { %1455 = vmatprep.subr.bf16.mxu0 %v1454_v14  ;;  %v131_v43 = vld [vmem:[%s2803_s1 + $0x308] sm:$0xff]  ;;  %v148_v46 = vld [vmem:[%s2803_s1 + $0x390] sm:$0xff]  ;;  %v149_v47 = vld [vmem:[%s2803_s1 + $0x398] sm:$0xff]  ;;  %v1496_v49 = vpack.c.bf16 %v99_v40, %v98_v39  ;;  %v1498_v52 = vpack.c.bf16 %v117_v45, %v116_v44 }
  0x1b   :  { %1485 = vmatpush3.bf16.msra.mxu1 %v1484_v13  ;;  %v14_v48 = vld [vmem:[%s2804_s0] sm:$0xff]  ;;  %v16_v50 = vld [vmem:[%s2804_s0 + $0x10] sm:$0xff]  ;;  %v1528_v51 = vpack.c.bf16 %v131_v43, %v130_v41  ;;  %v101_v54 = vld [vmem:[%s2803_s1 + $0x218] sm:$0xff]  ;;  %v1530_v56 = vpack.c.bf16 %v149_v47, %v148_v46 }
  0x1c   :  { %1487 = vmatprep.subr.bf16.mxu1 %v1486_v18  ;;  %v100_v53 = vld [vmem:[%s2803_s1 + $0x210] sm:$0xff]  ;;  %v133_v57 = vld [vmem:[%s2803_s1 + $0x318] sm:$0xff]  ;;  %v118_v58 = vld [vmem:[%s2803_s1 + $0x2a0] sm:$0xff] }
  0x1d   :  { %1457 = vmatpush3.bf16.msra.mxu0 %v1456_v24  ;;  %v132_v55 = vld [vmem:[%s2803_s1 + $0x310] sm:$0xff]  ;;  %v119_v59 = vld [vmem:[%s2803_s1 + $0x2a8] sm:$0xff]  ;;  %v150_v60 = vld [vmem:[%s2803_s1 + $0x3a0] sm:$0xff]  ;;  %v1500_v62 = vpack.c.bf16 %v101_v54, %v100_v53 }
  0x1e   :  { %1459 = vmatprep.subr.bf16.mxu0 %v1458_v26  ;;  %v151_v61 = vld [vmem:[%s2803_s1 + $0x3a8] sm:$0xff]  ;;  %v1532_v63 = vpack.c.bf16 %v133_v57, %v132_v55  ;;  %v1502_v0 = vpack.c.bf16 %v119_v59, %v118_v58  ;;  %v102_v1 = vld [vmem:[%s2803_s1 + $0x220] sm:$0xff]  ;;  %v120_v6 = vld [vmem:[%s2803_s1 + $0x2b0] sm:$0xff] }
  0x1f   :  { %1489 = vmatpush3.bf16.msra.mxu1 %v1488_v25  ;;  %v103_v2 = vld [vmem:[%s2803_s1 + $0x228] sm:$0xff]  ;;  %v134_v3 = vld [vmem:[%s2803_s1 + $0x320] sm:$0xff]  ;;  %v1534_v4 = vpack.c.bf16 %v151_v61, %v150_v60  ;;  %v121_v7 = vld [vmem:[%s2803_s1 + $0x2b8] sm:$0xff] }
  0x20   :  { %1491 = vmatprep.subr.bf16.mxu1 %v1490_v30  ;;  %v135_v5 = vld [vmem:[%s2803_s1 + $0x328] sm:$0xff]  ;;  %v152_v8 = vld [vmem:[%s2803_s1 + $0x3b0] sm:$0xff]  ;;  %v153_v9 = vld [vmem:[%s2803_s1 + $0x3b8] sm:$0xff]  ;;  %v1504_v10 = vpack.c.bf16 %v103_v2, %v102_v1  ;;  %v1506_v12 = vpack.c.bf16 %v121_v7, %v120_v6 }
  0x21   :  { %1461 = vmatpush3.bf16.msra.mxu0 %v1460_v36  ;;  %v1536_v11 = vpack.c.bf16 %v135_v5, %v134_v3  ;;  %v104_v13 = vld [vmem:[%s2803_s1 + $0x230] sm:$0xff]  ;;  %v105_v14 = vld [vmem:[%s2803_s1 + $0x238] sm:$0xff]  ;;  %v1538_v16 = vpack.c.bf16 %v153_v9, %v152_v8  ;;  %v122_v18 = vld [vmem:[%s2803_s1 + $0x2c0] sm:$0xff] }
  0x22   :  { %1495 = vmatprep.subr.bf16.mxu0 %v1494_v38  ;;  %v136_v15 = vld [vmem:[%s2803_s1 + $0x330] sm:$0xff]  ;;  %v137_v17 = vld [vmem:[%s2803_s1 + $0x338] sm:$0xff]  ;;  %v123_v19 = vld [vmem:[%s2803_s1 + $0x2c8] sm:$0xff]  ;;  %v1508_v22 = vpack.c.bf16 %v105_v14, %v104_v13 }
  0x23   :  { %1493 = vmatpush3.bf16.msra.mxu1 %v1492_v37  ;;  %v154_v20 = vld [vmem:[%s2803_s1 + $0x3c0] sm:$0xff]  ;;  %v155_v21 = vld [vmem:[%s2803_s1 + $0x3c8] sm:$0xff]  ;;  %v1540_v25 = vpack.c.bf16 %v137_v17, %v136_v15  ;;  %v1510_v26 = vpack.c.bf16 %v123_v19, %v122_v18  ;;  %v21_v29 = vld [vmem:[%s2804_s0 + $0x38] sm:$0xff] }
  0x24   :  { %1527 = vmatprep.subr.bf16.mxu1 %v1526_v42  ;;  %426 = vmatmul.mubr.f32.vlgmr.msra.gmra.mrb[0].mxu0 %v14_v48  ;;  %v106_v23 = vld [vmem:[%s2803_s1 + $0x240] sm:$0xff]  ;;  %v19_v24 = vld [vmem:[%s2804_s0 + $0x28] sm:$0xff]  ;;  %v1542_v30 = vpack.c.bf16 %v155_v21, %v154_v20  ;;  %v124_v32 = vld [vmem:[%s2803_s1 + $0x2d0] sm:$0xff] }
  0x25   :  { %1497 = vmatpush3.bf16.msra.mxu0 %v1496_v49  ;;  %v107_v27 = vld [vmem:[%s2803_s1 + $0x248] sm:$0xff]  ;;  %v138_v28 = vld [vmem:[%s2803_s1 + $0x340] sm:$0xff]  ;;  %v125_v33 = vld [vmem:[%s2803_s1 + $0x2d8] sm:$0xff]  ;;  %565 = vmatprep.mubr.f32.mxu0 %v19_v24 }
  0x26   :  { %496 = vmatmul.mubr.f32.vlgmr.msra.gmra.mrb[0].mxu1 %v16_v50  ;;  %1499 = vmatprep.subr.bf16.mxu0 %v1498_v52  ;;  %v139_v31 = vld [vmem:[%s2803_s1 + $0x348] sm:$0xff]  ;;  %v156_v34 = vld [vmem:[%s2803_s1 + $0x3d0] sm:$0xff]  ;;  %v157_v35 = vld [vmem:[%s2803_s1 + $0x3d8] sm:$0xff]  ;;  %v1512_v36 = vpack.c.bf16 %v107_v27, %v106_v23  ;;  %v1514_v38 = vpack.c.bf16 %v125_v33, %v124_v32 }
  0x27   :  { %1529 = vmatpush3.bf16.msra.mxu1 %v1528_v51  ;;  %635 = vmatprep.mubr.f32.mxu1 %v21_v29  ;;  %v1544_v37 = vpack.c.bf16 %v139_v31, %v138_v28  ;;  %v108_v39 = vld [vmem:[%s2803_s1 + $0x250] sm:$0xff]  ;;  %v109_v40 = vld [vmem:[%s2803_s1 + $0x258] sm:$0xff]  ;;  %v1546_v42 = vpack.c.bf16 %v157_v35, %v156_v34  ;;  %v126_v44 = vld [vmem:[%s2803_s1 + $0x2e0] sm:$0xff] }
  0x28   :  { %1531 = vmatprep.subr.bf16.mxu1 %v1530_v56  ;;  %v140_v41 = vld [vmem:[%s2803_s1 + $0x350] sm:$0xff]  ;;  %v141_v43 = vld [vmem:[%s2803_s1 + $0x358] sm:$0xff]  ;;  %v127_v45 = vld [vmem:[%s2803_s1 + $0x2e8] sm:$0xff]  ;;  %v1516_v48 = vpack.c.bf16 %v109_v40, %v108_v39 }
  0x29   :  { %1501 = vmatpush3.bf16.msra.mxu0 %v1500_v62  ;;  %v158_v46 = vld [vmem:[%s2803_s1 + $0x3e0] sm:$0xff]  ;;  %v159_v47 = vld [vmem:[%s2803_s1 + $0x3e8] sm:$0xff]  ;;  %v1548_v49 = vpack.c.bf16 %v141_v43, %v140_v41  ;;  %v1518_v50 = vpack.c.bf16 %v127_v45, %v126_v44  ;;  %v128_v56 = vld [vmem:[%s2803_s1 + $0x2f0] sm:$0xff] }
  0x2a   :  { %1503 = vmatprep.subr.bf16.mxu0 %v1502_v0  ;;  %v110_v51 = vld [vmem:[%s2803_s1 + $0x260] sm:$0xff]  ;;  %v111_v52 = vld [vmem:[%s2803_s1 + $0x268] sm:$0xff]  ;;  %v1550_v54 = vpack.c.bf16 %v159_v47, %v158_v46  ;;  %v129_v57 = vld [vmem:[%s2803_s1 + $0x2f8] sm:$0xff] }
  0x2b   :  { %1533 = vmatpush3.bf16.msra.mxu1 %v1532_v63  ;;  %v142_v53 = vld [vmem:[%s2803_s1 + $0x360] sm:$0xff]  ;;  %v143_v55 = vld [vmem:[%s2803_s1 + $0x368] sm:$0xff]  ;;  %v160_v58 = vld [vmem:[%s2803_s1 + $0x3f0] sm:$0xff]  ;;  %v1520_v60 = vpack.c.bf16 %v111_v52, %v110_v51  ;;  %v1522_v62 = vpack.c.bf16 %v129_v57, %v128_v56 }
  0x2c   :  { %1535 = vmatprep.subr.bf16.mxu1 %v1534_v4  ;;  %v161_v59 = vld [vmem:[%s2803_s1 + $0x3f8] sm:$0xff]  ;;  %v1552_v61 = vpack.c.bf16 %v143_v55, %v142_v53  ;;  %v112_v63 = vld [vmem:[%s2803_s1 + $0x270] sm:$0xff]  ;;  %v178_v4 = vld [vmem:[%s2803_s1 + $0x480] sm:$0xff] }
  0x2d   :  { %1505 = vmatpush3.bf16.msra.mxu0 %v1504_v10  ;;  %v113_v0 = vld [vmem:[%s2803_s1 + $0x278] sm:$0xff]  ;;  %v144_v1 = vld [vmem:[%s2803_s1 + $0x370] sm:$0xff]  ;;  %v1554_v2 = vpack.c.bf16 %v161_v59, %v160_v58  ;;  %v179_v5 = vld [vmem:[%s2803_s1 + $0x488] sm:$0xff] }
  0x2e   :  { %1507 = vmatprep.subr.bf16.mxu0 %v1506_v12  ;;  %v145_v3 = vld [vmem:[%s2803_s1 + $0x378] sm:$0xff]  ;;  %v210_v6 = vld [vmem:[%s2803_s1 + $0x580] sm:$0xff]  ;;  %v211_v7 = vld [vmem:[%s2803_s1 + $0x588] sm:$0xff]  ;;  %v1524_v8 = vpack.c.bf16 %v113_v0, %v112_v63  ;;  %v1558_v10 = vpack.c.bf16 %v179_v5, %v178_v4 }
  0x2f   :  { %1537 = vmatpush3.bf16.msra.mxu1 %v1536_v11  ;;  %v1556_v9 = vpack.c.bf16 %v145_v3, %v144_v1  ;;  %v162_v11 = vld [vmem:[%s2803_s1 + $0x400] sm:$0xff]  ;;  %v163_v12 = vld [vmem:[%s2803_s1 + $0x408] sm:$0xff]  ;;  %v1590_v14 = vpack.c.bf16 %v211_v7, %v210_v6  ;;  %v181_v17 = vld [vmem:[%s2803_s1 + $0x498] sm:$0xff] }
  0x30   :  { %1539 = vmatprep.subr.bf16.mxu1 %v1538_v16  ;;  %v194_v13 = vld [vmem:[%s2803_s1 + $0x500] sm:$0xff]  ;;  %v195_v15 = vld [vmem:[%s2803_s1 + $0x508] sm:$0xff]  ;;  %v180_v16 = vld [vmem:[%s2803_s1 + $0x490] sm:$0xff]  ;;  %v1560_v21 = vpack.c.bf16 %v163_v12, %v162_v11 }
  0x31   :  { %1509 = vmatpush3.bf16.msra.mxu0 %v1508_v22  ;;  %v212_v18 = vld [vmem:[%s2803_s1 + $0x590] sm:$0xff]  ;;  %v213_v19 = vld [vmem:[%s2803_s1 + $0x598] sm:$0xff]  ;;  %v18_v20 = vld [vmem:[%s2804_s0 + $0x20] sm:$0xff]  ;;  %v1592_v23 = vpack.c.bf16 %v195_v15, %v194_v13  ;;  %v1562_v24 = vpack.c.bf16 %v181_v17, %v180_v16 }
  0x32   :  { %1511 = vmatprep.subr.bf16.mxu0 %v1510_v26  ;;  %v20_v22 = vld [vmem:[%s2804_s0 + $0x30] sm:$0xff]  ;;  %v165_v26 = vld [vmem:[%s2803_s1 + $0x418] sm:$0xff]  ;;  %v1594_v28 = vpack.c.bf16 %v213_v19, %v212_v18  ;;  %v183_v31 = vld [vmem:[%s2803_s1 + $0x4a8] sm:$0xff] }
  0x33   :  { %1541 = vmatpush3.bf16.msra.mxu1 %v1540_v25  ;;  %v164_v25 = vld [vmem:[%s2803_s1 + $0x410] sm:$0xff]  ;;  %v197_v29 = vld [vmem:[%s2803_s1 + $0x518] sm:$0xff]  ;;  %v214_v32 = vld [vmem:[%s2803_s1 + $0x5a0] sm:$0xff] }
  0x34   :  { %1543 = vmatprep.subr.bf16.mxu1 %v1542_v30  ;;  %v196_v27 = vld [vmem:[%s2803_s1 + $0x510] sm:$0xff]  ;;  %v182_v30 = vld [vmem:[%s2803_s1 + $0x4a0] sm:$0xff]  ;;  %v215_v33 = vld [vmem:[%s2803_s1 + $0x5a8] sm:$0xff]  ;;  %v1564_v35 = vpack.c.bf16 %v165_v26, %v164_v25 }
  0x35   :  { %1513 = vmatpush3.bf16.msra.mxu0 %v1512_v36  ;;  %v23_v34 = vld [vmem:[%s2804_s0 + $0x48] sm:$0xff]  ;;  %v25_v36 = vld [vmem:[%s2804_s0 + $0x58] sm:$0xff]  ;;  %v166_v39 = vld [vmem:[%s2803_s1 + $0x420] sm:$0xff] }
  0x36   :  { %1515 = vmatprep.subr.bf16.mxu0 %v1514_v38  ;;  %v1566_v38 = vpack.c.bf16 %v183_v31, %v182_v30  ;;  %v167_v40 = vld [vmem:[%s2803_s1 + $0x428] sm:$0xff]  ;;  %v198_v41 = vld [vmem:[%s2803_s1 + $0x520] sm:$0xff]  ;;  %v184_v44 = vld [vmem:[%s2803_s1 + $0x4b0] sm:$0xff] }
  0x37   :  { %1545 = vmatpush3.bf16.msra.mxu1 %v1544_v37  ;;  %v1596_v37 = vpack.c.bf16 %v197_v29, %v196_v27  ;;  %v199_v43 = vld [vmem:[%s2803_s1 + $0x528] sm:$0xff]  ;;  %v185_v45 = vld [vmem:[%s2803_s1 + $0x4b8] sm:$0xff]  ;;  %v216_v46 = vld [vmem:[%s2803_s1 + $0x5b0] sm:$0xff] }
  0x38   :  { %1547 = vmatprep.subr.bf16.mxu1 %v1546_v42  ;;  %v1598_v42 = vpack.c.bf16 %v215_v33, %v214_v32  ;;  %v217_v47 = vld [vmem:[%s2803_s1 + $0x5b8] sm:$0xff]  ;;  %v168_v51 = vld [vmem:[%s2803_s1 + $0x430] sm:$0xff]  ;;  %v186_v56 = vld [vmem:[%s2803_s1 + $0x4c0] sm:$0xff] }
  0x39   :  { %1517 = vmatpush3.bf16.msra.mxu0 %v1516_v48  ;;  %v1568_v48 = vpack.c.bf16 %v167_v40, %v166_v39  ;;  %v169_v52 = vld [vmem:[%s2803_s1 + $0x438] sm:$0xff]  ;;  %v200_v53 = vld [vmem:[%s2803_s1 + $0x530] sm:$0xff]  ;;  %v187_v57 = vld [vmem:[%s2803_s1 + $0x4c8] sm:$0xff] }
  0x3a   :  { %1519 = vmatprep.subr.bf16.mxu0 %v1518_v50  ;;  %v1570_v50 = vpack.c.bf16 %v185_v45, %v184_v44  ;;  %v201_v55 = vld [vmem:[%s2803_s1 + $0x538] sm:$0xff]  ;;  %v218_v58 = vld [vmem:[%s2803_s1 + $0x5c0] sm:$0xff]  ;;  %v219_v59 = vld [vmem:[%s2803_s1 + $0x5c8] sm:$0xff] }
  0x3b   :  { %1549 = vmatpush3.bf16.msra.mxu1 %v1548_v49  ;;  %v1600_v49 = vpack.c.bf16 %v199_v43, %v198_v41  ;;  %v170_v63 = vld [vmem:[%s2803_s1 + $0x440] sm:$0xff]  ;;  %v171_v0 = vld [vmem:[%s2803_s1 + $0x448] sm:$0xff]  ;;  %v188_v4 = vld [vmem:[%s2803_s1 + $0x4d0] sm:$0xff] }
  0x3c   :  { %1551 = vmatprep.subr.bf16.mxu1 %v1550_v54  ;;  %v1602_v54 = vpack.c.bf16 %v217_v47, %v216_v46  ;;  %v202_v1 = vld [vmem:[%s2803_s1 + $0x540] sm:$0xff]  ;;  %v203_v3 = vld [vmem:[%s2803_s1 + $0x548] sm:$0xff]  ;;  %v189_v5 = vld [vmem:[%s2803_s1 + $0x4d8] sm:$0xff] }
  0x3d   :  { %1521 = vmatpush3.bf16.msra.mxu0 %v1520_v60  ;;  %v1572_v60 = vpack.c.bf16 %v169_v52, %v168_v51  ;;  %v220_v6 = vld [vmem:[%s2803_s1 + $0x5d0] sm:$0xff]  ;;  %v221_v7 = vld [vmem:[%s2803_s1 + $0x5d8] sm:$0xff]  ;;  %v190_v16 = vld [vmem:[%s2803_s1 + $0x4e0] sm:$0xff] }
  0x3e   :  { %1523 = vmatprep.subr.bf16.mxu0 %v1522_v62  ;;  %v1574_v62 = vpack.c.bf16 %v187_v57, %v186_v56  ;;  %v172_v11 = vld [vmem:[%s2803_s1 + $0x450] sm:$0xff]  ;;  %v173_v12 = vld [vmem:[%s2803_s1 + $0x458] sm:$0xff]  ;;  %v191_v17 = vld [vmem:[%s2803_s1 + $0x4e8] sm:$0xff] }
  0x3f   :  { %1553 = vmatpush3.bf16.msra.mxu1 %v1552_v61  ;;  %v1604_v61 = vpack.c.bf16 %v201_v55, %v200_v53  ;;  %v204_v13 = vld [vmem:[%s2803_s1 + $0x550] sm:$0xff]  ;;  %v205_v15 = vld [vmem:[%s2803_s1 + $0x558] sm:$0xff]  ;;  %v222_v18 = vld [vmem:[%s2803_s1 + $0x5e0] sm:$0xff] }
  0x40   :  { %1555 = vmatprep.subr.bf16.mxu1 %v1554_v2  ;;  %v1606_v2 = vpack.c.bf16 %v219_v59, %v218_v58  ;;  %v223_v19 = vld [vmem:[%s2803_s1 + $0x5e8] sm:$0xff]  ;;  %v206_v25 = vld [vmem:[%s2803_s1 + $0x560] sm:$0xff]  ;;  %v193_v29 = vld [vmem:[%s2803_s1 + $0x4f8] sm:$0xff] }
  0x41   :  { %1525 = vmatpush3.bf16.msra.mxu0 %v1524_v8  ;;  %v1576_v8 = vpack.c.bf16 %v171_v0, %v170_v63  ;;  %v1614_v26 = vpack.c.bf16 %v223_v19, %v222_v18  ;;  %v207_v27 = vld [vmem:[%s2803_s1 + $0x568] sm:$0xff]  ;;  %v224_v30 = vld [vmem:[%s2803_s1 + $0x5f0] sm:$0xff]  ;;  %v225_v31 = vld [vmem:[%s2803_s1 + $0x5f8] sm:$0xff] }
  0x42   :  { %1559 = vmatprep.subr.bf16.mxu0 %v1558_v10  ;;  %v1578_v10 = vpack.c.bf16 %v189_v5, %v188_v4  ;;  %v1616_v33 = vpack.c.bf16 %v207_v27, %v206_v25  ;;  %v209_v39 = vld [vmem:[%s2803_s1 + $0x578] sm:$0xff]  ;;  %v242_v40 = vld [vmem:[%s2803_s1 + $0x680] sm:$0xff]  ;;  %v243_v41 = vld [vmem:[%s2803_s1 + $0x688] sm:$0xff] }
  0x43   :  { %1557 = vmatpush3.bf16.msra.mxu1 %v1556_v9  ;;  %v1608_v9 = vpack.c.bf16 %v203_v3, %v202_v1  ;;  %v275_v43 = vld [vmem:[%s2803_s1 + $0x788] sm:$0xff]  ;;  %v1622_v46 = vpack.c.bf16 %v243_v41, %v242_v40  ;;  %v226_v47 = vld [vmem:[%s2803_s1 + $0x600] sm:$0xff]  ;;  %v244_v52 = vld [vmem:[%s2803_s1 + $0x690] sm:$0xff] }
  0x44   :  { %1591 = vmatprep.subr.bf16.mxu1 %v1590_v14  ;;  %566 = vmatmul.mubr.f32.vlgmr.msra.gmra.mrb[2].mxu0 %v18_v20  ;;  %v1610_v14 = vpack.c.bf16 %v221_v7, %v220_v6  ;;  %v1580_v20 = vpack.c.bf16 %v173_v12, %v172_v11  ;;  %v259_v51 = vld [vmem:[%s2803_s1 + $0x708] sm:$0xff]  ;;  %v245_v53 = vld [vmem:[%s2803_s1 + $0x698] sm:$0xff]  ;;  %v22_v56 = vld [vmem:[%s2804_s0 + $0x40] sm:$0xff] }
  0x45   :  { %1561 = vmatpush3.bf16.msra.mxu0 %v1560_v21  ;;  %705 = vmatprep.mubr.f32.mxu0 %v23_v34  ;;  %v1612_v21 = vpack.c.bf16 %v205_v15, %v204_v13  ;;  %v277_v55 = vld [vmem:[%s2803_s1 + $0x798] sm:$0xff]  ;;  %v24_v58 = vld [vmem:[%s2804_s0 + $0x50] sm:$0xff]  ;;  %v247_v3 = vld [vmem:[%s2803_s1 + $0x6a8] sm:$0xff] }
  0x46   :  { %636 = vmatmul.mubr.f32.vlgmr.msra.gmra.mrb[2].mxu1 %v20_v22  ;;  %1563 = vmatprep.subr.bf16.mxu0 %v1562_v24  ;;  %v1582_v22 = vpack.c.bf16 %v191_v17, %v190_v16  ;;  %v175_v24 = vld [vmem:[%s2803_s1 + $0x468] sm:$0xff]  ;;  %v260_v63 = vld [vmem:[%s2803_s1 + $0x710] sm:$0xff]  ;;  %v261_v1 = vld [vmem:[%s2803_s1 + $0x718] sm:$0xff] }
  0x47   :  { %1593 = vmatpush3.bf16.msra.mxu1 %v1592_v23  ;;  %775 = vmatprep.mubr.f32.mxu1 %v25_v36  ;;  %v174_v23 = vld [vmem:[%s2803_s1 + $0x460] sm:$0xff]  ;;  %v177_v36 = vld [vmem:[%s2803_s1 + $0x478] sm:$0xff]  ;;  %v279_v5 = vld [vmem:[%s2803_s1 + $0x7a8] sm:$0xff] }
  0x48   :  { %1595 = vmatprep.subr.bf16.mxu1 %v1594_v28  ;;  %v192_v28 = vld [vmem:[%s2803_s1 + $0x4f0] sm:$0xff]  ;;  %v1584_v32 = vpack.c.bf16 %v175_v24, %v174_v23  ;;  %v278_v4 = vld [vmem:[%s2803_s1 + $0x7a0] sm:$0xff]  ;;  %v27_v6 = vld [vmem:[%s2804_s0 + $0x68] sm:$0xff] }
  0x49   :  { %1565 = vmatpush3.bf16.msra.mxu0 %v1564_v35  ;;  %v1586_v34 = vpack.c.bf16 %v193_v29, %v192_v28  ;;  %v176_v35 = vld [vmem:[%s2803_s1 + $0x470] sm:$0xff]  ;;  %v230_v11 = vld [vmem:[%s2803_s1 + $0x620] sm:$0xff]  ;;  %v231_v12 = vld [vmem:[%s2803_s1 + $0x628] sm:$0xff] }
  0x4a   :  { %1567 = vmatprep.subr.bf16.mxu0 %v1566_v38  ;;  %v1618_v38 = vpack.c.bf16 %v225_v31, %v224_v30  ;;  %v1588_v44 = vpack.c.bf16 %v177_v36, %v176_v35  ;;  %v262_v13 = vld [vmem:[%s2803_s1 + $0x720] sm:$0xff]  ;;  %v263_v15 = vld [vmem:[%s2803_s1 + $0x728] sm:$0xff]  ;;  %v248_v16 = vld [vmem:[%s2803_s1 + $0x6b0] sm:$0xff] }
  0x4b   :  { %1597 = vmatpush3.bf16.msra.mxu1 %v1596_v37  ;;  %v208_v37 = vld [vmem:[%s2803_s1 + $0x570] sm:$0xff]  ;;  %v249_v17 = vld [vmem:[%s2803_s1 + $0x6b8] sm:$0xff]  ;;  %v250_v28 = vld [vmem:[%s2803_s1 + $0x6c0] sm:$0xff] }
  0x4c   :  { %1599 = vmatprep.subr.bf16.mxu1 %v1598_v42  ;;  %v274_v42 = vld [vmem:[%s2803_s1 + $0x780] sm:$0xff]  ;;  %v1620_v45 = vpack.c.bf16 %v209_v39, %v208_v37  ;;  %v280_v18 = vld [vmem:[%s2803_s1 + $0x7b0] sm:$0xff]  ;;  %v281_v19 = vld [vmem:[%s2803_s1 + $0x7b8] sm:$0xff] }
  0x4d   :  { %1569 = vmatpush3.bf16.msra.mxu0 %v1568_v48  ;;  %v227_v48 = vld [vmem:[%s2803_s1 + $0x608] sm:$0xff]  ;;  %v232_v23 = vld [vmem:[%s2803_s1 + $0x630] sm:$0xff]  ;;  %v233_v24 = vld [vmem:[%s2803_s1 + $0x638] sm:$0xff] }
  0x4e   :  { %1571 = vmatprep.subr.bf16.mxu0 %v1570_v50  ;;  %v1654_v50 = vpack.c.bf16 %v275_v43, %v274_v42  ;;  %v1624_v57 = vpack.c.bf16 %v227_v48, %v226_v47  ;;  %v264_v25 = vld [vmem:[%s2803_s1 + $0x730] sm:$0xff]  ;;  %v265_v27 = vld [vmem:[%s2803_s1 + $0x738] sm:$0xff]  ;;  %v251_v29 = vld [vmem:[%s2803_s1 + $0x6c8] sm:$0xff] }
  0x4f   :  { %1601 = vmatpush3.bf16.msra.mxu1 %v1600_v49  ;;  %v258_v49 = vld [vmem:[%s2803_s1 + $0x700] sm:$0xff]  ;;  %v283_v31 = vld [vmem:[%s2803_s1 + $0x7c8] sm:$0xff]  ;;  %v252_v40 = vld [vmem:[%s2803_s1 + $0x6d0] sm:$0xff] }
  0x50   :  { %1603 = vmatprep.subr.bf16.mxu1 %v1602_v54  ;;  %v276_v54 = vld [vmem:[%s2803_s1 + $0x790] sm:$0xff]  ;;  %v1656_v59 = vpack.c.bf16 %v259_v51, %v258_v49  ;;  %v282_v30 = vld [vmem:[%s2803_s1 + $0x7c0] sm:$0xff]  ;;  %v235_v36 = vld [vmem:[%s2803_s1 + $0x648] sm:$0xff] }
  0x51   :  { %1573 = vmatpush3.bf16.msra.mxu0 %v1572_v60  ;;  %v1626_v60 = vpack.c.bf16 %v245_v53, %v244_v52  ;;  %v1658_v0 = vpack.c.bf16 %v277_v55, %v276_v54  ;;  %v234_v35 = vld [vmem:[%s2803_s1 + $0x640] sm:$0xff]  ;;  %v267_v39 = vld [vmem:[%s2803_s1 + $0x748] sm:$0xff]  ;;  %v253_v41 = vld [vmem:[%s2803_s1 + $0x6d8] sm:$0xff] }
  0x52   :  { %1575 = vmatprep.subr.bf16.mxu0 %v1574_v62  ;;  %v229_v62 = vld [vmem:[%s2803_s1 + $0x618] sm:$0xff]  ;;  %v266_v37 = vld [vmem:[%s2803_s1 + $0x740] sm:$0xff]  ;;  %v284_v42 = vld [vmem:[%s2803_s1 + $0x7d0] sm:$0xff] }
  0x53   :  { %1605 = vmatpush3.bf16.msra.mxu1 %v1604_v61  ;;  %v228_v61 = vld [vmem:[%s2803_s1 + $0x610] sm:$0xff]  ;;  %v285_v43 = vld [vmem:[%s2803_s1 + $0x7d8] sm:$0xff]  ;;  %v254_v52 = vld [vmem:[%s2803_s1 + $0x6e0] sm:$0xff] }
  0x54   :  { %1607 = vmatprep.subr.bf16.mxu1 %v1606_v2  ;;  %v246_v2 = vld [vmem:[%s2803_s1 + $0x6a0] sm:$0xff]  ;;  %v1628_v7 = vpack.c.bf16 %v229_v62, %v228_v61  ;;  %v236_v47 = vld [vmem:[%s2803_s1 + $0x650] sm:$0xff]  ;;  %v237_v48 = vld [vmem:[%s2803_s1 + $0x658] sm:$0xff] }
  0x55   :  { %1577 = vmatpush3.bf16.msra.mxu0 %v1576_v8  ;;  %v29_v8 = vld [vmem:[%s2804_s0 + $0x78] sm:$0xff]  ;;  %v268_v49 = vld [vmem:[%s2803_s1 + $0x750] sm:$0xff]  ;;  %v255_v53 = vld [vmem:[%s2803_s1 + $0x6e8] sm:$0xff] }
  0x56   :  { %1579 = vmatprep.subr.bf16.mxu0 %v1578_v10  ;;  %v1630_v10 = vpack.c.bf16 %v247_v3, %v246_v2  ;;  %v269_v51 = vld [vmem:[%s2803_s1 + $0x758] sm:$0xff]  ;;  %v286_v54 = vld [vmem:[%s2803_s1 + $0x7e0] sm:$0xff]  ;;  %v287_v55 = vld [vmem:[%s2803_s1 + $0x7e8] sm:$0xff] }
  0x57   :  { %1609 = vmatpush3.bf16.msra.mxu1 %v1608_v9  ;;  %v1660_v9 = vpack.c.bf16 %v261_v1, %v260_v63  ;;  %v270_v61 = vld [vmem:[%s2803_s1 + $0x760] sm:$0xff]  ;;  %v1678_v62 = vpack.c.bf16 %v287_v55, %v286_v54  ;;  %v271_v63 = vld [vmem:[%s2803_s1 + $0x768] sm:$0xff]  ;;  %v257_v1 = vld [vmem:[%s2803_s1 + $0x6f8] sm:$0xff] }
  0x58   :  { %1611 = vmatprep.subr.bf16.mxu1 %v1610_v14  ;;  %v1662_v14 = vpack.c.bf16 %v279_v5, %v278_v4  ;;  %v288_v2 = vld [vmem:[%s2803_s1 + $0x7f0] sm:$0xff]  ;;  %v289_v3 = vld [vmem:[%s2803_s1 + $0x7f8] sm:$0xff]  ;;  %v1680_v5 = vpack.c.bf16 %v271_v63, %v270_v61 }
  0x59   :  { %1581 = vmatpush3.bf16.msra.mxu0 %v1580_v20  ;;  %v1632_v20 = vpack.c.bf16 %v231_v12, %v230_v11  ;;  %v273_v11 = vld [vmem:[%s2803_s1 + $0x778] sm:$0xff]  ;;  %v306_v12 = vld [vmem:[%s2803_s1 + $0x880] sm:$0xff]  ;;  %v344_v54 = vld [vmem:[%s2803_s1 + $0x9b0] sm:$0xff] }
  0x5a   :  { %1583 = vmatprep.subr.bf16.mxu0 %v1582_v22  ;;  %v1634_v22 = vpack.c.bf16 %v249_v17, %v248_v16  ;;  %v345_v55 = vld [vmem:[%s2803_s1 + $0x9b8] sm:$0xff]  ;;  %v328_v61 = vld [vmem:[%s2803_s1 + $0x930] sm:$0xff] }
  0x5b   :  { %1613 = vmatpush3.bf16.msra.mxu1 %v1612_v21  ;;  %v1664_v21 = vpack.c.bf16 %v263_v15, %v262_v13  ;;  %v307_v13 = vld [vmem:[%s2803_s1 + $0x888] sm:$0xff]  ;;  %v329_v63 = vld [vmem:[%s2803_s1 + $0x938] sm:$0xff] }
  0x5c   :  { %1615 = vmatprep.subr.bf16.mxu1 %v1614_v26  ;;  %v1666_v26 = vpack.c.bf16 %v281_v19, %v280_v18  ;;  %v339_v15 = vld [vmem:[%s2803_s1 + $0x988] sm:$0xff]  ;;  %v1686_v18 = vpack.c.bf16 %v307_v13, %v306_v12  ;;  %v290_v19 = vld [vmem:[%s2803_s1 + $0x800] sm:$0xff]  ;;  %v316_v12 = vld [vmem:[%s2803_s1 + $0x8d0] sm:$0xff] }
  0x5d   :  { %1585 = vmatpush3.bf16.msra.mxu0 %v1584_v32  ;;  %v1636_v32 = vpack.c.bf16 %v233_v24, %v232_v23  ;;  %v323_v23 = vld [vmem:[%s2803_s1 + $0x908] sm:$0xff]  ;;  %v308_v24 = vld [vmem:[%s2803_s1 + $0x890] sm:$0xff]  ;;  %v317_v13 = vld [vmem:[%s2803_s1 + $0x8d8] sm:$0xff] }
  0x5e   :  { %1587 = vmatprep.subr.bf16.mxu0 %v1586_v34  ;;  %v1638_v34 = vpack.c.bf16 %v251_v29, %v250_v28  ;;  %v26_v28 = vld [vmem:[%s2804_s0 + $0x60] sm:$0xff] }
  0x5f   :  { %1617 = vmatpush3.bf16.msra.mxu1 %v1616_v33  ;;  %v1668_v33 = vpack.c.bf16 %v265_v27, %v264_v25  ;;  %v309_v25 = vld [vmem:[%s2803_s1 + $0x898] sm:$0xff] }
  0x60   :  { %1619 = vmatprep.subr.bf16.mxu1 %v1618_v38  ;;  %v1670_v38 = vpack.c.bf16 %v283_v31, %v282_v30  ;;  %v341_v27 = vld [vmem:[%s2803_s1 + $0x998] sm:$0xff]  ;;  %v28_v30 = vld [vmem:[%s2804_s0 + $0x70] sm:$0xff] }
  0x61   :  { %1589 = vmatpush3.bf16.msra.mxu0 %v1588_v44  ;;  %v1640_v44 = vpack.c.bf16 %v235_v36, %v234_v35  ;;  %v324_v35 = vld [vmem:[%s2803_s1 + $0x910] sm:$0xff] }
  0x62   :  { %1623 = vmatprep.subr.bf16.mxu0 %v1622_v46  ;;  %v1642_v46 = vpack.c.bf16 %v253_v41, %v252_v40  ;;  %v342_v40 = vld [vmem:[%s2803_s1 + $0x9a0] sm:$0xff]  ;;  %v343_v41 = vld [vmem:[%s2803_s1 + $0x9a8] sm:$0xff] }
  0x63   :  { %1621 = vmatpush3.bf16.msra.mxu1 %v1620_v45  ;;  %v1672_v45 = vpack.c.bf16 %v267_v39, %v266_v37  ;;  %v325_v37 = vld [vmem:[%s2803_s1 + $0x918] sm:$0xff]  ;;  %v311_v39 = vld [vmem:[%s2803_s1 + $0x8a8] sm:$0xff] }
  0x64   :  { %1655 = vmatprep.subr.bf16.mxu1 %v1654_v50  ;;  %706 = vmatmul.mubr.f32.vlgmr.msra.gmra.mrb[4].mxu0 %v22_v56  ;;  %v1674_v50 = vpack.c.bf16 %v285_v43, %v284_v42  ;;  %v1644_v56 = vpack.c.bf16 %v237_v48, %v236_v47  ;;  %v31_v42 = vld [vmem:[%s2804_s0 + $0x88] sm:$0xff]  ;;  %v294_v47 = vld [vmem:[%s2803_s1 + $0x820] sm:$0xff] }
  0x65   :  { %1625 = vmatpush3.bf16.msra.mxu0 %v1624_v57  ;;  %845 = vmatprep.mubr.f32.mxu0 %v27_v6  ;;  %v1676_v57 = vpack.c.bf16 %v269_v51, %v268_v49  ;;  %v295_v48 = vld [vmem:[%s2803_s1 + $0x828] sm:$0xff]  ;;  %v326_v49 = vld [vmem:[%s2803_s1 + $0x920] sm:$0xff] }
  0x66   :  { %776 = vmatmul.mubr.f32.vlgmr.msra.gmra.mrb[4].mxu1 %v24_v58  ;;  %1627 = vmatprep.subr.bf16.mxu0 %v1626_v60  ;;  %v1646_v58 = vpack.c.bf16 %v255_v53, %v254_v52  ;;  %v239_v60 = vld [vmem:[%s2803_s1 + $0x668] sm:$0xff]  ;;  %v312_v52 = vld [vmem:[%s2803_s1 + $0x8b0] sm:$0xff]  ;;  %v313_v53 = vld [vmem:[%s2803_s1 + $0x8b8] sm:$0xff] }
  0x67   :  { %1657 = vmatpush3.bf16.msra.mxu1 %v1656_v59  ;;  %915 = vmatprep.mubr.f32.mxu1 %v29_v8  ;;  %v238_v59 = vld [vmem:[%s2803_s1 + $0x660] sm:$0xff]  ;;  %v241_v8 = vld [vmem:[%s2803_s1 + $0x678] sm:$0xff]  ;;  %v327_v51 = vld [vmem:[%s2803_s1 + $0x928] sm:$0xff] }
  0x68   :  { %1659 = vmatprep.subr.bf16.mxu1 %v1658_v0  ;;  %v256_v0 = vld [vmem:[%s2803_s1 + $0x6f0] sm:$0xff]  ;;  %v1648_v4 = vpack.c.bf16 %v239_v60, %v238_v59  ;;  %v297_v60 = vld [vmem:[%s2803_s1 + $0x838] sm:$0xff] }
  0x69   :  { %1629 = vmatpush3.bf16.msra.mxu0 %v1628_v7  ;;  %v1650_v6 = vpack.c.bf16 %v257_v1, %v256_v0  ;;  %v240_v7 = vld [vmem:[%s2803_s1 + $0x670] sm:$0xff]  ;;  %v314_v0 = vld [vmem:[%s2803_s1 + $0x8c0] sm:$0xff]  ;;  %v315_v1 = vld [vmem:[%s2803_s1 + $0x8c8] sm:$0xff] }
  0x6a   :  { %1631 = vmatprep.subr.bf16.mxu0 %v1630_v10  ;;  %v1682_v10 = vpack.c.bf16 %v289_v3, %v288_v2  ;;  %v1652_v16 = vpack.c.bf16 %v241_v8, %v240_v7  ;;  %v296_v59 = vld [vmem:[%s2803_s1 + $0x830] sm:$0xff]  ;;  %v346_v2 = vld [vmem:[%s2803_s1 + $0x9c0] sm:$0xff]  ;;  %v347_v3 = vld [vmem:[%s2803_s1 + $0x9c8] sm:$0xff] }
  0x6b   :  { %1661 = vmatpush3.bf16.msra.mxu1 %v1660_v9  ;;  %v272_v9 = vld [vmem:[%s2803_s1 + $0x770] sm:$0xff]  ;;  %v298_v7 = vld [vmem:[%s2803_s1 + $0x840] sm:$0xff]  ;;  %v299_v8 = vld [vmem:[%s2803_s1 + $0x848] sm:$0xff] }
  0x6c   :  { %1663 = vmatprep.subr.bf16.mxu1 %v1662_v14  ;;  %v338_v14 = vld [vmem:[%s2803_s1 + $0x980] sm:$0xff]  ;;  %v1684_v17 = vpack.c.bf16 %v273_v11, %v272_v9  ;;  %v331_v11 = vld [vmem:[%s2803_s1 + $0x948] sm:$0xff] }
  0x6d   :  { %1633 = vmatpush3.bf16.msra.mxu0 %v1632_v20  ;;  %v291_v20 = vld [vmem:[%s2803_s1 + $0x808] sm:$0xff]  ;;  %v330_v9 = vld [vmem:[%s2803_s1 + $0x940] sm:$0xff] }
  0x6e   :  { %1635 = vmatprep.subr.bf16.mxu0 %v1634_v22  ;;  %v1718_v22 = vpack.c.bf16 %v339_v15, %v338_v14  ;;  %v1688_v29 = vpack.c.bf16 %v291_v20, %v290_v19  ;;  %v348_v14 = vld [vmem:[%s2803_s1 + $0x9d0] sm:$0xff]  ;;  %v349_v15 = vld [vmem:[%s2803_s1 + $0x9d8] sm:$0xff] }
  0x6f   :  { %1665 = vmatpush3.bf16.msra.mxu1 %v1664_v21  ;;  %v322_v21 = vld [vmem:[%s2803_s1 + $0x900] sm:$0xff]  ;;  %v300_v19 = vld [vmem:[%s2803_s1 + $0x850] sm:$0xff]  ;;  %v301_v20 = vld [vmem:[%s2803_s1 + $0x858] sm:$0xff] }
  0x70   :  { %1667 = vmatprep.subr.bf16.mxu1 %v1666_v26  ;;  %v340_v26 = vld [vmem:[%s2803_s1 + $0x990] sm:$0xff]  ;;  %v1720_v31 = vpack.c.bf16 %v323_v23, %v322_v21  ;;  %v333_v23 = vld [vmem:[%s2803_s1 + $0x958] sm:$0xff] }
  0x71   :  { %1637 = vmatpush3.bf16.msra.mxu0 %v1636_v32  ;;  %v1690_v32 = vpack.c.bf16 %v309_v25, %v308_v24  ;;  %v1722_v36 = vpack.c.bf16 %v341_v27, %v340_v26  ;;  %v332_v21 = vld [vmem:[%s2803_s1 + $0x950] sm:$0xff]  ;;  %v318_v24 = vld [vmem:[%s2803_s1 + $0x8e0] sm:$0xff]  ;;  %v319_v25 = vld [vmem:[%s2803_s1 + $0x8e8] sm:$0xff] }
  0x72   :  { %1639 = vmatprep.subr.bf16.mxu0 %v1638_v34  ;;  %v293_v34 = vld [vmem:[%s2803_s1 + $0x818] sm:$0xff]  ;;  %v350_v26 = vld [vmem:[%s2803_s1 + $0x9e0] sm:$0xff]  ;;  %v351_v27 = vld [vmem:[%s2803_s1 + $0x9e8] sm:$0xff] }
  0x73   :  { %1669 = vmatpush3.bf16.msra.mxu1 %v1668_v33  ;;  %v292_v33 = vld [vmem:[%s2803_s1 + $0x810] sm:$0xff] }
  0x74   :  { %1671 = vmatprep.subr.bf16.mxu1 %v1670_v38  ;;  %v310_v38 = vld [vmem:[%s2803_s1 + $0x8a0] sm:$0xff]  ;;  %v1692_v43 = vpack.c.bf16 %v293_v34, %v292_v33  ;;  %v1742_v34 = vpack.c.bf16 %v351_v27, %v350_v26 }
  0x75   :  { %1641 = vmatpush3.bf16.msra.mxu0 %v1640_v44  ;;  %v33_v44 = vld [vmem:[%s2804_s0 + $0x98] sm:$0xff]  ;;  %v334_v33 = vld [vmem:[%s2803_s1 + $0x960] sm:$0xff] }
  0x76   :  { %1643 = vmatprep.subr.bf16.mxu0 %v1642_v46  ;;  %v1694_v46 = vpack.c.bf16 %v311_v39, %v310_v38  ;;  %v352_v38 = vld [vmem:[%s2803_s1 + $0x9f0] sm:$0xff]  ;;  %v353_v39 = vld [vmem:[%s2803_s1 + $0x9f8] sm:$0xff] }
  0x77   :  { %1673 = vmatpush3.bf16.msra.mxu1 %v1672_v45  ;;  %v1724_v45 = vpack.c.bf16 %v325_v37, %v324_v35  ;;  %v335_v35 = vld [vmem:[%s2803_s1 + $0x968] sm:$0xff]  ;;  %v321_v37 = vld [vmem:[%s2803_s1 + $0x8f8] sm:$0xff] }
  0x78   :  { %1675 = vmatprep.subr.bf16.mxu1 %v1674_v50  ;;  %v1726_v50 = vpack.c.bf16 %v343_v41, %v342_v40  ;;  %v1744_v41 = vpack.c.bf16 %v335_v35, %v334_v33 }
  0x79   :  { %1645 = vmatpush3.bf16.msra.mxu0 %v1644_v56  ;;  %v1696_v56 = vpack.c.bf16 %v295_v48, %v294_v47  ;;  %v337_v47 = vld [vmem:[%s2803_s1 + $0x978] sm:$0xff] }
  0x7a   :  { %1647 = vmatprep.subr.bf16.mxu0 %v1646_v58  ;;  %v1698_v58 = vpack.c.bf16 %v313_v53, %v312_v52  ;;  %v1079_v53 = vld [vmem:[%s2805_s2] ss:$0 sm:$0xff] }
  0x7b   :  { %1677 = vmatpush3.bf16.msra.mxu1 %v1676_v57  ;;  %v1728_v57 = vpack.c.bf16 %v327_v51, %v326_v49  ;;  %v32_v51 = vld [vmem:[%s2804_s0 + $0x90] sm:$0xff] }
  0x7c   :  { %1679 = vmatprep.subr.bf16.mxu1 %v1678_v62  ;;  %v1730_v62 = vpack.c.bf16 %v345_v55, %v344_v54 }
  0x7d   :  { %1649 = vmatpush3.bf16.msra.mxu0 %v1648_v4  ;;  %v1700_v4 = vpack.c.bf16 %v297_v60, %v296_v59 }
  0x7e   :  { %1651 = vmatprep.subr.bf16.mxu0 %v1650_v6  ;;  %v1702_v6 = vpack.c.bf16 %v315_v1, %v314_v0 }
  0x7f   :  { %1681 = vmatpush3.bf16.msra.mxu1 %v1680_v5  ;;  %v1732_v5 = vpack.c.bf16 %v329_v63, %v328_v61 }
  0x80   :  { %1683 = vmatprep.subr.bf16.mxu1 %v1682_v10  ;;  %v1734_v10 = vpack.c.bf16 %v347_v3, %v346_v2 }
  0x81   :  { %1653 = vmatpush3.bf16.msra.mxu0 %v1652_v16  ;;  %v1704_v16 = vpack.c.bf16 %v299_v8, %v298_v7 }
  0x82   :  { %1687 = vmatprep.subr.bf16.mxu0 %v1686_v18  ;;  %v1706_v18 = vpack.c.bf16 %v317_v13, %v316_v12 }
  0x83   :  { %1685 = vmatpush3.bf16.msra.mxu1 %v1684_v17  ;;  %v1736_v17 = vpack.c.bf16 %v331_v11, %v330_v9 }
  0x84   :  { %1719 = vmatprep.subr.bf16.mxu1 %v1718_v22  ;;  %846 = vmatmul.mubr.f32.vlgmr.msra.gmra.mrb[6].mxu0 %v26_v28  ;;  %v1738_v22 = vpack.c.bf16 %v349_v15, %v348_v14  ;;  %v1708_v28 = vpack.c.bf16 %v301_v20, %v300_v19 }
  0x85   :  { %1689 = vmatpush3.bf16.msra.mxu0 %v1688_v29  ;;  %985 = vmatprep.mubr.f32.mxu0 %v31_v42  ;;  %v1740_v29 = vpack.c.bf16 %v333_v23, %v332_v21 }
  0x86   :  { %916 = vmatmul.mubr.f32.vlgmr.msra.gmra.mrb[6].mxu1 %v28_v30  ;;  %1691 = vmatprep.subr.bf16.mxu0 %v1690_v32  ;;  %v1710_v30 = vpack.c.bf16 %v319_v25, %v318_v24  ;;  %v303_v32 = vld [vmem:[%s2803_s1 + $0x868] sm:$0xff] }
  0x87   :  { %1721 = vmatpush3.bf16.msra.mxu1 %v1720_v31  ;;  %1055 = vmatprep.mubr.f32.mxu1 %v33_v44  ;;  %v302_v31 = vld [vmem:[%s2803_s1 + $0x860] sm:$0xff]  ;;  %v305_v44 = vld [vmem:[%s2803_s1 + $0x878] sm:$0xff] }
  0x88   :  { %1723 = vmatprep.subr.bf16.mxu1 %v1722_v36  ;;  %v320_v36 = vld [vmem:[%s2803_s1 + $0x8f0] sm:$0xff]  ;;  %v1712_v40 = vpack.c.bf16 %v303_v32, %v302_v31 }
  0x89   :  { %1693 = vmatpush3.bf16.msra.mxu0 %v1692_v43  ;;  %v1714_v42 = vpack.c.bf16 %v321_v37, %v320_v36  ;;  %v304_v43 = vld [vmem:[%s2803_s1 + $0x870] sm:$0xff] }
  0x8a   :  { %1695 = vmatprep.subr.bf16.mxu0 %v1694_v46  ;;  %v336_v46 = vld [vmem:[%s2803_s1 + $0x970] sm:$0xff]  ;;  %v1716_v48 = vpack.c.bf16 %v305_v44, %v304_v43 }
  0x8b   :  { %1725 = vmatpush3.bf16.msra.mxu1 %v1724_v45  ;;  %v1746_v45 = vpack.c.bf16 %v353_v39, %v352_v38  ;;  %v1748_v49 = vpack.c.bf16 %v337_v47, %v336_v46 }
  0x8c   :  { %1727 = vmatprep.subr.bf16.mxu1 %v1726_v50  ;;  %v30_v50 = vld [vmem:[%s2804_s0 + $0x80] sm:$0xff] }
  0x8d   :  { %1697 = vmatpush3.bf16.msra.mxu0 %v1696_v56 }
  0x8e   :  { %1699 = vmatprep.subr.bf16.mxu0 %v1698_v58 }
  0x8f   :  { %1729 = vmatpush3.bf16.msra.mxu1 %v1728_v57 }
  0x90   :  { %1731 = vmatprep.subr.bf16.mxu1 %v1730_v62 }
  0x91   :  { %1701 = vmatpush3.bf16.msra.mxu0 %v1700_v4 }
  0x92   :  { %1703 = vmatprep.subr.bf16.mxu0 %v1702_v6 }
  0x93   :  { %1733 = vmatpush3.bf16.msra.mxu1 %v1732_v5 }
  0x94   :  { %1735 = vmatprep.subr.bf16.mxu1 %v1734_v10 }
  0x95   :  { %1705 = vmatpush3.bf16.msra.mxu0 %v1704_v16 }
  0x96   :  { %1707 = vmatprep.subr.bf16.mxu0 %v1706_v18 }
  0x97   :  { %1737 = vmatpush3.bf16.msra.mxu1 %v1736_v17 }
  0x98   :  { %1739 = vmatprep.subr.bf16.mxu1 %v1738_v22 }
  0x99   :  { %1709 = vmatpush3.bf16.msra.mxu0 %v1708_v28 }
  0x9a   :  { %1711 = vmatprep.subr.bf16.mxu0 %v1710_v30 }
  0x9b   :  { %1741 = vmatpush3.bf16.msra.mxu1 %v1740_v29 }
  0x9c   :  { %1743 = vmatprep.subr.bf16.mxu1 %v1742_v34 }
  0x9d   :  { %1713 = vmatpush3.bf16.msra.mxu0 %v1712_v40 }
  0x9e   :  { %1715 = vmatprep.subr.bf16.mxu0 %v1714_v42 }
  0x9f   :  { %1745 = vmatpush3.bf16.msra.mxu1 %v1744_v41 }
  0xa0   :  { %1747 = vmatprep.subr.bf16.mxu1 %v1746_v45 }
  0xa1   :  { %1717 = vmatpush3.bf16.msra.mxu0 %v1716_v48 }
  0xa3   :  { %1749 = vmatpush3.bf16.msra.mxu1 %v1748_v49 }
  0xa4   :  { %986 = vmatmul.mubr.f32.vlgmr.msra.gmra.mrb[8].mxu0 %v30_v50 }
  0xa6   :  { %1056 = vmatmul.mubr.f32.vlgmr.msra.gmra.mrb[8].mxu1 %v32_v51 }
  0xf7   :  { %v1112_v52 = vpop.f32.mrb[0].mxu0 }
  0xf8   :  { %v1113_v54 = vpop.f32.mrb[1].mxu0 }
  0xf9   :  { %v1147_v55 = vpop.f32.mrb[0].mxu1  ;;  %v1114_v56 = vadd.f32 %v1113_v54, %v1112_v52 }
  0xfa   :  { %v1148_v57 = vpop.f32.mrb[1].mxu1 }
  0xfb   :  { %v1149_v58 = vadd.f32 %v1148_v57, %v1147_v55  ;;  %v428_v59 = vadd.f32 %v1114_v56, %v1079_v53 }
  0xfd   :  { %v498_v60 = vadd.f32 %v1149_v58, %v428_v59 }
 0x117   :  { %v1182_v61 = vpop.f32.mrb[2].mxu0 }
 0x118   :  { %v1183_v62 = vpop.f32.mrb[3].mxu0 }
 0x119   :  { %v1217_v63 = vpop.f32.mrb[2].mxu1  ;;  %v1184_v0 = vadd.f32 %v1183_v62, %v1182_v61 }
 0x11a   :  { %v1218_v1 = vpop.f32.mrb[3].mxu1 }
 0x11b   :  { %v1219_v2 = vadd.f32 %v1218_v1, %v1217_v63  ;;  %v568_v3 = vadd.f32 %v1184_v0, %v498_v60 }
 0x11d   :  { %v638_v4 = vadd.f32 %v1219_v2, %v568_v3 }
 0x137   :  { %v1252_v5 = vpop.f32.mrb[4].mxu0 }
 0x138   :  { %v1253_v6 = vpop.f32.mrb[5].mxu0 }
 0x139   :  { %v1287_v7 = vpop.f32.mrb[4].mxu1  ;;  %v1254_v8 = vadd.f32 %v1253_v6, %v1252_v5 }
 0x13a   :  { %v1288_v9 = vpop.f32.mrb[5].mxu1 }
 0x13b   :  { %v1289_v10 = vadd.f32 %v1288_v9, %v1287_v7  ;;  %v708_v11 = vadd.f32 %v1254_v8, %v638_v4 }
 0x13d   :  { %v778_v12 = vadd.f32 %v1289_v10, %v708_v11 }
 0x157   :  { %v1322_v13 = vpop.f32.mrb[6].mxu0 }
 0x158   :  { %v1323_v14 = vpop.f32.mrb[7].mxu0 }
 0x159   :  { %v1357_v15 = vpop.f32.mrb[6].mxu1  ;;  %v1324_v16 = vadd.f32 %v1323_v14, %v1322_v13 }
 0x15a   :  { %v1358_v17 = vpop.f32.mrb[7].mxu1 }
 0x15b   :  { %v1359_v18 = vadd.f32 %v1358_v17, %v1357_v15  ;;  %v848_v19 = vadd.f32 %v1324_v16, %v778_v12 }
 0x15d   :  { %v918_v20 = vadd.f32 %v1359_v18, %v848_v19 }
 0x177   :  { %v1392_v21 = vpop.f32.mrb[8].mxu0 }
 0x178   :  { %v1393_v22 = vpop.f32.mrb[9].mxu0 }
 0x179   :  { %v1427_v23 = vpop.f32.mrb[8].mxu1  ;;  %v1394_v24 = vadd.f32 %v1393_v22, %v1392_v21 }
 0x17a   :  { %v1428_v25 = vpop.f32.mrb[9].mxu1 }
 0x17b   :  { %v1429_v26 = vadd.f32 %v1428_v25, %v1427_v23  ;;  %v988_v27 = vadd.f32 %v1394_v24, %v918_v20 }
 0x17d   :  { %v1058_v28 = vadd.f32 %v1429_v26, %v988_v27 }
 0x17f   :  { %v1062_v29 = vsel %vm1061_vm0, %v1058_v28, -inf }
 0x180   :  { %1063 = vmax.xlane.f32.xlu0 %v1062_v29 }
 0x20d   :  { %v1064_v30 = vpop.xlane.xlu0 %1063 }
 0x20e   :  { %v1065_v31 = vsub.f32 %v1058_v28, %v1064_v30 }
 0x210   :  { %v1066_v32 = vmul.f32 1.442695, %v1065_v31 }
 0x212   :  { %1750 = vpow2.f32 %v1066_v32 }
 0x21c   :  { %v1751_v33 = vpop.eup %1750 }
 0x21d   :  { %v1068_v34 = vsel %vm1061_vm0, %v1751_v33, 0.0 }
 0x21e   :  { %1069 = vadd.xlane.f32.xlu0 %v1068_v34 }
 0x2ab   :  { %v1070_v35 = vpop.xlane.xlu0 %1069 }
 0x2ac   :  { %1752 = vlog2.f32 %v1070_v35 }
 0x2b6   :  { %v1753_v36 = vpop.eup %1752 }
 0x2b7   :  { %v1072_v37 = vmul.f32 0.6931472, %v1753_v36 }
 0x2b9   :  { %v1073_v38 = vsub.f32 %v1065_v31, %v1072_v37 }
 0x2bb   :  { %1074 = vst.msk [vmem:[%s2806_s3] sm:$0xff] %vm1061_vm0, %v1073_v38 }

</bundles_post_ra>
